<compile_context>
chip_gen: v6e
topology: v6e:2x2x1
jax: 0.10.0
libtpu: 0.0.40
codegen_flags: <defaults>
</compile_context>

<pallas_src>
import jax
import jax.numpy as jnp
from jax.experimental import pallas as pl
from jax.experimental.pallas import tpu as pltpu


LANE = 128     # TPU lane width; K and emb_dim padded to a multiple of this
SUBLANE = 8    # sublane granularity for the M (batch) tile


def _round_up(a, b):
    return ((a + b - 1) // b) * b


def _make_mlp_kernel(n_branches):
    """Build a kernel over `n_branches` activation slabs sharing one resident weight set.

    Ref layout: (x_0 .. x_{n-1}, w1, b1, w2, b2, w3, b3, o_0 .. o_{n-1})
    """

    def kernel(*refs):
        x_refs = refs[:n_branches]
        w1_ref, b1_ref, w2_ref, b2_ref, w3_ref, b3_ref = refs[n_branches:n_branches + 6]
        o_refs = refs[n_branches + 6:]
        for x_ref, o_ref in zip(x_refs, o_refs):
            # f32 -> bf16 cast done in-kernel (x read from HBM exactly once).
            x = x_ref[...].astype(jnp.bfloat16)
            # Layer 1: Linear(in_pad, 1024) + ReLU   (bf16 operands, f32 accumulate)
            h1 = jnp.dot(x, w1_ref[...], preferred_element_type=jnp.float32)
            h1 = jnp.maximum(h1 + b1_ref[...], 0.0).astype(jnp.bfloat16)
            # Layer 2: Linear(1024, 512) + ReLU
            h2 = jnp.dot(h1, w2_ref[...], preferred_element_type=jnp.float32)
            h2 = jnp.maximum(h2 + b2_ref[...], 0.0).astype(jnp.bfloat16)
            # Layer 3: Linear(512, emb_pad)  (no activation; emb padded lane-dense)
            out = jnp.dot(h2, w3_ref[...], preferred_element_type=jnp.float32)
            o_ref[...] = (out + b3_ref[...]).astype(o_ref.dtype)

    return kernel


def _backbone_forward_multi(x_list, params):
    """Run the 3-layer MLP backbone on n [M, in_size] f32 activation slabs in one call."""
    w1, b1 = params["w1"], params["b1"]
    w2, b2 = params["w2"], params["b2"]
    w3, b3 = params["w3"], params["b3"]          # w1 rows / w3,b3 cols already zero-padded
    emb_dim = params["emb_dim"]
    in_pad = w1.shape[0]
    emb_pad = w3.shape[1]

    n = len(x_list)
    M = x_list[0].shape[0]
    for x in x_list:
        assert x.shape[0] == M, "fused Siamese branches must share batch size"

    # Pad K (flattened feature dim) up to the padded weight rows; padded w1 rows are zero.
    xs = []
    for x in x_list:
        k = x.shape[1]
        if k != in_pad:
            x = jnp.pad(x, ((0, 0), (0, in_pad - k)))
        xs.append(x)

    # Batch tile: one sublane-aligned tile for small batches (no padded passes);
    # 512 rows for large batches to amortize the ~0.35 us per-grid-step overhead.
    TM = _round_up(M, SUBLANE) if M <= 512 else 512
    M_pad = _round_up(M, TM)
    if M_pad != M:
        xs = [jnp.pad(x, ((0, M_pad - M), (0, 0))) for x in xs]
    nm = M_pad // TM

    x_spec = pl.BlockSpec((TM, in_pad), lambda i: (i, 0))
    o_spec = pl.BlockSpec((TM, emb_pad), lambda i: (i, 0))
    # Weights/biases: full-array blocks with constant index_map -> VMEM-resident across tiles.
    w_spec = lambda arr: pl.BlockSpec(arr.shape, lambda i: (0, 0))

    # Megacore sharding only pays once there are enough batch tiles that MXU time
    # dominates the duplicated per-TC weight DMA (v7x: 2 TCs share HBM).
    semantics = ("parallel",) if nm >= 4 else ("arbitrary",)

    # VMEM budget from actual buffers: double-buffered x/out tiles + double-buffered
    # weights + intermediate activations, x2 headroom, clamped to [32 MiB, 64 MiB].
    bytes_weights = sum(a.size * a.dtype.itemsize for a in (w1, b1, w2, b2, w3, b3))
    bytes_tiles = n * TM * (in_pad * 4 + emb_pad * 4)
    bytes_interm = n * TM * (1024 + 512) * 4
    vmem_needed = 2 * (bytes_weights + bytes_tiles) + bytes_interm
    vmem_limit = int(min(max(2 * vmem_needed, 32 << 20), 64 << 20))

    flops = n * 2 * M_pad * (in_pad * 1024 + 1024 * 512 + 512 * emb_pad)
    bytes_accessed = (
        sum(x.size * x.dtype.itemsize for x in xs)
        + bytes_weights
        + n * M_pad * emb_pad * 4
    )

    outs = pl.pallas_call(
        _make_mlp_kernel(n),
        out_shape=tuple(
            jax.ShapeDtypeStruct((M_pad, emb_pad), jnp.float32) for _ in range(n)
        ),
        grid_spec=pltpu.PrefetchScalarGridSpec(
            num_scalar_prefetch=0,
            grid=(nm,),
            in_specs=[x_spec] * n
            + [w_spec(w1), w_spec(b1), w_spec(w2), w_spec(b2), w_spec(w3), w_spec(b3)],
            out_specs=[o_spec] * n,
        ),
        compiler_params=pltpu.CompilerParams(
            dimension_semantics=semantics,
            vmem_limit_bytes=vmem_limit,
        ),
        cost_estimate=pl.CostEstimate(
            flops=flops, transcendentals=0, bytes_accessed=bytes_accessed
        ),
    )(*xs, w1, b1, w2, b2, w3, b3)

    return [o[:M, :emb_dim] for o in outs]


def siamese_linear_forward(x, params):
    """Forward pass of SiameseNetwork (Linear backbone) on a single branch.

    x: [B, H, W] float32  (single-channel image, as implied by input_shape=(H, W))
    """
    x_flat = x.reshape(x.shape[0], -1)          # torch.flatten(x, 1); cast happens in-kernel
    return _backbone_forward_multi([x_flat], params)[0]


def siamese_linear_forward_pair(x1, x2, params):
    """Run BOTH Siamese twins in one pallas_call (weights DMA'd once, amortized over both)."""
    f1 = x1.reshape(x1.shape[0], -1)
    f2 = x2.reshape(x2.shape[0], -1)
    o1, o2 = _backbone_forward_multi([f1, f2], params)
    return o1, o2


def init_params(key, in_size, emb_dim):
    """Deterministic init matching PyTorch nn.Linear default (uniform +-1/sqrt(fan_in)).

    Weights stored transposed [in_features, out_features] in bf16; biases [1, out] in f32.
    w1 is zero-padded on its K rows and the final layer is zero-padded on the output dim,
    both up to a multiple of 128 (MXU / lane alignment); padded entries are zero.
    """

    def linear(k, fan_in, fan_out):
        kw, kb = jax.random.split(k)
        bound = 1.0 / jnp.sqrt(fan_in)
        w = jax.random.uniform(kw, (fan_in, fan_out), jnp.float32, -bound, bound)
        b = jax.random.uniform(kb, (1, fan_out), jnp.float32, -bound, bound)
        return w, b

    k1, k2, k3 = jax.random.split(key, 3)
    w1, b1 = linear(k1, in_size, 1024)
    w2, b2 = linear(k2, 1024, 512)
    w3, b3 = linear(k3, 512, emb_dim)

    in_pad = _round_up(in_size, LANE)
    emb_pad = _round_up(emb_dim, LANE)
    w1 = jnp.pad(w1, ((0, in_pad - in_size), (0, 0)))     # padded K rows are zero
    w3 = jnp.pad(w3, ((0, 0), (0, emb_pad - emb_dim)))    # padded out cols are zero
    b3 = jnp.pad(b3, ((0, 0), (0, emb_pad - emb_dim)))

    return {
        "w1": w1.astype(jnp.bfloat16), "b1": b1,
        "w2": w2.astype(jnp.bfloat16), "b2": b2,
        "w3": w3.astype(jnp.bfloat16), "b3": b3,
        "emb_dim": emb_dim, "in_size": in_size,
    }


def reference_forward(x, params):
    """Pure-JAX reference mirroring the kernel's bf16/f32 mixed precision."""
    in_size = params["in_size"]
    h = x.reshape(x.shape[0], -1).astype(jnp.bfloat16)
    h = jnp.dot(h, params["w1"][:in_size], preferred_element_type=jnp.float32) + params["b1"]
    h = jnp.maximum(h, 0.0).astype(jnp.bfloat16)
    h = jnp.dot(h, params["w2"], preferred_element_type=jnp.float32) + params["b2"]
    h = jnp.maximum(h, 0.0).astype(jnp.bfloat16)
    out = jnp.dot(h, params["w3"], preferred_element_type=jnp.float32) + params["b3"]
    return out[:, : params["emb_dim"]]


if __name__ == "__main__":
    # Small, module-consistent shapes: input_shape=(16, 16), emb_dim=32, batch=8.
    B, H, W = 8, 16, 16
    emb_dim = 32
    in_size = H * W

    key = jax.random.PRNGKey(0)
    k_x1, k_x2, k_p = jax.random.split(key, 3)
    x1 = jax.random.normal(k_x1, (B, H, W), dtype=jnp.float32)
    x2 = jax.random.normal(k_x2, (B, H, W), dtype=jnp.float32)
    params = init_params(k_p, in_size, emb_dim)

    # Both Siamese branches fused into a single kernel invocation; cast happens in-kernel.
    emb1, emb2 = siamese_linear_forward_pair(x1, x2, params)
    emb1 = jax.block_until_ready(emb1)
    emb2 = jax.block_until_ready(emb2)

    # Single-branch path (SiameseNetwork.forward) also exercised once.
    emb_single = jax.block_until_ready(siamese_linear_forward(x1, params))

    ref1 = reference_forward(x1, params)
    ref2 = reference_forward(x2, params)

    assert emb1.shape == (B, emb_dim), emb1.shape
    assert emb2.shape == (B, emb_dim), emb2.shape
    assert emb_single.shape == (B, emb_dim), emb_single.shape
    assert jnp.allclose(emb1, ref1, atol=2e-2, rtol=2e-2), "branch-1 mismatch vs reference"
    assert jnp.allclose(emb2, ref2, atol=2e-2, rtol=2e-2), "branch-2 mismatch vs reference"
    assert jnp.allclose(emb_single, ref1, atol=2e-2, rtol=2e-2), "single-branch mismatch"

    print("KERNEL_OK")
</pallas_src>

<mosaic_0001>
module attributes {stable_mosaic.version = 11 : i64} {
  func.func @kernel(%arg0: i32, %arg1: memref<8x256xf32, #tpu.memory_space<vmem>>, %arg2: memref<8x256xf32, #tpu.memory_space<vmem>>, %arg3: memref<256x1024xbf16, #tpu.memory_space<vmem>>, %arg4: memref<1x1024xf32, #tpu.memory_space<vmem>>, %arg5: memref<1024x512xbf16, #tpu.memory_space<vmem>>, %arg6: memref<1x512xf32, #tpu.memory_space<vmem>>, %arg7: memref<512x128xbf16, #tpu.memory_space<vmem>>, %arg8: memref<1x128xf32, #tpu.memory_space<vmem>>, %arg9: memref<8x128xf32, #tpu.memory_space<vmem>>, %arg10: memref<8x128xf32, #tpu.memory_space<vmem>>) attributes {dimension_semantics = [#tpu.dimension_semantics<arbitrary>], iteration_bounds = array<i64: 1>, scalar_prefetch = 0 : i64, scratch_operands = 0 : i64, tpu.core_type = #tpu.core_type<tc>, window_params = [{transform_indices = @transform_0, window_bounds = array<i64: 8, 256>}, {transform_indices = @transform_1, window_bounds = array<i64: 8, 256>}, {pipeline_mode = #tpu.pipeline_mode<synchronous>, transform_indices = @transform_2, window_bounds = array<i64: 256, 1024>}, {pipeline_mode = #tpu.pipeline_mode<synchronous>, transform_indices = @transform_3, window_bounds = array<i64: 1, 1024>}, {pipeline_mode = #tpu.pipeline_mode<synchronous>, transform_indices = @transform_4, window_bounds = array<i64: 1024, 512>}, {pipeline_mode = #tpu.pipeline_mode<synchronous>, transform_indices = @transform_5, window_bounds = array<i64: 1, 512>}, {pipeline_mode = #tpu.pipeline_mode<synchronous>, transform_indices = @transform_6, window_bounds = array<i64: 512, 128>}, {pipeline_mode = #tpu.pipeline_mode<synchronous>, transform_indices = @transform_7, window_bounds = array<i64: 1, 128>}, {transform_indices = @transform_8, window_bounds = array<i64: 8, 128>}, {transform_indices = @transform_9, window_bounds = array<i64: 8, 128>}]} {
    %c0 = arith.constant 0 : index
    %c0_0 = arith.constant 0 : index
    %0 = vector.load %arg1[%c0, %c0_0] : memref<8x256xf32, #tpu.memory_space<vmem>>, vector<8x256xf32>
    %1 = arith.truncf %0 : vector<8x256xf32> to vector<8x256xbf16>
    %c0_1 = arith.constant 0 : index
    %c0_2 = arith.constant 0 : index
    %2 = vector.load %arg3[%c0_1, %c0_2] : memref<256x1024xbf16, #tpu.memory_space<vmem>>, vector<256x1024xbf16>
    %cst = arith.constant dense<0.000000e+00> : vector<8x1024xf32>
    %3 = tpu.matmul %1, %2, %cst {dimension_numbers = #tpu.dot_dimension_numbers<[1], [0], [0], [1], [0, 0, 1, 1], [], []>} : vector<8x256xbf16>, vector<256x1024xbf16>, vector<8x1024xf32> -> vector<8x1024xf32>
    %c0_3 = arith.constant 0 : index
    %c0_4 = arith.constant 0 : index
    %4 = vector.load %arg4[%c0_3, %c0_4] : memref<1x1024xf32, #tpu.memory_space<vmem>>, vector<1x1024xf32>
    %5 = vector.broadcast %4 : vector<1x1024xf32> to vector<8x1024xf32>
    %6 = arith.addf %3, %5 : vector<8x1024xf32>
    %cst_5 = arith.constant 0.000000e+00 : f32
    %7 = vector.broadcast %cst_5 : f32 to vector<8x1024xf32>
    %8 = arith.maximumf %6, %7 : vector<8x1024xf32>
    %9 = arith.truncf %8 : vector<8x1024xf32> to vector<8x1024xbf16>
    %c0_6 = arith.constant 0 : index
    %c0_7 = arith.constant 0 : index
    %10 = vector.load %arg5[%c0_6, %c0_7] : memref<1024x512xbf16, #tpu.memory_space<vmem>>, vector<1024x512xbf16>
    %cst_8 = arith.constant dense<0.000000e+00> : vector<8x512xf32>
    %11 = tpu.matmul %9, %10, %cst_8 {dimension_numbers = #tpu.dot_dimension_numbers<[1], [0], [0], [1], [0, 0, 1, 1], [], []>} : vector<8x1024xbf16>, vector<1024x512xbf16>, vector<8x512xf32> -> vector<8x512xf32>
    %c0_9 = arith.constant 0 : index
    %c0_10 = arith.constant 0 : index
    %12 = vector.load %arg6[%c0_9, %c0_10] : memref<1x512xf32, #tpu.memory_space<vmem>>, vector<1x512xf32>
    %13 = vector.broadcast %12 : vector<1x512xf32> to vector<8x512xf32>
    %14 = arith.addf %11, %13 : vector<8x512xf32>
    %cst_11 = arith.constant 0.000000e+00 : f32
    %15 = vector.broadcast %cst_11 : f32 to vector<8x512xf32>
    %16 = arith.maximumf %14, %15 : vector<8x512xf32>
    %17 = arith.truncf %16 : vector<8x512xf32> to vector<8x512xbf16>
    %c0_12 = arith.constant 0 : index
    %c0_13 = arith.constant 0 : index
    %18 = vector.load %arg7[%c0_12, %c0_13] : memref<512x128xbf16, #tpu.memory_space<vmem>>, vector<512x128xbf16>
    %cst_14 = arith.constant dense<0.000000e+00> : vector<8x128xf32>
    %19 = tpu.matmul %17, %18, %cst_14 {dimension_numbers = #tpu.dot_dimension_numbers<[1], [0], [0], [1], [0, 0, 1, 1], [], []>} : vector<8x512xbf16>, vector<512x128xbf16>, vector<8x128xf32> -> vector<8x128xf32>
    %c0_15 = arith.constant 0 : index
    %c0_16 = arith.constant 0 : index
    %20 = vector.load %arg8[%c0_15, %c0_16] : memref<1x128xf32, #tpu.memory_space<vmem>>, vector<1x128xf32>
    %21 = vector.broadcast %20 : vector<1x128xf32> to vector<8x128xf32>
    %22 = arith.addf %19, %21 : vector<8x128xf32>
    %c0_17 = arith.constant 0 : index
    %c0_18 = arith.constant 0 : index
    %23 = vector.load %arg9[%c0_17, %c0_18] : memref<8x128xf32, #tpu.memory_space<vmem>>, vector<8x128xf32>
    tpu.vector_store %arg9[%c0_17, %c0_18], %22 {strides = array<i32>} : memref<8x128xf32, #tpu.memory_space<vmem>>, vector<8x128xf32>,
    %c0_19 = arith.constant 0 : index
    %c0_20 = arith.constant 0 : index
    %24 = vector.load %arg2[%c0_19, %c0_20] : memref<8x256xf32, #tpu.memory_space<vmem>>, vector<8x256xf32>
    %25 = arith.truncf %24 : vector<8x256xf32> to vector<8x256xbf16>
    %c0_21 = arith.constant 0 : index
    %c0_22 = arith.constant 0 : index
    %26 = vector.load %arg3[%c0_21, %c0_22] : memref<256x1024xbf16, #tpu.memory_space<vmem>>, vector<256x1024xbf16>
    %cst_23 = arith.constant dense<0.000000e+00> : vector<8x1024xf32>
    %27 = tpu.matmul %25, %26, %cst_23 {dimension_numbers = #tpu.dot_dimension_numbers<[1], [0], [0], [1], [0, 0, 1, 1], [], []>} : vector<8x256xbf16>, vector<256x1024xbf16>, vector<8x1024xf32> -> vector<8x1024xf32>
    %c0_24 = arith.constant 0 : index
    %c0_25 = arith.constant 0 : index
    %28 = vector.load %arg4[%c0_24, %c0_25] : memref<1x1024xf32, #tpu.memory_space<vmem>>, vector<1x1024xf32>
    %29 = vector.broadcast %28 : vector<1x1024xf32> to vector<8x1024xf32>
    %30 = arith.addf %27, %29 : vector<8x1024xf32>
    %cst_26 = arith.constant 0.000000e+00 : f32
    %31 = vector.broadcast %cst_26 : f32 to vector<8x1024xf32>
    %32 = arith.maximumf %30, %31 : vector<8x1024xf32>
    %33 = arith.truncf %32 : vector<8x1024xf32> to vector<8x1024xbf16>
    %c0_27 = arith.constant 0 : index
    %c0_28 = arith.constant 0 : index
    %34 = vector.load %arg5[%c0_27, %c0_28] : memref<1024x512xbf16, #tpu.memory_space<vmem>>, vector<1024x512xbf16>
    %cst_29 = arith.constant dense<0.000000e+00> : vector<8x512xf32>
    %35 = tpu.matmul %33, %34, %cst_29 {dimension_numbers = #tpu.dot_dimension_numbers<[1], [0], [0], [1], [0, 0, 1, 1], [], []>} : vector<8x1024xbf16>, vector<1024x512xbf16>, vector<8x512xf32> -> vector<8x512xf32>
    %c0_30 = arith.constant 0 : index
    %c0_31 = arith.constant 0 : index
    %36 = vector.load %arg6[%c0_30, %c0_31] : memref<1x512xf32, #tpu.memory_space<vmem>>, vector<1x512xf32>
    %37 = vector.broadcast %36 : vector<1x512xf32> to vector<8x512xf32>
    %38 = arith.addf %35, %37 : vector<8x512xf32>
    %cst_32 = arith.constant 0.000000e+00 : f32
    %39 = vector.broadcast %cst_32 : f32 to vector<8x512xf32>
    %40 = arith.maximumf %38, %39 : vector<8x512xf32>
    %41 = arith.truncf %40 : vector<8x512xf32> to vector<8x512xbf16>
    %c0_33 = arith.constant 0 : index
    %c0_34 = arith.constant 0 : index
    %42 = vector.load %arg7[%c0_33, %c0_34] : memref<512x128xbf16, #tpu.memory_space<vmem>>, vector<512x128xbf16>
    %cst_35 = arith.constant dense<0.000000e+00> : vector<8x128xf32>
    %43 = tpu.matmul %41, %42, %cst_35 {dimension_numbers = #tpu.dot_dimension_numbers<[1], [0], [0], [1], [0, 0, 1, 1], [], []>} : vector<8x512xbf16>, vector<512x128xbf16>, vector<8x128xf32> -> vector<8x128xf32>
    %c0_36 = arith.constant 0 : index
    %c0_37 = arith.constant 0 : index
    %44 = vector.load %arg8[%c0_36, %c0_37] : memref<1x128xf32, #tpu.memory_space<vmem>>, vector<1x128xf32>
    %45 = vector.broadcast %44 : vector<1x128xf32> to vector<8x128xf32>
    %46 = arith.addf %43, %45 : vector<8x128xf32>
    %c0_38 = arith.constant 0 : index
    %c0_39 = arith.constant 0 : index
    %47 = vector.load %arg10[%c0_38, %c0_39] : memref<8x128xf32, #tpu.memory_space<vmem>>, vector<8x128xf32>
    tpu.vector_store %arg10[%c0_38, %c0_39], %46 {strides = array<i32>} : memref<8x128xf32, #tpu.memory_space<vmem>>, vector<8x128xf32>,
    return
  }
  func.func @transform_0(%arg0: i32) -> (i32, i32) {
    %c0_i32 = arith.constant 0 : i32
    %c0_i32_0 = arith.constant 0 : i32
    return %arg0, %c0_i32 : i32, i32
  }
  func.func @transform_1(%arg0: i32) -> (i32, i32) {
    %c0_i32 = arith.constant 0 : i32
    %c0_i32_0 = arith.constant 0 : i32
    return %arg0, %c0_i32 : i32, i32
  }
  func.func @transform_2(%arg0: i32) -> (i32, i32) {
    %c0_i32 = arith.constant 0 : i32
    %c0_i32_0 = arith.constant 0 : i32
    %c0_i32_1 = arith.constant 0 : i32
    return %c0_i32, %c0_i32_0 : i32, i32
  }
  func.func @transform_3(%arg0: i32) -> (i32, i32) {
    %c0_i32 = arith.constant 0 : i32
    %c0_i32_0 = arith.constant 0 : i32
    %c0_i32_1 = arith.constant 0 : i32
    return %c0_i32, %c0_i32_0 : i32, i32
  }
  func.func @transform_4(%arg0: i32) -> (i32, i32) {
    %c0_i32 = arith.constant 0 : i32
    %c0_i32_0 = arith.constant 0 : i32
    %c0_i32_1 = arith.constant 0 : i32
    return %c0_i32, %c0_i32_0 : i32, i32
  }
  func.func @transform_5(%arg0: i32) -> (i32, i32) {
    %c0_i32 = arith.constant 0 : i32
    %c0_i32_0 = arith.constant 0 : i32
    %c0_i32_1 = arith.constant 0 : i32
    return %c0_i32, %c0_i32_0 : i32, i32
  }
  func.func @transform_6(%arg0: i32) -> (i32, i32) {
    %c0_i32 = arith.constant 0 : i32
    %c0_i32_0 = arith.constant 0 : i32
    %c0_i32_1 = arith.constant 0 : i32
    return %c0_i32, %c0_i32_0 : i32, i32
  }
  func.func @transform_7(%arg0: i32) -> (i32, i32) {
    %c0_i32 = arith.constant 0 : i32
    %c0_i32_0 = arith.constant 0 : i32
    %c0_i32_1 = arith.constant 0 : i32
    return %c0_i32, %c0_i32_0 : i32, i32
  }
  func.func @transform_8(%arg0: i32) -> (i32, i32) {
    %c0_i32 = arith.constant 0 : i32
    %c0_i32_0 = arith.constant 0 : i32
    return %arg0, %c0_i32 : i32, i32
  }
  func.func @transform_9(%arg0: i32) -> (i32, i32) {
    %c0_i32 = arith.constant 0 : i32
    %c0_i32_0 = arith.constant 0 : i32
    return %arg0, %c0_i32 : i32, i32
  }
}

</mosaic_0001>

<bundles_post_ra>
// kernel: tpu_custom_call.1
= control target key start
LH: loop header
LB: loop body
LE: loop exit
PB: predicated region body
PF: predicated region fallthrough
CT: control target
= control target key end

     0   :  { %15 = vsyncpa [#allocation3], 0  ;;  %s8868_s0 = inlined_call_operand.hbm [shape: f32[8,256], index: 0, kind: input, shape index: {}]   ;;  %s8869_s1 = inlined_call_operand.hbm [shape: f32[8,256], index: 1, kind: input, shape index: {}]   ;;  %s8870_s2 = inlined_call_operand.hbm [shape: bf16[256,1024], index: 2, kind: input, shape index: {}]   ;;  %s8871_s3 = inlined_call_operand.hbm [shape: f32[1,1024], index: 3, kind: input, shape index: {}]   ;;  %s8872_s4 = inlined_call_operand.hbm [shape: bf16[1024,512], index: 4, kind: input, shape index: {}]   ;;  %s8873_s5 = inlined_call_operand.vmem [shape: f32[1,512], index: 5, kind: input, shape index: {}]   ;;  %s8874_s6 = inlined_call_operand.hbm [shape: bf16[512,128], index: 6, kind: input, shape index: {}]   ;;  %s8875_s7 = inlined_call_operand.vmem [shape: f32[1,128], index: 7, kind: input, shape index: {}]   ;;  %s8876_s8 = inlined_call_operand.hbm [shape: f32[8,128], index: 8, kind: output, shape index: {0}]   ;;  %s8877_s9 = inlined_call_operand.hbm [shape: f32[8,128], index: 9, kind: output, shape index: {1}]  }
   0x1   :  { %16 = vsyncpa [#allocation6], 0 }
   0x2   :  { %17 = vsyncpa [#allocation9], 0 }
   0x3   :  { %18 = vsyncpa [#allocation12], 0 }
   0x4   :  { %19 = vsyncpa [#allocation4], 0 }
   0x5   :  { %20 = vsyncpa [#allocation15], 0  ;;  %s8546_s30 = smov [#allocation5]   ;;  %s8547_s11 = smov [#allocation8]  }
   0x6   :  { %s37_s10 = sshll.u32 %s8546_s30, 4  ;;  %s59_s12 = sshll.u32 %s8547_s11, 4  ;;  %s38_s10 = int_to_ptr.vmem [resolvable:$true] %s37_s10  ;;  %s60_s12 = int_to_ptr.vmem [resolvable:$true] %s59_s12 }
   0x7   :  { %s8382_s13 = scalar_lea.vmem %s38_s10, 256  ;;  %p8387_p1 = scmp.lt.s32.totalorder %s38_s10, %s38_s10 }
   0x8   :  { %p8383_p0 = scmp.ne.s32.totalorder %s38_s10, %s8382_s13  ;;  %p8388_p2 = scmp.lt.s32.totalorder %s8382_s13, %s8382_s13 }
   0xa   :  { %p8389_p3 = por %p8388_p2, %p8387_p1 }
   0xc   :  { %p8390_p4 = pnand %p8389_p3, %p8383_p0 }
   0xe   :  { %8393 = shalt.err (!%p8390_p4)
}
   0xf   :  { %40 = dma.hbm_to_vmem [thread:$0]  %s8869_s1, 256, %s38_s10, [#allocation6]  }
  0x10   :  { %s8402_s16 = scalar_lea.vmem %s60_s12, 128  ;;  %p8407_p6 = scmp.lt.s32.totalorder %s60_s12, %s60_s12 }
  0x11   :  { %p8403_p5 = scmp.ne.s32.totalorder %s60_s12, %s8402_s16  ;;  %p8408_p7 = scmp.lt.s32.totalorder %s8402_s16, %s8402_s16 }
  0x13   :  { %p8409_p8 = por %p8408_p7, %p8407_p6 }
  0x15   :  { %p8410_p9 = pnand %p8409_p8, %p8403_p5 }
  0x17   :  { %8413 = shalt.err (!%p8410_p9)
}
  0x18   :  { %62 = dma.hbm_to_vmem [thread:$0]  %s8871_s3, 128, %s60_s12, [#allocation9]  }
  0x19   :  { %s8548_s19 = smov [#allocation2]   ;;  %s8549_s21 = smov [#allocation7]  }
  0x1a   :  { %s27_s20 = sshll.u32 %s8548_s19, 4  ;;  %s46_s22 = sshll.u32 %s8549_s21, 4  ;;  %s28_s20 = int_to_ptr.vmem [resolvable:$true] %s27_s20  ;;  %s47_s22 = int_to_ptr.vmem [resolvable:$true] %s46_s22 }
  0x1b   :  { %s8422_s23 = scalar_lea.vmem %s28_s20, 256  ;;  %p8427_p11 = scmp.lt.s32.totalorder %s28_s20, %s28_s20 }
  0x1c   :  { %p8423_p10 = scmp.ne.s32.totalorder %s28_s20, %s8422_s23  ;;  %p8428_p12 = scmp.lt.s32.totalorder %s8422_s23, %s8422_s23 }
  0x1e   :  { %p8429_p13 = por %p8428_p12, %p8427_p11 }
  0x20   :  { %p8430_p0 = pnand %p8429_p13, %p8423_p10 }
  0x22   :  { %8433 = shalt.err (!%p8430_p0)
}
  0x23   :  { %30 = dma.hbm_to_vmem [thread:$0]  %s8868_s0, 256, %s28_s20, [#allocation3]  }
  0x24   :  { %s8442_s25 = scalar_lea.vmem %s47_s22, 16384  ;;  %p8447_p2 = scmp.lt.s32.totalorder %s47_s22, %s47_s22 }
  0x25   :  { %p8443_p1 = scmp.ne.s32.totalorder %s47_s22, %s8442_s25  ;;  %p8448_p3 = scmp.lt.s32.totalorder %s8442_s25, %s8442_s25 }
  0x27   :  { %p8449_p4 = por %p8448_p3, %p8447_p2 }
  0x29   :  { %p8450_p5 = pnand %p8449_p4, %p8443_p1 }
  0x2b   :  { %8453 = shalt.err (!%p8450_p5)
}
  0x2c   :  { %s8550_s3 = smov 512   ;;  %s8551_s26 = smov 32  }
  0x2d   :  { %52 = dma.hbm_to_vmem [thread:$0]  %s8870_s2, 16384, %s47_s22, [#allocation6], %s8550_s3, %s8550_s3, %s8551_s26  }
  0x2e   :  { %s8552_s29 = smov [#allocation10]  }
  0x2f   :  { %s68_s30 = sshll.u32 %s8552_s29, 4  ;;  %s69_s30 = int_to_ptr.vmem [resolvable:$true] %s68_s30 }
  0x30   :  { %s8462_s10 = scalar_lea.vmem %s69_s30, 32768  ;;  %p8467_p7 = scmp.lt.s32.totalorder %s69_s30, %s69_s30 }
  0x31   :  { %p8463_p6 = scmp.ne.s32.totalorder %s69_s30, %s8462_s10  ;;  %p8468_p8 = scmp.lt.s32.totalorder %s8462_s10, %s8462_s10 }
  0x33   :  { %p8469_p9 = por %p8468_p8, %p8467_p7 }
  0x35   :  { %p8470_p10 = pnand %p8469_p9, %p8463_p6 }
  0x37   :  { %8473 = shalt.err (!%p8470_p10)
}
  0x38   :  { %s8553_s0 = smov 256   ;;  %s8554_s11 = smov 16  }
  0x39   :  { %74 = dma.hbm_to_vmem [thread:$0]  %s8872_s4, 32768, %s69_s30, [#allocation9], %s8553_s0, %s8553_s0, %s8554_s11  }
  0x3a   :  { %s8555_s14 = smov [#allocation11]  }
  0x3b   :  { %s82_s15 = sshll.u32 %s8555_s14, 4  ;;  %s83_s15 = int_to_ptr.vmem [resolvable:$true] %s82_s15 }
  0x3c   :  { %s8482_s2 = scalar_lea.vmem %s83_s15, 4096  ;;  %p8487_p12 = scmp.lt.s32.totalorder %s83_s15, %s83_s15 }
  0x3d   :  { %p8483_p11 = scmp.ne.s32.totalorder %s83_s15, %s8482_s2  ;;  %p8488_p13 = scmp.lt.s32.totalorder %s8482_s2, %s8482_s2 }
  0x3f   :  { %p8489_p0 = por %p8488_p13, %p8487_p12 }
  0x41   :  { %p8490_p1 = pnand %p8489_p0, %p8483_p11 }
  0x43   :  { %8493 = shalt.err (!%p8490_p1)
}
  0x44   :  { %s8556_s16 = smov 64   ;;  %s8557_s17 = smov 4  }
  0x45   :  { %88 = dma.hbm_to_vmem [thread:$0]  %s8874_s6, 4096, %s83_s15, [#allocation12], %s8556_s16, %s8556_s16, %s8557_s17  }
  0x46   :  { %8534 = dma.done.wait [#allocation3], 256  }
  0x47   :  { %8535 = vsyncadd [#allocation3], 4294967040 }
  0x48   :  { %8536 = dma.done.wait [#allocation6], 16640  }
  0x49   :  { %8537 = vsyncadd [#allocation6], 4294950656 }
  0x4a   :  { %8538 = dma.done.wait [#allocation9], 32896  }
  0x4b   :  { %8539 = vsyncadd [#allocation9], 4294934400 }
  0x4c   :  { %8540 = dma.done.wait [#allocation12], 4096  }
  0x4d   :  { %8541 = vsyncadd [#allocation12], 4294963200  ;;  %v170_v0 = vld [vmem:[#allocation7 + $0x1c0] sm:$0xff]  ;;  %v171_v2 = vld [vmem:[#allocation7 + $0x1c8] sm:$0xff] }
  0x4e   :  { %v174_v1 = vld [vmem:[#allocation7 + $0x1e0] sm:$0xff]  ;;  %v175_v4 = vld [vmem:[#allocation7 + $0x1e8] sm:$0xff] }
  0x4f   :  { %v6663_v3 = vcombine.high %v170_v0, %v174_v1  ;;  %v6662_v5 = vcombine.low %v170_v0, %v174_v1  ;;  %v162_v6 = vld [vmem:[#allocation7 + $0x180] sm:$0xff]  ;;  %v6665_v8 = vcombine.high %v171_v2, %v175_v4  ;;  %v6664_v9 = vcombine.low %v171_v2, %v175_v4  ;;  %v163_v11 = vld [vmem:[#allocation7 + $0x188] sm:$0xff] }
  0x50   :  { %v166_v7 = vld [vmem:[#allocation7 + $0x1a0] sm:$0xff]  ;;  %v167_v12 = vld [vmem:[#allocation7 + $0x1a8] sm:$0xff] }
  0x51   :  { %v6655_v10 = vcombine.high %v162_v6, %v166_v7  ;;  %v154_v13 = vld [vmem:[#allocation7 + $0x140] sm:$0xff]  ;;  %924 = vmatprep.subr.bf16.mxu0 %v6663_v3  ;;  %v6657_v14 = vcombine.high %v163_v11, %v167_v12  ;;  %v155_v16 = vld [vmem:[#allocation7 + $0x148] sm:$0xff]  ;;  %965 = vmatprep.subr.bf16.mxu1 %v6665_v8  ;;  %v6654_v18 = vcombine.low %v162_v6, %v166_v7 }
  0x52   :  { %v158_v15 = vld [vmem:[#allocation7 + $0x160] sm:$0xff]  ;;  %v159_v17 = vld [vmem:[#allocation7 + $0x168] sm:$0xff]  ;;  %925 = vmatpush1.bf16.msra.mxu0 %v6662_v5  ;;  %966 = vmatpush1.bf16.msra.mxu1 %v6664_v9  ;;  %v6656_v19 = vcombine.low %v163_v11, %v167_v12 }
  0x53   :  { %926 = vmatprep.subr.bf16.mxu0 %v6655_v10  ;;  %v6647_v20 = vcombine.high %v154_v13, %v158_v15  ;;  %967 = vmatprep.subr.bf16.mxu1 %v6657_v14  ;;  %v6649_v21 = vcombine.high %v155_v16, %v159_v17  ;;  %v146_v22 = vld [vmem:[#allocation7 + $0x100] sm:$0xff]  ;;  %v147_v24 = vld [vmem:[#allocation7 + $0x108] sm:$0xff]  ;;  %v6646_v26 = vcombine.low %v154_v13, %v158_v15 }
  0x54   :  { %v150_v23 = vld [vmem:[#allocation7 + $0x120] sm:$0xff]  ;;  %v151_v25 = vld [vmem:[#allocation7 + $0x128] sm:$0xff]  ;;  %v6648_v27 = vcombine.low %v155_v16, %v159_v17 }
  0x55   :  { %v6639_v28 = vcombine.high %v146_v22, %v150_v23  ;;  %v6641_v29 = vcombine.high %v147_v24, %v151_v25  ;;  %v138_v30 = vld [vmem:[#allocation7 + $0xc0] sm:$0xff]  ;;  %v139_v32 = vld [vmem:[#allocation7 + $0xc8] sm:$0xff]  ;;  %v6638_v34 = vcombine.low %v146_v22, %v150_v23  ;;  %v6640_v35 = vcombine.low %v147_v24, %v151_v25 }
  0x56   :  { %927 = vmatpush1.bf16.msra.mxu0 %v6654_v18  ;;  %968 = vmatpush1.bf16.msra.mxu1 %v6656_v19  ;;  %v142_v31 = vld [vmem:[#allocation7 + $0xe0] sm:$0xff]  ;;  %v143_v33 = vld [vmem:[#allocation7 + $0xe8] sm:$0xff] }
  0x57   :  { %928 = vmatprep.subr.bf16.mxu0 %v6647_v20  ;;  %969 = vmatprep.subr.bf16.mxu1 %v6649_v21  ;;  %v6631_v36 = vcombine.high %v138_v30, %v142_v31  ;;  %v6633_v37 = vcombine.high %v139_v32, %v143_v33  ;;  %v130_v38 = vld [vmem:[#allocation7 + $0x80] sm:$0xff]  ;;  %v131_v40 = vld [vmem:[#allocation7 + $0x88] sm:$0xff]  ;;  %v6630_v42 = vcombine.low %v138_v30, %v142_v31 }
  0x58   :  { %v134_v39 = vld [vmem:[#allocation7 + $0xa0] sm:$0xff]  ;;  %v135_v41 = vld [vmem:[#allocation7 + $0xa8] sm:$0xff]  ;;  %v6632_v43 = vcombine.low %v139_v32, %v143_v33 }
  0x59   :  { %v6623_v44 = vcombine.high %v130_v38, %v134_v39  ;;  %v6625_v45 = vcombine.high %v131_v40, %v135_v41  ;;  %v122_v46 = vld [vmem:[#allocation7 + $0x40] sm:$0xff]  ;;  %v123_v48 = vld [vmem:[#allocation7 + $0x48] sm:$0xff]  ;;  %v6622_v50 = vcombine.low %v130_v38, %v134_v39  ;;  %v6624_v51 = vcombine.low %v131_v40, %v135_v41 }
  0x5a   :  { %929 = vmatpush1.bf16.msra.mxu0 %v6646_v26  ;;  %970 = vmatpush1.bf16.msra.mxu1 %v6648_v27  ;;  %v126_v47 = vld [vmem:[#allocation7 + $0x60] sm:$0xff]  ;;  %v127_v49 = vld [vmem:[#allocation7 + $0x68] sm:$0xff] }
  0x5b   :  { %930 = vmatprep.subr.bf16.mxu0 %v6639_v28  ;;  %971 = vmatprep.subr.bf16.mxu1 %v6641_v29  ;;  %v6615_v52 = vcombine.high %v122_v46, %v126_v47  ;;  %v111_v53 = vld [vmem:[#allocation2 + $0x8] sm:$0xff]  ;;  %v6617_v54 = vcombine.high %v123_v48, %v127_v49  ;;  %v114_v55 = vld [vmem:[#allocation7] sm:$0xff]  ;;  %v6614_v60 = vcombine.low %v122_v46, %v126_v47 }
  0x5c   :  { %v118_v56 = vld [vmem:[#allocation7 + $0x20] sm:$0xff]  ;;  %v8628_v57 = vpack.c.bf16 %v111_v53, %v111_v53  ;;  %v115_v58 = vld [vmem:[#allocation7 + $0x8] sm:$0xff]  ;;  %v6616_v61 = vcombine.low %v123_v48, %v127_v49 }
  0x5d   :  { %v119_v59 = vld [vmem:[#allocation7 + $0x28] sm:$0xff]  ;;  %v6607_v62 = vcombine.high %v114_v55, %v118_v56  ;;  %v234_v0 = vld [vmem:[#allocation7 + $0x3c0] sm:$0xff]  ;;  %v6606_v4 = vcombine.low %v114_v55, %v118_v56 }
  0x5e   :  { %931 = vmatpush1.bf16.msra.mxu0 %v6638_v34  ;;  %972 = vmatpush1.bf16.msra.mxu1 %v6640_v35  ;;  %v6609_v63 = vcombine.high %v115_v58, %v119_v59  ;;  %v238_v1 = vld [vmem:[#allocation7 + $0x3e0] sm:$0xff]  ;;  %v235_v2 = vld [vmem:[#allocation7 + $0x3c8] sm:$0xff]  ;;  %v6608_v5 = vcombine.low %v115_v58, %v119_v59 }
  0x5f   :  { %932 = vmatprep.subr.bf16.mxu0 %v6631_v36  ;;  %973 = vmatprep.subr.bf16.mxu1 %v6633_v37  ;;  %v239_v3 = vld [vmem:[#allocation7 + $0x3e8] sm:$0xff]  ;;  %v6727_v6 = vcombine.high %v234_v0, %v238_v1  ;;  %v226_v8 = vld [vmem:[#allocation7 + $0x380] sm:$0xff]  ;;  %v6726_v12 = vcombine.low %v234_v0, %v238_v1  ;;  %v172_v0 = vld [vmem:[#allocation7 + $0x1d0] sm:$0xff] }
  0x60   :  { %956 = vmatprep.mubr.bf16.mxu0 %v8628_v57  ;;  %997 = vmatprep.mubr.bf16.mxu1 %v8628_v57  ;;  %v6729_v7 = vcombine.high %v235_v2, %v239_v3  ;;  %v230_v9 = vld [vmem:[#allocation7 + $0x3a0] sm:$0xff]  ;;  %v227_v10 = vld [vmem:[#allocation7 + $0x388] sm:$0xff]  ;;  %v6728_v13 = vcombine.low %v235_v2, %v239_v3  ;;  %v176_v1 = vld [vmem:[#allocation7 + $0x1f0] sm:$0xff] }
  0x61   :  { %v231_v11 = vld [vmem:[#allocation7 + $0x3a8] sm:$0xff]  ;;  %v6719_v14 = vcombine.high %v226_v8, %v230_v9  ;;  %v218_v16 = vld [vmem:[#allocation7 + $0x340] sm:$0xff]  ;;  %v6718_v20 = vcombine.low %v226_v8, %v230_v9  ;;  %v173_v3 = vld [vmem:[#allocation7 + $0x1d8] sm:$0xff]  ;;  %v6667_v8 = vcombine.high %v172_v0, %v176_v1 }
  0x62   :  { %933 = vmatpush1.bf16.msra.mxu0 %v6630_v42  ;;  %974 = vmatpush1.bf16.msra.mxu1 %v6632_v43  ;;  %v6721_v15 = vcombine.high %v227_v10, %v231_v11  ;;  %v222_v17 = vld [vmem:[#allocation7 + $0x360] sm:$0xff]  ;;  %v219_v18 = vld [vmem:[#allocation7 + $0x348] sm:$0xff]  ;;  %v6720_v21 = vcombine.low %v227_v10, %v231_v11  ;;  %v164_v9 = vld [vmem:[#allocation7 + $0x190] sm:$0xff] }
  0x63   :  { %934 = vmatprep.subr.bf16.mxu0 %v6623_v44  ;;  %975 = vmatprep.subr.bf16.mxu1 %v6625_v45  ;;  %v223_v19 = vld [vmem:[#allocation7 + $0x368] sm:$0xff]  ;;  %v6711_v22 = vcombine.high %v218_v16, %v222_v17  ;;  %v210_v24 = vld [vmem:[#allocation7 + $0x300] sm:$0xff]  ;;  %v6710_v28 = vcombine.low %v218_v16, %v222_v17  ;;  %v168_v10 = vld [vmem:[#allocation7 + $0x1b0] sm:$0xff] }
  0x64   :  { %v6713_v23 = vcombine.high %v219_v18, %v223_v19  ;;  %v214_v25 = vld [vmem:[#allocation7 + $0x320] sm:$0xff]  ;;  %v211_v26 = vld [vmem:[#allocation7 + $0x308] sm:$0xff]  ;;  %v6712_v29 = vcombine.low %v219_v18, %v223_v19  ;;  %v6659_v17 = vcombine.high %v164_v9, %v168_v10  ;;  %v156_v18 = vld [vmem:[#allocation7 + $0x150] sm:$0xff] }
  0x65   :  { %v215_v27 = vld [vmem:[#allocation7 + $0x328] sm:$0xff]  ;;  %v6703_v30 = vcombine.high %v210_v24, %v214_v25  ;;  %v202_v32 = vld [vmem:[#allocation7 + $0x2c0] sm:$0xff]  ;;  %v6702_v36 = vcombine.low %v210_v24, %v214_v25  ;;  %v160_v19 = vld [vmem:[#allocation7 + $0x170] sm:$0xff] }
  0x66   :  { %935 = vmatpush1.bf16.msra.mxu0 %v6622_v50  ;;  %976 = vmatpush1.bf16.msra.mxu1 %v6624_v51  ;;  %v6705_v31 = vcombine.high %v211_v26, %v215_v27  ;;  %v206_v33 = vld [vmem:[#allocation7 + $0x2e0] sm:$0xff]  ;;  %v203_v34 = vld [vmem:[#allocation7 + $0x2c8] sm:$0xff]  ;;  %v6704_v37 = vcombine.low %v211_v26, %v215_v27  ;;  %v6651_v25 = vcombine.high %v156_v18, %v160_v19  ;;  %v148_v26 = vld [vmem:[#allocation7 + $0x110] sm:$0xff] }
  0x67   :  { %936 = vmatprep.subr.bf16.mxu0 %v6615_v52  ;;  %977 = vmatprep.subr.bf16.mxu1 %v6617_v54  ;;  %v207_v35 = vld [vmem:[#allocation7 + $0x2e8] sm:$0xff]  ;;  %v6695_v38 = vcombine.high %v202_v32, %v206_v33  ;;  %v194_v39 = vld [vmem:[#allocation7 + $0x280] sm:$0xff]  ;;  %v6694_v44 = vcombine.low %v202_v32, %v206_v33  ;;  %v152_v27 = vld [vmem:[#allocation7 + $0x130] sm:$0xff] }
  0x68   :  { %v198_v40 = vld [vmem:[#allocation7 + $0x2a0] sm:$0xff]  ;;  %v6697_v41 = vcombine.high %v203_v34, %v207_v35  ;;  %v195_v42 = vld [vmem:[#allocation7 + $0x288] sm:$0xff]  ;;  %v6696_v45 = vcombine.low %v203_v34, %v207_v35  ;;  %v6643_v33 = vcombine.high %v148_v26, %v152_v27  ;;  %v140_v34 = vld [vmem:[#allocation7 + $0xd0] sm:$0xff] }
  0x69   :  { %v199_v43 = vld [vmem:[#allocation7 + $0x2a8] sm:$0xff]  ;;  %v6687_v46 = vcombine.high %v194_v39, %v198_v40  ;;  %v186_v47 = vld [vmem:[#allocation7 + $0x240] sm:$0xff]  ;;  %v6686_v52 = vcombine.low %v194_v39, %v198_v40  ;;  %v144_v35 = vld [vmem:[#allocation7 + $0xf0] sm:$0xff]  ;;  %v6642_v39 = vcombine.low %v148_v26, %v152_v27 }
  0x6a   :  { %937 = vmatpush1.bf16.msra.mxu0 %v6614_v60  ;;  %978 = vmatpush1.bf16.msra.mxu1 %v6616_v61  ;;  %v190_v48 = vld [vmem:[#allocation7 + $0x260] sm:$0xff]  ;;  %v6689_v49 = vcombine.high %v195_v42, %v199_v43  ;;  %v187_v50 = vld [vmem:[#allocation7 + $0x248] sm:$0xff]  ;;  %v6688_v53 = vcombine.low %v195_v42, %v199_v43  ;;  %v132_v42 = vld [vmem:[#allocation7 + $0x90] sm:$0xff] }
  0x6b   :  { %938 = vmatprep.subr.bf16.mxu0 %v6607_v62  ;;  %979 = vmatprep.subr.bf16.mxu1 %v6609_v63  ;;  %v191_v51 = vld [vmem:[#allocation7 + $0x268] sm:$0xff]  ;;  %v6679_v54 = vcombine.high %v186_v47, %v190_v48  ;;  %v178_v55 = vld [vmem:[#allocation7 + $0x200] sm:$0xff]  ;;  %v6678_v61 = vcombine.low %v186_v47, %v190_v48  ;;  %v124_v47 = vld [vmem:[#allocation7 + $0x50] sm:$0xff] }
  0x6c   :  { %v182_v56 = vld [vmem:[#allocation7 + $0x220] sm:$0xff]  ;;  %v6681_v58 = vcombine.high %v187_v50, %v191_v51  ;;  %v179_v59 = vld [vmem:[#allocation7 + $0x208] sm:$0xff]  ;;  %v6680_v62 = vcombine.low %v187_v50, %v191_v51  ;;  %v128_v48 = vld [vmem:[#allocation7 + $0x70] sm:$0xff] }
  0x6d   :  { %v183_v60 = vld [vmem:[#allocation7 + $0x228] sm:$0xff]  ;;  %v6671_v63 = vcombine.high %v178_v55, %v182_v56  ;;  %v125_v51 = vld [vmem:[#allocation7 + $0x58] sm:$0xff]  ;;  %v216_v26 = vld [vmem:[#allocation7 + $0x330] sm:$0xff] }
  0x6e   :  { %939 = vmatpush1.bf16.msra.mxu0 %v6606_v4  ;;  %980 = vmatpush1.bf16.msra.mxu1 %v6608_v5  ;;  %v6673_v2 = vcombine.high %v179_v59, %v183_v60  ;;  %v177_v4 = vld [vmem:[#allocation7 + $0x1f8] sm:$0xff]  ;;  %v6670_v5 = vcombine.low %v178_v55, %v182_v56  ;;  %v116_v55 = vld [vmem:[#allocation7 + $0x10] sm:$0xff] }
  0x6f   :  { %940 = vmatprep.subr.bf16.mxu0 %v6727_v6  ;;  %981 = vmatprep.subr.bf16.mxu1 %v6729_v7  ;;  %v110_v6 = vld [vmem:[#allocation2] sm:$0xff]  ;;  %v6672_v7 = vcombine.low %v179_v59, %v183_v60  ;;  %v6669_v11 = vcombine.high %v173_v3, %v177_v4  ;;  %v6668_v16 = vcombine.low %v173_v3, %v177_v4  ;;  %v120_v56 = vld [vmem:[#allocation7 + $0x30] sm:$0xff]  ;;  %v117_v60 = vld [vmem:[#allocation7 + $0x18] sm:$0xff] }
  0x70   :  { %v6619_v59 = vcombine.high %v124_v47, %v128_v48  ;;  %v6611_v3 = vcombine.high %v116_v55, %v120_v56  ;;  %v237_v4 = vld [vmem:[#allocation7 + $0x3d8] sm:$0xff] }
  0x72   :  { %941 = vmatpush2.bf16.msra.mxu0 %v6726_v12  ;;  %982 = vmatpush2.bf16.msra.mxu1 %v6728_v13  ;;  %v165_v12 = vld [vmem:[#allocation7 + $0x198] sm:$0xff]  ;;  %v8632_v13 = vpack.c.bf16 %v110_v6, %v110_v6 }
  0x73   :  { %942 = vmatprep.subr.bf16.mxu0 %v6719_v14  ;;  %983 = vmatprep.subr.bf16.mxu1 %v6721_v15  ;;  %v169_v14 = vld [vmem:[#allocation7 + $0x1b8] sm:$0xff]  ;;  %v6666_v15 = vcombine.low %v172_v0, %v176_v1  ;;  %v236_v0 = vld [vmem:[#allocation7 + $0x3d0] sm:$0xff] }
  0x74   :  { %v6660_v24 = vcombine.low %v165_v12, %v169_v14  ;;  %v240_v1 = vld [vmem:[#allocation7 + $0x3f0] sm:$0xff] }
  0x76   :  { %943 = vmatpush2.bf16.msra.mxu0 %v6718_v20  ;;  %984 = vmatpush2.bf16.msra.mxu1 %v6720_v21  ;;  %v6661_v20 = vcombine.high %v165_v12, %v169_v14  ;;  %v157_v21 = vld [vmem:[#allocation7 + $0x158] sm:$0xff] }
  0x77   :  { %944 = vmatprep.subr.bf16.mxu0 %v6711_v22  ;;  %985 = vmatprep.subr.bf16.mxu1 %v6713_v23  ;;  %v161_v22 = vld [vmem:[#allocation7 + $0x178] sm:$0xff]  ;;  %v6658_v23 = vcombine.low %v164_v9, %v168_v10  ;;  %v232_v9 = vld [vmem:[#allocation7 + $0x3b0] sm:$0xff] }
  0x78   :  { %v6652_v32 = vcombine.low %v157_v21, %v161_v22  ;;  %v229_v12 = vld [vmem:[#allocation7 + $0x398] sm:$0xff] }
  0x79   :  { %v233_v14 = vld [vmem:[#allocation7 + $0x3b8] sm:$0xff] }
  0x7a   :  { %945 = vmatpush2.bf16.msra.mxu0 %v6710_v28  ;;  %986 = vmatpush2.bf16.msra.mxu1 %v6712_v29  ;;  %v6653_v28 = vcombine.high %v157_v21, %v161_v22  ;;  %v149_v29 = vld [vmem:[#allocation7 + $0x118] sm:$0xff]  ;;  %v6724_v27 = vcombine.low %v229_v12, %v233_v14 }
  0x7b   :  { %946 = vmatprep.subr.bf16.mxu0 %v6703_v30  ;;  %987 = vmatprep.subr.bf16.mxu1 %v6705_v31  ;;  %v153_v30 = vld [vmem:[#allocation7 + $0x138] sm:$0xff]  ;;  %v6650_v31 = vcombine.low %v156_v18, %v160_v19  ;;  %v224_v18 = vld [vmem:[#allocation7 + $0x370] sm:$0xff] }
  0x7c   :  { %v6644_v40 = vcombine.low %v149_v29, %v153_v30  ;;  %v221_v21 = vld [vmem:[#allocation7 + $0x358] sm:$0xff] }
  0x7d   :  { %v225_v22 = vld [vmem:[#allocation7 + $0x378] sm:$0xff] }
  0x7e   :  { %947 = vmatpush2.bf16.msra.mxu0 %v6702_v36  ;;  %988 = vmatpush2.bf16.msra.mxu1 %v6704_v37  ;;  %v6645_v36 = vcombine.high %v149_v29, %v153_v30  ;;  %v141_v37 = vld [vmem:[#allocation7 + $0xd8] sm:$0xff] }
  0x7f   :  { %948 = vmatprep.subr.bf16.mxu0 %v6695_v38  ;;  %989 = vmatprep.subr.bf16.mxu1 %v6697_v41  ;;  %v145_v38 = vld [vmem:[#allocation7 + $0xf8] sm:$0xff]  ;;  %v6635_v41 = vcombine.high %v140_v34, %v144_v35 }
  0x80   :  { %v6637_v43 = vcombine.high %v141_v37, %v145_v38  ;;  %v213_v29 = vld [vmem:[#allocation7 + $0x318] sm:$0xff] }
  0x81   :  { %v217_v30 = vld [vmem:[#allocation7 + $0x338] sm:$0xff] }
  0x82   :  { %949 = vmatpush2.bf16.msra.mxu0 %v6694_v44  ;;  %990 = vmatpush2.bf16.msra.mxu1 %v6696_v45  ;;  %v133_v44 = vld [vmem:[#allocation7 + $0x98] sm:$0xff] }
  0x83   :  { %950 = vmatprep.subr.bf16.mxu0 %v6687_v46  ;;  %991 = vmatprep.subr.bf16.mxu1 %v6689_v49  ;;  %v137_v45 = vld [vmem:[#allocation7 + $0xb8] sm:$0xff]  ;;  %v6634_v46 = vcombine.low %v140_v34, %v144_v35  ;;  %v6636_v49 = vcombine.low %v141_v37, %v145_v38  ;;  %v208_v34 = vld [vmem:[#allocation7 + $0x2f0] sm:$0xff]  ;;  %v6716_v35 = vcombine.low %v221_v21, %v225_v22 }
  0x84   :  { %v205_v37 = vld [vmem:[#allocation7 + $0x2d8] sm:$0xff] }
  0x85   :  { %v209_v38 = vld [vmem:[#allocation7 + $0x2f8] sm:$0xff] }
  0x86   :  { %951 = vmatpush2.bf16.msra.mxu0 %v6686_v52  ;;  %992 = vmatpush2.bf16.msra.mxu1 %v6688_v53  ;;  %v129_v52 = vld [vmem:[#allocation7 + $0x78] sm:$0xff]  ;;  %v6629_v53 = vcombine.high %v133_v44, %v137_v45 }
  0x87   :  { %952 = vmatprep.subr.bf16.mxu0 %v6679_v54  ;;  %993 = vmatprep.subr.bf16.mxu1 %v6681_v58  ;;  %v6628_v58 = vcombine.low %v133_v44, %v137_v45  ;;  %v197_v44 = vld [vmem:[#allocation7 + $0x298] sm:$0xff] }
  0x88   :  { %v201_v45 = vld [vmem:[#allocation7 + $0x2b8] sm:$0xff] }
  0x8a   :  { %953 = vmatpush2.bf16.msra.mxu0 %v6678_v61  ;;  %994 = vmatpush2.bf16.msra.mxu1 %v6680_v62  ;;  %v121_v61 = vld [vmem:[#allocation7 + $0x38] sm:$0xff]  ;;  %v6621_v62 = vcombine.high %v125_v51, %v129_v52 }
  0x8b   :  { %954 = vmatprep.subr.bf16.mxu0 %v6671_v63  ;;  %995 = vmatprep.subr.bf16.mxu1 %v6673_v2  ;;  %v6618_v63 = vcombine.low %v124_v47, %v128_v48  ;;  %v6620_v2 = vcombine.low %v125_v51, %v129_v52  ;;  %v6613_v6 = vcombine.high %v117_v60, %v121_v61  ;;  %v188_v48 = vld [vmem:[#allocation7 + $0x250] sm:$0xff]  ;;  %v189_v52 = vld [vmem:[#allocation7 + $0x258] sm:$0xff] }
  0x8c   :  { %v6612_v10 = vcombine.low %v117_v60, %v121_v61  ;;  %v181_v61 = vld [vmem:[#allocation7 + $0x218] sm:$0xff] }
  0x8e   :  { %955 = vmatpush2.bf16.msra.mxu0 %v6670_v5  ;;  %996 = vmatpush2.bf16.msra.mxu1 %v6672_v7  ;;  %v241_v5 = vld [vmem:[#allocation7 + $0x3f8] sm:$0xff]  ;;  %v6610_v7 = vcombine.low %v116_v55, %v120_v56  ;;  %v180_v56 = vld [vmem:[#allocation7 + $0x210] sm:$0xff] }
  0x8f   :  { %1006 = vmatprep.subr.bf16.mxu0 %v6667_v8  ;;  %1047 = vmatprep.subr.bf16.mxu1 %v6669_v11  ;;  %v228_v8 = vld [vmem:[#allocation7 + $0x390] sm:$0xff]  ;;  %v6731_v11 = vcombine.high %v236_v0, %v240_v1  ;;  %v6732_v19 = vcombine.low %v237_v4, %v241_v5 }
  0x91   :  { %957 = vmatmul.mubr.bf16.vlgmr.msra.gmra.mxu0 %v8632_v13  ;;  %998 = vmatmul.mubr.bf16.vlgmr.msra.gmra.mxu1 %v8632_v13 }
  0x92   :  { %1007 = vmatpush1.bf16.msra.mxu0 %v6666_v15  ;;  %1048 = vmatpush1.bf16.msra.mxu1 %v6668_v16  ;;  %v6733_v15 = vcombine.high %v237_v4, %v241_v5  ;;  %v6730_v16 = vcombine.low %v236_v0, %v240_v1  ;;  %v7544_v4 = vld [vmem:[#allocation10 + $0xe4] ss:$16 sps:$4 sm:$0xff]  }
  0x93   :  { %1008 = vmatprep.subr.bf16.mxu0 %v6659_v17  ;;  %1049 = vmatprep.subr.bf16.mxu1 %v6661_v20  ;;  %v220_v17 = vld [vmem:[#allocation7 + $0x350] sm:$0xff]  ;;  %v6723_v20 = vcombine.high %v228_v8, %v232_v9 }
  0x94   :  { %1038 = vmatprep.mubr.bf16.mxu0 %v8628_v57  ;;  %1079 = vmatprep.mubr.bf16.mxu1 %v8628_v57  ;;  %v136_v57 = vld [vmem:[#allocation7 + $0xb0] sm:$0xff] }
  0x95   :  { %v6627_v50 = vcombine.high %v132_v42, %v136_v57  ;;  %v6626_v54 = vcombine.low %v132_v42, %v136_v57  ;;  %v200_v42 = vld [vmem:[#allocation7 + $0x2b0] sm:$0xff]  ;;  %v6708_v57 = vcombine.low %v213_v29, %v217_v30 }
  0x96   :  { %1009 = vmatpush1.bf16.msra.mxu0 %v6658_v23  ;;  %1050 = vmatpush1.bf16.msra.mxu1 %v6660_v24  ;;  %v6725_v23 = vcombine.high %v229_v12, %v233_v14  ;;  %v6722_v24 = vcombine.low %v228_v8, %v232_v9  ;;  %v7542_v8 = vld [vmem:[#allocation10 + $0xe0] ss:$16 sps:$4 sm:$0xff]  }
  0x97   :  { %1010 = vmatprep.subr.bf16.mxu0 %v6651_v25  ;;  %1051 = vmatprep.subr.bf16.mxu1 %v6653_v28  ;;  %v212_v25 = vld [vmem:[#allocation7 + $0x310] sm:$0xff]  ;;  %v6715_v28 = vcombine.high %v220_v17, %v224_v18  ;;  %v7545_v9 = vld [vmem:[#allocation10 + $0x2e0] ss:$16 sps:$4 sm:$0xff]  }
  0x98   :  { %v7548_v12 = vld [vmem:[#allocation10 + $0xc0] ss:$16 sps:$4 sm:$0xff]  }
  0x99   :  { %v7551_v14 = vld [vmem:[#allocation10 + $0x2c0] ss:$16 sps:$4 sm:$0xff]  }
  0x9a   :  { %1011 = vmatpush1.bf16.msra.mxu0 %v6650_v31  ;;  %1052 = vmatpush1.bf16.msra.mxu1 %v6652_v32  ;;  %v6717_v31 = vcombine.high %v221_v21, %v225_v22  ;;  %v6714_v32 = vcombine.low %v220_v17, %v224_v18  ;;  %v7554_v17 = vld [vmem:[#allocation10 + $0xa0] ss:$16 sps:$4 sm:$0xff]  }
  0x9b   :  { %1012 = vmatprep.subr.bf16.mxu0 %v6643_v33  ;;  %1053 = vmatprep.subr.bf16.mxu1 %v6645_v36  ;;  %v204_v33 = vld [vmem:[#allocation7 + $0x2d0] sm:$0xff]  ;;  %v6707_v36 = vcombine.high %v212_v25, %v216_v26  ;;  %v7557_v18 = vld [vmem:[#allocation10 + $0x2a0] ss:$16 sps:$4 sm:$0xff]  }
  0x9c   :  { %v6698_v47 = vcombine.low %v204_v33, %v208_v34  ;;  %v7560_v21 = vld [vmem:[#allocation10 + $0x80] ss:$16 sps:$4 sm:$0xff]  }
  0x9d   :  { %v7563_v22 = vld [vmem:[#allocation10 + $0x280] ss:$16 sps:$4 sm:$0xff]  }
  0x9e   :  { %1013 = vmatpush1.bf16.msra.mxu0 %v6642_v39  ;;  %1054 = vmatpush1.bf16.msra.mxu1 %v6644_v40  ;;  %v6709_v39 = vcombine.high %v213_v29, %v217_v30  ;;  %v6706_v40 = vcombine.low %v212_v25, %v216_v26  ;;  %v7569_v25 = vld [vmem:[#allocation10 + $0x260] ss:$16 sps:$4 sm:$0xff]   ;;  %v7574_v26 = vld [vmem:[#allocation10 + $0x44] ss:$16 sps:$4 sm:$0xff]  }
  0x9f   :  { %1014 = vmatprep.subr.bf16.mxu0 %v6635_v41  ;;  %1055 = vmatprep.subr.bf16.mxu1 %v6637_v43  ;;  %v196_v41 = vld [vmem:[#allocation7 + $0x290] sm:$0xff]  ;;  %v6699_v43 = vcombine.high %v204_v33, %v208_v34  ;;  %v7575_v29 = vld [vmem:[#allocation10 + $0x240] ss:$16 sps:$4 sm:$0xff]   ;;  %v7580_v30 = vld [vmem:[#allocation10 + $0x24] ss:$16 sps:$4 sm:$0xff]  }
  0xa0   :  { %v6691_v51 = vcombine.high %v196_v41, %v200_v42  ;;  %v6690_v55 = vcombine.low %v196_v41, %v200_v42  ;;  %v7581_v33 = vld [vmem:[#allocation10 + $0x220] ss:$16 sps:$4 sm:$0xff]   ;;  %v7586_v34 = vld [vmem:[#allocation10 + $0x4] ss:$16 sps:$4 sm:$0xff]  }
  0xa1   :  { %v7593_v41 = vld [vmem:[#allocation10 + $0x3e0] ss:$16 sps:$4 sm:$0xff]   ;;  %v7598_v42 = vld [vmem:[#allocation10 + $0x1c4] ss:$16 sps:$4 sm:$0xff]  }
  0xa2   :  { %1015 = vmatpush1.bf16.msra.mxu0 %v6634_v46  ;;  %1056 = vmatpush1.bf16.msra.mxu1 %v6636_v49  ;;  %v6701_v46 = vcombine.high %v205_v37, %v209_v38  ;;  %v192_v49 = vld [vmem:[#allocation7 + $0x270] sm:$0xff] }
  0xa3   :  { %1016 = vmatprep.subr.bf16.mxu0 %v6627_v50  ;;  %1057 = vmatprep.subr.bf16.mxu1 %v6629_v53  ;;  %v6700_v50 = vcombine.low %v205_v37, %v209_v38  ;;  %v193_v53 = vld [vmem:[#allocation7 + $0x278] sm:$0xff]  ;;  %v6683_v60 = vcombine.high %v188_v48, %v192_v49  ;;  %v6682_v0 = vcombine.low %v188_v48, %v192_v49 }
  0xa4   :  { %v6684_v1 = vcombine.low %v189_v52, %v193_v53  ;;  %v7587_v37 = vld [vmem:[#allocation10 + $0x200] ss:$16 sps:$4 sm:$0xff]   ;;  %v7592_v38 = vld [vmem:[#allocation10 + $0x1e4] ss:$16 sps:$4 sm:$0xff]  }
  0xa5   :  { %v7605_v48 = vld [vmem:[#allocation10 + $0x3a0] ss:$16 sps:$4 sm:$0xff]   ;;  %v7610_v49 = vld [vmem:[#allocation10 + $0x184] ss:$16 sps:$4 sm:$0xff]  }
  0xa6   :  { %1017 = vmatpush1.bf16.msra.mxu0 %v6626_v54  ;;  %1058 = vmatpush1.bf16.msra.mxu1 %v6628_v58  ;;  %v6693_v54 = vcombine.high %v197_v44, %v201_v45  ;;  %v184_v58 = vld [vmem:[#allocation7 + $0x230] sm:$0xff] }
  0xa7   :  { %1018 = vmatprep.subr.bf16.mxu0 %v6619_v59  ;;  %1059 = vmatprep.subr.bf16.mxu1 %v6621_v62  ;;  %v6692_v59 = vcombine.low %v197_v44, %v201_v45  ;;  %v185_v62 = vld [vmem:[#allocation7 + $0x238] sm:$0xff]  ;;  %v6674_v5 = vcombine.low %v180_v56, %v184_v58 }
  0xa8   :  { %v7599_v44 = vld [vmem:[#allocation10 + $0x3c0] ss:$16 sps:$4 sm:$0xff]   ;;  %v7604_v45 = vld [vmem:[#allocation10 + $0x1a4] ss:$16 sps:$4 sm:$0xff]  }
  0xaa   :  { %1019 = vmatpush1.bf16.msra.mxu0 %v6618_v63  ;;  %1060 = vmatpush1.bf16.msra.mxu1 %v6620_v2  ;;  %v6685_v63 = vcombine.high %v189_v52, %v193_v53  ;;  %v6675_v2 = vcombine.high %v180_v56, %v184_v58  ;;  %v7611_v52 = vld [vmem:[#allocation10 + $0x380] ss:$16 sps:$4 sm:$0xff]   ;;  %v7616_v53 = vld [vmem:[#allocation10 + $0x164] ss:$16 sps:$4 sm:$0xff]  }
  0xab   :  { %1020 = vmatprep.subr.bf16.mxu0 %v6611_v3  ;;  %1061 = vmatprep.subr.bf16.mxu1 %v6613_v6  ;;  %v6677_v3 = vcombine.high %v181_v61, %v185_v62  ;;  %v7547_v6 = vld [vmem:[#allocation10 + $0x2e4] ss:$16 sps:$4 sm:$0xff]   ;;  %v7617_v56 = vld [vmem:[#allocation10 + $0x360] ss:$16 sps:$4 sm:$0xff]  }
  0xac   :  { %v7622_v58 = vld [vmem:[#allocation10 + $0x144] ss:$16 sps:$4 sm:$0xff]  }
  0xae   :  { %1021 = vmatpush1.bf16.msra.mxu0 %v6610_v7  ;;  %1062 = vmatpush1.bf16.msra.mxu1 %v6612_v10  ;;  %v6676_v7 = vcombine.low %v181_v61, %v185_v62  ;;  %v7550_v10 = vld [vmem:[#allocation10 + $0xc4] ss:$16 sps:$4 sm:$0xff]   ;;  %v7623_v61 = vld [vmem:[#allocation10 + $0x340] ss:$16 sps:$4 sm:$0xff]  }
  0xaf   :  { %1022 = vmatprep.subr.bf16.mxu0 %v6731_v11  ;;  %1063 = vmatprep.subr.bf16.mxu1 %v6733_v15  ;;  %v7553_v11 = vld [vmem:[#allocation10 + $0x2c4] ss:$16 sps:$4 sm:$0xff]  }
  0xb0   :  { %v7556_v15 = vld [vmem:[#allocation10 + $0xa4] ss:$16 sps:$4 sm:$0xff]  }
  0xb1   :  { %v7628_v62 = vld [vmem:[#allocation10 + $0x124] ss:$16 sps:$4 sm:$0xff]  }
  0xb2   :  { %1023 = vmatpush2.bf16.msra.mxu0 %v6730_v16  ;;  %1064 = vmatpush2.bf16.msra.mxu1 %v6732_v19  ;;  %v7559_v16 = vld [vmem:[#allocation10 + $0x2a4] ss:$16 sps:$4 sm:$0xff]  }
  0xb3   :  { %1024 = vmatprep.subr.bf16.mxu0 %v6723_v20  ;;  %1065 = vmatprep.subr.bf16.mxu1 %v6725_v23  ;;  %v7562_v19 = vld [vmem:[#allocation10 + $0x84] ss:$16 sps:$4 sm:$0xff]  }
  0xb4   :  { %v7565_v20 = vld [vmem:[#allocation10 + $0x284] ss:$16 sps:$4 sm:$0xff]  }
  0xb5   :  { %v7568_v23 = vld [vmem:[#allocation10 + $0x64] ss:$16 sps:$4 sm:$0xff]  }
  0xb6   :  { %1025 = vmatpush2.bf16.msra.mxu0 %v6722_v24  ;;  %1066 = vmatpush2.bf16.msra.mxu1 %v6724_v27  ;;  %v7571_v24 = vld [vmem:[#allocation10 + $0x264] ss:$16 sps:$4 sm:$0xff]  }
  0xb7   :  { %1026 = vmatprep.subr.bf16.mxu0 %v6715_v28  ;;  %1067 = vmatprep.subr.bf16.mxu1 %v6717_v31  ;;  %v7577_v27 = vld [vmem:[#allocation10 + $0x244] ss:$16 sps:$4 sm:$0xff]   ;;  %v7572_v28 = vld [vmem:[#allocation10 + $0x40] ss:$16 sps:$4 sm:$0xff]  }
  0xb8   :  { %v7583_v31 = vld [vmem:[#allocation10 + $0x224] ss:$16 sps:$4 sm:$0xff]  }
  0xba   :  { %1027 = vmatpush2.bf16.msra.mxu0 %v6714_v32  ;;  %1068 = vmatpush2.bf16.msra.mxu1 %v6716_v35  ;;  %v7578_v32 = vld [vmem:[#allocation10 + $0x20] ss:$16 sps:$4 sm:$0xff]   ;;  %v7589_v35 = vld [vmem:[#allocation10 + $0x204] ss:$16 sps:$4 sm:$0xff]  }
  0xbb   :  { %1028 = vmatprep.subr.bf16.mxu0 %v6707_v36  ;;  %1069 = vmatprep.subr.bf16.mxu1 %v6709_v39  ;;  %v7584_v36 = vld [vmem:[#allocation10] ss:$16 sps:$4 sm:$0xff]   ;;  %v7595_v39 = vld [vmem:[#allocation10 + $0x3e4] ss:$16 sps:$4 sm:$0xff]  }
  0xbe   :  { %1029 = vmatpush2.bf16.msra.mxu0 %v6706_v40  ;;  %1070 = vmatpush2.bf16.msra.mxu1 %v6708_v57  ;;  %v7590_v40 = vld [vmem:[#allocation10 + $0x1e0] ss:$16 sps:$4 sm:$0xff]   ;;  %v7601_v57 = vld [vmem:[#allocation10 + $0x3c4] ss:$16 sps:$4 sm:$0xff]  }
  0xbf   :  { %1030 = vmatprep.subr.bf16.mxu0 %v6699_v43  ;;  %1071 = vmatprep.subr.bf16.mxu1 %v6701_v46  ;;  %v7596_v43 = vld [vmem:[#allocation10 + $0x1c0] ss:$16 sps:$4 sm:$0xff]   ;;  %v7607_v46 = vld [vmem:[#allocation10 + $0x3a4] ss:$16 sps:$4 sm:$0xff]  }
  0xc2   :  { %1031 = vmatpush2.bf16.msra.mxu0 %v6698_v47  ;;  %1072 = vmatpush2.bf16.msra.mxu1 %v6700_v50  ;;  %v7602_v47 = vld [vmem:[#allocation10 + $0x1a0] ss:$16 sps:$4 sm:$0xff]   ;;  %v7613_v50 = vld [vmem:[#allocation10 + $0x384] ss:$16 sps:$4 sm:$0xff]  }
  0xc3   :  { %1032 = vmatprep.subr.bf16.mxu0 %v6691_v51  ;;  %1073 = vmatprep.subr.bf16.mxu1 %v6693_v54  ;;  %v7608_v51 = vld [vmem:[#allocation10 + $0x180] ss:$16 sps:$4 sm:$0xff]   ;;  %v7619_v54 = vld [vmem:[#allocation10 + $0x364] ss:$16 sps:$4 sm:$0xff]  }
  0xc6   :  { %1033 = vmatpush2.bf16.msra.mxu0 %v6690_v55  ;;  %1074 = vmatpush2.bf16.msra.mxu1 %v6692_v59  ;;  %v7614_v55 = vld [vmem:[#allocation10 + $0x160] ss:$16 sps:$4 sm:$0xff]   ;;  %v7625_v59 = vld [vmem:[#allocation10 + $0x344] ss:$16 sps:$4 sm:$0xff]  }
  0xc7   :  { %1034 = vmatprep.subr.bf16.mxu0 %v6683_v60  ;;  %1075 = vmatprep.subr.bf16.mxu1 %v6685_v63  ;;  %v7620_v60 = vld [vmem:[#allocation10 + $0x140] ss:$16 sps:$4 sm:$0xff]   ;;  %v7631_v63 = vld [vmem:[#allocation10 + $0x324] ss:$16 sps:$4 sm:$0xff]  }
  0xca   :  { %1035 = vmatpush2.bf16.msra.mxu0 %v6682_v0  ;;  %1076 = vmatpush2.bf16.msra.mxu1 %v6684_v1  ;;  %v7626_v0 = vld [vmem:[#allocation10 + $0x120] ss:$16 sps:$4 sm:$0xff]  }
  0xcb   :  { %1036 = vmatprep.subr.bf16.mxu0 %v6675_v2  ;;  %1077 = vmatprep.subr.bf16.mxu1 %v6677_v3  ;;  %v7629_v1 = vld [vmem:[#allocation10 + $0x320] ss:$16 sps:$4 sm:$0xff]   ;;  %v7634_v2 = vld [vmem:[#allocation10 + $0x104] ss:$16 sps:$4 sm:$0xff]  }
  0xcc   :  { %v7637_v3 = vld [vmem:[#allocation10 + $0x304] ss:$16 sps:$4 sm:$0xff]  }
  0xce   :  { %1037 = vmatpush2.bf16.msra.mxu0 %v6674_v5  ;;  %1078 = vmatpush2.bf16.msra.mxu1 %v6676_v7  ;;  %v7635_v5 = vld [vmem:[#allocation10 + $0x300] ss:$16 sps:$4 sm:$0xff]   ;;  %v7643_v7 = vld [vmem:[#allocation10 + $0x6e4] ss:$16 sps:$4 sm:$0xff]  }
  0xcf   :  { %2662 = vmatprep.subr.bf16.mxu0 %v7544_v4  ;;  %2703 = vmatprep.subr.bf16.mxu1 %v7547_v6  ;;  %v7632_v4 = vld [vmem:[#allocation10 + $0x100] ss:$16 sps:$4 sm:$0xff]   ;;  %v7640_v6 = vld [vmem:[#allocation10 + $0x4e4] ss:$16 sps:$4 sm:$0xff]  }
  0xd1   :  { %1039 = vmatmul.mubr.bf16.vlgmr.msra.gmra.mxu0 %v8632_v13  ;;  %1080 = vmatmul.mubr.bf16.vlgmr.msra.gmra.mxu1 %v8632_v13  ;;  %v7566_v13 = vld [vmem:[#allocation10 + $0x60] ss:$16 sps:$4 sm:$0xff]  }
  0xd2   :  { %2663 = vmatpush1.bf16.msra.mxu0 %v7542_v8  ;;  %2704 = vmatpush1.bf16.msra.mxu1 %v7545_v9  ;;  %v244_v8 = vlaneseq }
  0xd3   :  { %2664 = vmatprep.subr.bf16.mxu0 %v7550_v10  ;;  %2705 = vmatprep.subr.bf16.mxu1 %v7553_v11  ;;  %v8642_v10 = vld [vmem:[#allocation8] sm:$0xff] }
  0xd4   :  { %v8640_v9 = vshrl.u32 %v244_v8, 7  ;;  %v7689_v8 = vld [vmem:[#allocation10 + $0x7e0] ss:$16 sps:$4 sm:$0xff]  }
  0xd6   :  { %2665 = vmatpush1.bf16.msra.mxu0 %v7548_v12  ;;  %2706 = vmatpush1.bf16.msra.mxu1 %v7551_v14  ;;  %v8645_v11 = vsub.s32 0, %v8640_v9  ;;  %v8648_v12 = vsub.s32 2, %v8640_v9  ;;  %v8651_v14 = vsub.s32 1, %v8640_v9 }
  0xd7   :  { %2666 = vmatprep.subr.bf16.mxu0 %v7556_v15  ;;  %2707 = vmatprep.subr.bf16.mxu1 %v7559_v16  ;;  %v8654_v15 = vsub.s32 3, %v8640_v9 }
  0xd8   :  { %v247_v16 = vrot.slane %v8642_v10, %v8645_v11 }
  0xda   :  { %2667 = vmatpush1.bf16.msra.mxu0 %v7554_v17  ;;  %2708 = vmatpush1.bf16.msra.mxu1 %v7557_v18  ;;  %v255_v17 = vrot.slane %v8642_v10, %v8648_v12  ;;  %v251_v18 = vrot.slane %v8642_v10, %v8651_v14 }
  0xdb   :  { %2668 = vmatprep.subr.bf16.mxu0 %v7562_v19  ;;  %2709 = vmatprep.subr.bf16.mxu1 %v7565_v20  ;;  %v259_v20 = vrot.slane %v8642_v10, %v8654_v15 }
  0xde   :  { %2669 = vmatpush1.bf16.msra.mxu0 %v7560_v21  ;;  %2710 = vmatpush1.bf16.msra.mxu1 %v7563_v22 }
  0xdf   :  { %2670 = vmatprep.subr.bf16.mxu0 %v7568_v23  ;;  %2711 = vmatprep.subr.bf16.mxu1 %v7571_v24 }
  0xe2   :  { %2671 = vmatpush1.bf16.msra.mxu0 %v7566_v13  ;;  %2712 = vmatpush1.bf16.msra.mxu1 %v7569_v25 }
  0xe3   :  { %2672 = vmatprep.subr.bf16.mxu0 %v7574_v26  ;;  %2713 = vmatprep.subr.bf16.mxu1 %v7577_v27 }
  0xe6   :  { %2673 = vmatpush1.bf16.msra.mxu0 %v7572_v28  ;;  %2714 = vmatpush1.bf16.msra.mxu1 %v7575_v29 }
  0xe7   :  { %2674 = vmatprep.subr.bf16.mxu0 %v7580_v30  ;;  %2715 = vmatprep.subr.bf16.mxu1 %v7583_v31 }
  0xea   :  { %2675 = vmatpush1.bf16.msra.mxu0 %v7578_v32  ;;  %2716 = vmatpush1.bf16.msra.mxu1 %v7581_v33  ;;  %v7638_v32 = vld [vmem:[#allocation10 + $0x4e0] ss:$16 sps:$4 sm:$0xff]  }
  0xeb   :  { %2676 = vmatprep.subr.bf16.mxu0 %v7586_v34  ;;  %2717 = vmatprep.subr.bf16.mxu1 %v7589_v35  ;;  %v7641_v35 = vld [vmem:[#allocation10 + $0x6e0] ss:$16 sps:$4 sm:$0xff]  }
  0xee   :  { %2677 = vmatpush1.bf16.msra.mxu0 %v7584_v36  ;;  %2718 = vmatpush1.bf16.msra.mxu1 %v7587_v37  ;;  %v7646_v36 = vld [vmem:[#allocation10 + $0x4c4] ss:$16 sps:$4 sm:$0xff]  }
  0xef   :  { %2678 = vmatprep.subr.bf16.mxu0 %v7592_v38  ;;  %2719 = vmatprep.subr.bf16.mxu1 %v7595_v39 }
  0xf2   :  { %2679 = vmatpush2.bf16.msra.mxu0 %v7590_v40  ;;  %2720 = vmatpush2.bf16.msra.mxu1 %v7593_v41 }
  0xf3   :  { %2680 = vmatprep.subr.bf16.mxu0 %v7598_v42  ;;  %2721 = vmatprep.subr.bf16.mxu1 %v7601_v57  ;;  %v7644_v42 = vld [vmem:[#allocation10 + $0x4c0] ss:$16 sps:$4 sm:$0xff]   ;;  %v7649_v57 = vld [vmem:[#allocation10 + $0x6c4] ss:$16 sps:$4 sm:$0xff]  }
  0xf6   :  { %2681 = vmatpush2.bf16.msra.mxu0 %v7596_v43  ;;  %2722 = vmatpush2.bf16.msra.mxu1 %v7599_v44  ;;  %v7647_v43 = vld [vmem:[#allocation10 + $0x6c0] ss:$16 sps:$4 sm:$0xff]   ;;  %v7652_v44 = vld [vmem:[#allocation10 + $0x4a4] ss:$16 sps:$4 sm:$0xff]  }
  0xf7   :  { %2682 = vmatprep.subr.bf16.mxu0 %v7604_v45  ;;  %2723 = vmatprep.subr.bf16.mxu1 %v7607_v46  ;;  %v7655_v45 = vld [vmem:[#allocation10 + $0x6a4] ss:$16 sps:$4 sm:$0xff]   ;;  %v7650_v46 = vld [vmem:[#allocation10 + $0x4a0] ss:$16 sps:$4 sm:$0xff]  }
  0xfa   :  { %2683 = vmatpush2.bf16.msra.mxu0 %v7602_v47  ;;  %2724 = vmatpush2.bf16.msra.mxu1 %v7605_v48  ;;  %v7653_v47 = vld [vmem:[#allocation10 + $0x6a0] ss:$16 sps:$4 sm:$0xff]   ;;  %v7658_v48 = vld [vmem:[#allocation10 + $0x484] ss:$16 sps:$4 sm:$0xff]  }
  0xfb   :  { %2684 = vmatprep.subr.bf16.mxu0 %v7610_v49  ;;  %2725 = vmatprep.subr.bf16.mxu1 %v7613_v50  ;;  %v7656_v49 = vld [vmem:[#allocation10 + $0x480] ss:$16 sps:$4 sm:$0xff]   ;;  %v7661_v50 = vld [vmem:[#allocation10 + $0x684] ss:$16 sps:$4 sm:$0xff]  }
  0xfe   :  { %2685 = vmatpush2.bf16.msra.mxu0 %v7608_v51  ;;  %2726 = vmatpush2.bf16.msra.mxu1 %v7611_v52  ;;  %v7659_v51 = vld [vmem:[#allocation10 + $0x680] ss:$16 sps:$4 sm:$0xff]   ;;  %v7664_v52 = vld [vmem:[#allocation10 + $0x464] ss:$16 sps:$4 sm:$0xff]  }
  0xff   :  { %2686 = vmatprep.subr.bf16.mxu0 %v7616_v53  ;;  %2727 = vmatprep.subr.bf16.mxu1 %v7619_v54  ;;  %v7662_v53 = vld [vmem:[#allocation10 + $0x460] ss:$16 sps:$4 sm:$0xff]   ;;  %v7667_v54 = vld [vmem:[#allocation10 + $0x664] ss:$16 sps:$4 sm:$0xff]  }
 0x102   :  { %2687 = vmatpush2.bf16.msra.mxu0 %v7614_v55  ;;  %2728 = vmatpush2.bf16.msra.mxu1 %v7617_v56  ;;  %v7665_v55 = vld [vmem:[#allocation10 + $0x660] ss:$16 sps:$4 sm:$0xff]   ;;  %v7670_v56 = vld [vmem:[#allocation10 + $0x444] ss:$16 sps:$4 sm:$0xff]  }
 0x103   :  { %2688 = vmatprep.subr.bf16.mxu0 %v7622_v58  ;;  %2729 = vmatprep.subr.bf16.mxu1 %v7625_v59  ;;  %v7668_v58 = vld [vmem:[#allocation10 + $0x440] ss:$16 sps:$4 sm:$0xff]   ;;  %v7673_v59 = vld [vmem:[#allocation10 + $0x644] ss:$16 sps:$4 sm:$0xff]  }
 0x106   :  { %2689 = vmatpush2.bf16.msra.mxu0 %v7620_v60  ;;  %2730 = vmatpush2.bf16.msra.mxu1 %v7623_v61  ;;  %v7671_v60 = vld [vmem:[#allocation10 + $0x640] ss:$16 sps:$4 sm:$0xff]   ;;  %v7676_v61 = vld [vmem:[#allocation10 + $0x424] ss:$16 sps:$4 sm:$0xff]  }
 0x107   :  { %2690 = vmatprep.subr.bf16.mxu0 %v7628_v62  ;;  %2731 = vmatprep.subr.bf16.mxu1 %v7631_v63  ;;  %v7674_v62 = vld [vmem:[#allocation10 + $0x420] ss:$16 sps:$4 sm:$0xff]   ;;  %v7679_v63 = vld [vmem:[#allocation10 + $0x624] ss:$16 sps:$4 sm:$0xff]  }
 0x10a   :  { %2691 = vmatpush2.bf16.msra.mxu0 %v7626_v0  ;;  %2732 = vmatpush2.bf16.msra.mxu1 %v7629_v1  ;;  %v7677_v0 = vld [vmem:[#allocation10 + $0x620] ss:$16 sps:$4 sm:$0xff]   ;;  %v7682_v1 = vld [vmem:[#allocation10 + $0x404] ss:$16 sps:$4 sm:$0xff]  }
 0x10b   :  { %2692 = vmatprep.subr.bf16.mxu0 %v7634_v2  ;;  %2733 = vmatprep.subr.bf16.mxu1 %v7637_v3  ;;  %v7680_v2 = vld [vmem:[#allocation10 + $0x400] ss:$16 sps:$4 sm:$0xff]   ;;  %v7685_v3 = vld [vmem:[#allocation10 + $0x604] ss:$16 sps:$4 sm:$0xff]  }
 0x10e   :  { %2693 = vmatpush2.bf16.msra.mxu0 %v7632_v4  ;;  %2734 = vmatpush2.bf16.msra.mxu1 %v7635_v5  ;;  %v7683_v4 = vld [vmem:[#allocation10 + $0x600] ss:$16 sps:$4 sm:$0xff]   ;;  %v7688_v5 = vld [vmem:[#allocation10 + $0x5e4] ss:$16 sps:$4 sm:$0xff]  }
 0x10f   :  { %2744 = vmatprep.subr.bf16.mxu0 %v7640_v6  ;;  %2785 = vmatprep.subr.bf16.mxu1 %v7643_v7  ;;  %v7686_v6 = vld [vmem:[#allocation10 + $0x5e0] ss:$16 sps:$4 sm:$0xff]   ;;  %v7691_v7 = vld [vmem:[#allocation10 + $0x7e4] ss:$16 sps:$4 sm:$0xff]  }
 0x151   :  { %v958_v19 = vpop.f32.mrf.mxu0  ;;  %v999_v22 = vpop.f32.mrf.mxu1 }
 0x152   :  { %v959_v21 = vadd.f32 %v958_v19, %v247_v16  ;;  %v1000_v23 = vadd.f32 %v999_v22, %v255_v17  ;;  %v7694_v16 = vld [vmem:[#allocation10 + $0x5c4] ss:$16 sps:$4 sm:$0xff]   ;;  %v7692_v17 = vld [vmem:[#allocation10 + $0x5c0] ss:$16 sps:$4 sm:$0xff]  }
 0x153   :  { %v960_v24 = vpop.f32.mrf.mxu0  ;;  %v1001_v25 = vpop.f32.mrf.mxu1  ;;  %v7695_v19 = vld [vmem:[#allocation10 + $0x7c0] ss:$16 sps:$4 sm:$0xff]   ;;  %v7703_v22 = vld [vmem:[#allocation10 + $0x7a4] ss:$16 sps:$4 sm:$0xff]  }
 0x154   :  { %v961_v13 = vadd.f32 %v960_v24, %v251_v18  ;;  %v1088_v26 = vmax.f32 %v959_v21, 0.0  ;;  %v1090_v27 = vmax.f32 %v1000_v23, 0.0  ;;  %v1002_v28 = vadd.f32 %v1001_v25, %v259_v20  ;;  %v7697_v18 = vld [vmem:[#allocation10 + $0x7c4] ss:$16 sps:$4 sm:$0xff]   ;;  %v7698_v21 = vld [vmem:[#allocation10 + $0x5a0] ss:$16 sps:$4 sm:$0xff]  }
 0x155   :  { %v962_v29 = vpop.f32.mrf.mxu0  ;;  %v1003_v31 = vpop.f32.mrf.mxu1  ;;  %v7700_v20 = vld [vmem:[#allocation10 + $0x5a4] ss:$16 sps:$4 sm:$0xff]   ;;  %v7701_v23 = vld [vmem:[#allocation10 + $0x7a0] ss:$16 sps:$4 sm:$0xff]  }
 0x156   :  { %v1089_v30 = vmax.f32 %v961_v13, 0.0  ;;  %v1091_v33 = vmax.f32 %v1002_v28, 0.0  ;;  %v8664_v37 = vpack.c.bf16 %v1090_v27, %v1090_v27  ;;  %v8668_v40 = vpack.c.bf16 %v1088_v26, %v1088_v26  ;;  %v7706_v24 = vld [vmem:[#allocation10 + $0x584] ss:$16 sps:$4 sm:$0xff]   ;;  %v7704_v13 = vld [vmem:[#allocation10 + $0x580] ss:$16 sps:$4 sm:$0xff]  }
 0x157   :  { %v963_v34 = vpop.f32.mrf.mxu0  ;;  %v1004_v39 = vpop.f32.mrf.mxu1  ;;  %v7709_v25 = vld [vmem:[#allocation10 + $0x784] ss:$16 sps:$4 sm:$0xff]   ;;  %v7707_v26 = vld [vmem:[#allocation10 + $0x780] ss:$16 sps:$4 sm:$0xff]  }
 0x158   :  { %v8666_v38 = vpack.c.bf16 %v1089_v30, %v1089_v30  ;;  %v8670_v41 = vpack.c.bf16 %v1091_v33, %v1091_v33  ;;  %v7712_v27 = vld [vmem:[#allocation10 + $0x564] ss:$16 sps:$4 sm:$0xff]   ;;  %v7710_v28 = vld [vmem:[#allocation10 + $0x560] ss:$16 sps:$4 sm:$0xff]   ;;  %v262_v34 = vsub.s32 4, %v8640_v9  ;;  %v266_v39 = vsub.s32 5, %v8640_v9 }
 0x159   :  { %v7715_v29 = vld [vmem:[#allocation10 + $0x764] ss:$16 sps:$4 sm:$0xff]   ;;  %v7713_v30 = vld [vmem:[#allocation10 + $0x760] ss:$16 sps:$4 sm:$0xff]  }
 0x15a   :  { %2694 = vmatprep.mubr.bf16.mxu0 %v8666_v38  ;;  %2735 = vmatprep.mubr.bf16.mxu1 %v8670_v41  ;;  %v7718_v31 = vld [vmem:[#allocation10 + $0x544] ss:$16 sps:$4 sm:$0xff]  }
 0x15b   :  { %2695 = vmatmul.mubr.bf16.vlgmr.msra.gmra.mxu0 %v8668_v40  ;;  %2736 = vmatmul.mubr.bf16.vlgmr.msra.gmra.mxu1 %v8664_v37  ;;  %v7721_v33 = vld [vmem:[#allocation10 + $0x744] ss:$16 sps:$4 sm:$0xff]  }
 0x15c   :  { %2745 = vmatpush1.bf16.msra.mxu0 %v7638_v32  ;;  %2786 = vmatpush1.bf16.msra.mxu1 %v7641_v35  ;;  %v7716_v32 = vld [vmem:[#allocation10 + $0x540] ss:$16 sps:$4 sm:$0xff]  }
 0x15d   :  { %2746 = vmatprep.subr.bf16.mxu0 %v7646_v36  ;;  %2787 = vmatprep.subr.bf16.mxu1 %v7649_v57  ;;  %v7719_v35 = vld [vmem:[#allocation10 + $0x740] ss:$16 sps:$4 sm:$0xff]   ;;  %v270_v36 = vsub.s32 6, %v8640_v9  ;;  %v7727_v57 = vld [vmem:[#allocation10 + $0x724] ss:$16 sps:$4 sm:$0xff]  }
 0x160   :  { %2747 = vmatpush1.bf16.msra.mxu0 %v7644_v42  ;;  %2788 = vmatpush1.bf16.msra.mxu1 %v7647_v43  ;;  %v7724_v42 = vld [vmem:[#allocation10 + $0x524] ss:$16 sps:$4 sm:$0xff]   ;;  %v274_v43 = vsub.s32 7, %v8640_v9  ;;  %v8248_v9 = vld [vmem:[#allocation10 + $0x2ec] ss:$16 sps:$4 sm:$0xff]  }
 0x161   :  { %2748 = vmatprep.subr.bf16.mxu0 %v7652_v44  ;;  %2789 = vmatprep.subr.bf16.mxu1 %v7655_v45  ;;  %v263_v44 = vrot.slane %v8642_v10, %v262_v34  ;;  %v7722_v45 = vld [vmem:[#allocation10 + $0x520] ss:$16 sps:$4 sm:$0xff]  }
 0x164   :  { %2749 = vmatpush1.bf16.msra.mxu0 %v7650_v46  ;;  %2790 = vmatpush1.bf16.msra.mxu1 %v7653_v47  ;;  %v271_v46 = vrot.slane %v8642_v10, %v270_v36  ;;  %v267_v47 = vrot.slane %v8642_v10, %v266_v39 }
 0x165   :  { %2750 = vmatprep.subr.bf16.mxu0 %v7658_v48  ;;  %2791 = vmatprep.subr.bf16.mxu1 %v7661_v50  ;;  %v275_v50 = vrot.slane %v8642_v10, %v274_v43 }
 0x168   :  { %2751 = vmatpush1.bf16.msra.mxu0 %v7656_v49  ;;  %2792 = vmatpush1.bf16.msra.mxu1 %v7659_v51  ;;  %v7725_v49 = vld [vmem:[#allocation10 + $0x720] ss:$16 sps:$4 sm:$0xff]   ;;  %v7730_v51 = vld [vmem:[#allocation10 + $0x504] ss:$16 sps:$4 sm:$0xff]  }
 0x169   :  { %2752 = vmatprep.subr.bf16.mxu0 %v7664_v52  ;;  %2793 = vmatprep.subr.bf16.mxu1 %v7667_v54  ;;  %v7733_v54 = vld [vmem:[#allocation10 + $0x704] ss:$16 sps:$4 sm:$0xff]  }
 0x16c   :  { %2753 = vmatpush1.bf16.msra.mxu0 %v7662_v53  ;;  %2794 = vmatpush1.bf16.msra.mxu1 %v7665_v55 }
 0x16d   :  { %2754 = vmatprep.subr.bf16.mxu0 %v7670_v56  ;;  %2795 = vmatprep.subr.bf16.mxu1 %v7673_v59 }
 0x170   :  { %2755 = vmatpush1.bf16.msra.mxu0 %v7668_v58  ;;  %2796 = vmatpush1.bf16.msra.mxu1 %v7671_v60  ;;  %v7728_v60 = vld [vmem:[#allocation10 + $0x500] ss:$16 sps:$4 sm:$0xff]  }
 0x171   :  { %2756 = vmatprep.subr.bf16.mxu0 %v7676_v61  ;;  %2797 = vmatprep.subr.bf16.mxu1 %v7679_v63 }
 0x174   :  { %2757 = vmatpush1.bf16.msra.mxu0 %v7674_v62  ;;  %2798 = vmatpush1.bf16.msra.mxu1 %v7677_v0 }
 0x175   :  { %2758 = vmatprep.subr.bf16.mxu0 %v7682_v1  ;;  %2799 = vmatprep.subr.bf16.mxu1 %v7685_v3  ;;  %v7731_v1 = vld [vmem:[#allocation10 + $0x700] ss:$16 sps:$4 sm:$0xff]  }
 0x178   :  { %2759 = vmatpush1.bf16.msra.mxu0 %v7680_v2  ;;  %2800 = vmatpush1.bf16.msra.mxu1 %v7683_v4  ;;  %v7736_v2 = vld [vmem:[#allocation10 + $0xec] ss:$16 sps:$4 sm:$0xff]   ;;  %v7734_v4 = vld [vmem:[#allocation10 + $0xe8] ss:$16 sps:$4 sm:$0xff]  }
 0x179   :  { %2760 = vmatprep.subr.bf16.mxu0 %v7688_v5  ;;  %2801 = vmatprep.subr.bf16.mxu1 %v7691_v7  ;;  %v7739_v5 = vld [vmem:[#allocation10 + $0x2ec] ss:$16 sps:$4 sm:$0xff]  }
 0x17c   :  { %2761 = vmatpush2.bf16.msra.mxu0 %v7686_v6  ;;  %2802 = vmatpush2.bf16.msra.mxu1 %v7689_v8  ;;  %v7737_v8 = vld [vmem:[#allocation10 + $0x2e8] ss:$16 sps:$4 sm:$0xff]  }
 0x17d   :  { %2762 = vmatprep.subr.bf16.mxu0 %v7694_v16  ;;  %2803 = vmatprep.subr.bf16.mxu1 %v7697_v18 }
 0x180   :  { %2763 = vmatpush2.bf16.msra.mxu0 %v7692_v17  ;;  %2804 = vmatpush2.bf16.msra.mxu1 %v7695_v19  ;;  %v7742_v19 = vld [vmem:[#allocation10 + $0xcc] ss:$16 sps:$4 sm:$0xff]  }
 0x181   :  { %2764 = vmatprep.subr.bf16.mxu0 %v7700_v20  ;;  %2805 = vmatprep.subr.bf16.mxu1 %v7703_v22  ;;  %v7745_v22 = vld [vmem:[#allocation10 + $0x2cc] ss:$16 sps:$4 sm:$0xff]  }
 0x184   :  { %2765 = vmatpush2.bf16.msra.mxu0 %v7698_v21  ;;  %2806 = vmatpush2.bf16.msra.mxu1 %v7701_v23  ;;  %v7740_v23 = vld [vmem:[#allocation10 + $0xc8] ss:$16 sps:$4 sm:$0xff]  }
 0x185   :  { %2766 = vmatprep.subr.bf16.mxu0 %v7706_v24  ;;  %2807 = vmatprep.subr.bf16.mxu1 %v7709_v25  ;;  %v7743_v24 = vld [vmem:[#allocation10 + $0x2c8] ss:$16 sps:$4 sm:$0xff]   ;;  %v7751_v25 = vld [vmem:[#allocation10 + $0x2ac] ss:$16 sps:$4 sm:$0xff]  }
 0x188   :  { %2767 = vmatpush2.bf16.msra.mxu0 %v7704_v13  ;;  %2808 = vmatpush2.bf16.msra.mxu1 %v7707_v26  ;;  %v7748_v13 = vld [vmem:[#allocation10 + $0xac] ss:$16 sps:$4 sm:$0xff]   ;;  %v7746_v26 = vld [vmem:[#allocation10 + $0xa8] ss:$16 sps:$4 sm:$0xff]  }
 0x189   :  { %2768 = vmatprep.subr.bf16.mxu0 %v7712_v27  ;;  %2809 = vmatprep.subr.bf16.mxu1 %v7715_v29  ;;  %v7749_v27 = vld [vmem:[#allocation10 + $0x2a8] ss:$16 sps:$4 sm:$0xff]   ;;  %v7757_v29 = vld [vmem:[#allocation10 + $0x28c] ss:$16 sps:$4 sm:$0xff]  }
 0x18c   :  { %2769 = vmatpush2.bf16.msra.mxu0 %v7710_v28  ;;  %2810 = vmatpush2.bf16.msra.mxu1 %v7713_v30  ;;  %v7754_v28 = vld [vmem:[#allocation10 + $0x8c] ss:$16 sps:$4 sm:$0xff]   ;;  %v7752_v30 = vld [vmem:[#allocation10 + $0x88] ss:$16 sps:$4 sm:$0xff]  }
 0x18d   :  { %2770 = vmatprep.subr.bf16.mxu0 %v7718_v31  ;;  %2811 = vmatprep.subr.bf16.mxu1 %v7721_v33  ;;  %v7755_v31 = vld [vmem:[#allocation10 + $0x288] ss:$16 sps:$4 sm:$0xff]   ;;  %v7763_v33 = vld [vmem:[#allocation10 + $0x26c] ss:$16 sps:$4 sm:$0xff]  }
 0x190   :  { %2771 = vmatpush2.bf16.msra.mxu0 %v7716_v32  ;;  %2812 = vmatpush2.bf16.msra.mxu1 %v7719_v35  ;;  %v7760_v32 = vld [vmem:[#allocation10 + $0x6c] ss:$16 sps:$4 sm:$0xff]  }
 0x191   :  { %v1040_v48 = vpop.f32.mrf.mxu0  ;;  %2772 = vmatprep.subr.bf16.mxu0 %v7724_v42  ;;  %v1081_v53 = vpop.f32.mrf.mxu1  ;;  %2813 = vmatprep.subr.bf16.mxu1 %v7727_v57  ;;  %v7766_v35 = vld [vmem:[#allocation10 + $0x4c] ss:$16 sps:$4 sm:$0xff]   ;;  %v7764_v57 = vld [vmem:[#allocation10 + $0x48] ss:$16 sps:$4 sm:$0xff]  }
 0x192   :  { %v1041_v52 = vadd.f32 %v1040_v48, %v263_v44  ;;  %v1082_v55 = vadd.f32 %v1081_v53, %v271_v46  ;;  %v7769_v42 = vld [vmem:[#allocation10 + $0x24c] ss:$16 sps:$4 sm:$0xff]   ;;  %v7767_v44 = vld [vmem:[#allocation10 + $0x248] ss:$16 sps:$4 sm:$0xff]  }
 0x193   :  { %v1042_v56 = vpop.f32.mrf.mxu0  ;;  %v1083_v59 = vpop.f32.mrf.mxu1  ;;  %v7775_v46 = vld [vmem:[#allocation10 + $0x22c] ss:$16 sps:$4 sm:$0xff]   ;;  %v7773_v48 = vld [vmem:[#allocation10 + $0x228] ss:$16 sps:$4 sm:$0xff]  }
 0x194   :  { %v1043_v58 = vadd.f32 %v1042_v56, %v267_v47  ;;  %2773 = vmatpush2.bf16.msra.mxu0 %v7722_v45  ;;  %v1092_v61 = vmax.f32 %v1041_v52, 0.0  ;;  %v1094_v62 = vmax.f32 %v1082_v55, 0.0  ;;  %v1084_v63 = vadd.f32 %v1083_v59, %v275_v50  ;;  %2814 = vmatpush2.bf16.msra.mxu1 %v7725_v49  ;;  %v7772_v45 = vld [vmem:[#allocation10 + $0x2c] ss:$16 sps:$4 sm:$0xff]   ;;  %v7770_v47 = vld [vmem:[#allocation10 + $0x28] ss:$16 sps:$4 sm:$0xff]  }
 0x195   :  { %v1044_v0 = vpop.f32.mrf.mxu0  ;;  %2774 = vmatprep.subr.bf16.mxu0 %v7730_v51  ;;  %v1085_v3 = vpop.f32.mrf.mxu1  ;;  %2815 = vmatprep.subr.bf16.mxu1 %v7733_v54  ;;  %v7778_v49 = vld [vmem:[#allocation10 + $0xc] ss:$16 sps:$4 sm:$0xff]   ;;  %v7776_v51 = vld [vmem:[#allocation10 + $0x8] ss:$16 sps:$4 sm:$0xff]  }
 0x196   :  { %v1093_v10 = vmax.f32 %v1043_v58, 0.0  ;;  %v1095_v6 = vmax.f32 %v1084_v63, 0.0  ;;  %v8692_v16 = vpack.c.bf16 %v1094_v62, %v1094_v62  ;;  %v8696_v20 = vpack.c.bf16 %v1092_v61, %v1092_v61  ;;  %v7781_v50 = vld [vmem:[#allocation10 + $0x20c] ss:$16 sps:$4 sm:$0xff]   ;;  %v7779_v52 = vld [vmem:[#allocation10 + $0x208] ss:$16 sps:$4 sm:$0xff]  }
 0x197   :  { %v1045_v7 = vpop.f32.mrf.mxu0  ;;  %v1086_v18 = vpop.f32.mrf.mxu1  ;;  %v7784_v53 = vld [vmem:[#allocation10 + $0x1ec] ss:$16 sps:$4 sm:$0xff]   ;;  %v7782_v55 = vld [vmem:[#allocation10 + $0x1e8] ss:$16 sps:$4 sm:$0xff]  }
 0x198   :  { %v8694_v17 = vpack.c.bf16 %v1093_v10, %v1093_v10  ;;  %2775 = vmatpush2.bf16.msra.mxu0 %v7728_v60  ;;  %v8698_v21 = vpack.c.bf16 %v1095_v6, %v1095_v6  ;;  %2816 = vmatpush2.bf16.msra.mxu1 %v7731_v1  ;;  %v7787_v54 = vld [vmem:[#allocation10 + $0x3ec] ss:$16 sps:$4 sm:$0xff]   ;;  %v7785_v56 = vld [vmem:[#allocation10 + $0x3e8] ss:$16 sps:$4 sm:$0xff]  }
 0x199   :  { %2826 = vmatprep.subr.bf16.mxu0 %v7736_v2  ;;  %2867 = vmatprep.subr.bf16.mxu1 %v7739_v5  ;;  %v7790_v58 = vld [vmem:[#allocation10 + $0x1cc] ss:$16 sps:$4 sm:$0xff]   ;;  %v7788_v60 = vld [vmem:[#allocation10 + $0x1c8] ss:$16 sps:$4 sm:$0xff]  }
 0x19a   :  { %2776 = vmatprep.mubr.bf16.mxu0 %v8694_v17  ;;  %2817 = vmatprep.mubr.bf16.mxu1 %v8698_v21  ;;  %v7793_v59 = vld [vmem:[#allocation10 + $0x3cc] ss:$16 sps:$4 sm:$0xff]   ;;  %v7791_v61 = vld [vmem:[#allocation10 + $0x3c8] ss:$16 sps:$4 sm:$0xff]  }
 0x19b   :  { %2777 = vmatmul.mubr.bf16.vlgmr.msra.gmra.mxu0 %v8696_v20  ;;  %2818 = vmatmul.mubr.bf16.vlgmr.msra.gmra.mxu1 %v8692_v16  ;;  %v7796_v62 = vld [vmem:[#allocation10 + $0x1ac] ss:$16 sps:$4 sm:$0xff]   ;;  %v7794_v0 = vld [vmem:[#allocation10 + $0x1a8] ss:$16 sps:$4 sm:$0xff]  }
 0x19c   :  { %2827 = vmatpush1.bf16.msra.mxu0 %v7734_v4  ;;  %2868 = vmatpush1.bf16.msra.mxu1 %v7737_v8  ;;  %v7799_v63 = vld [vmem:[#allocation10 + $0x3ac] ss:$16 sps:$4 sm:$0xff]   ;;  %v7797_v1 = vld [vmem:[#allocation10 + $0x3a8] ss:$16 sps:$4 sm:$0xff]  }
 0x19d   :  { %2858 = vmatprep.mubr.bf16.mxu0 %v8666_v38  ;;  %2899 = vmatprep.mubr.bf16.mxu1 %v8670_v41  ;;  %v7758_v38 = vld [vmem:[#allocation10 + $0x68] ss:$16 sps:$4 sm:$0xff]   ;;  %v7802_v2 = vld [vmem:[#allocation10 + $0x18c] ss:$16 sps:$4 sm:$0xff]  }
 0x19e   :  { %2828 = vmatprep.subr.bf16.mxu0 %v7742_v19  ;;  %2869 = vmatprep.subr.bf16.mxu1 %v7745_v22  ;;  %v7761_v41 = vld [vmem:[#allocation10 + $0x268] ss:$16 sps:$4 sm:$0xff]   ;;  %v7805_v10 = vld [vmem:[#allocation10 + $0x38c] ss:$16 sps:$4 sm:$0xff]  }
 0x19f   :  { %v7800_v3 = vld [vmem:[#allocation10 + $0x188] ss:$16 sps:$4 sm:$0xff]   ;;  %v7808_v5 = vld [vmem:[#allocation10 + $0x16c] ss:$16 sps:$4 sm:$0xff]  }
 0x1a0   :  { %2829 = vmatpush1.bf16.msra.mxu0 %v7740_v23  ;;  %2870 = vmatpush1.bf16.msra.mxu1 %v7743_v24  ;;  %v7803_v4 = vld [vmem:[#allocation10 + $0x388] ss:$16 sps:$4 sm:$0xff]   ;;  %v7811_v6 = vld [vmem:[#allocation10 + $0x36c] ss:$16 sps:$4 sm:$0xff]  }
 0x1a1   :  { %2830 = vmatprep.subr.bf16.mxu0 %v7748_v13  ;;  %2871 = vmatprep.subr.bf16.mxu1 %v7751_v25  ;;  %v7806_v7 = vld [vmem:[#allocation10 + $0x168] ss:$16 sps:$4 sm:$0xff]   ;;  %v7814_v18 = vld [vmem:[#allocation10 + $0x14c] ss:$16 sps:$4 sm:$0xff]  }
 0x1a2   :  { %v7809_v8 = vld [vmem:[#allocation10 + $0x368] ss:$16 sps:$4 sm:$0xff]   ;;  %v7817_v19 = vld [vmem:[#allocation10 + $0x34c] ss:$16 sps:$4 sm:$0xff]  }
 0x1a3   :  { %v7812_v22 = vld [vmem:[#allocation10 + $0x148] ss:$16 sps:$4 sm:$0xff]   ;;  %v7820_v24 = vld [vmem:[#allocation10 + $0x12c] ss:$16 sps:$4 sm:$0xff]  }
 0x1a4   :  { %2831 = vmatpush1.bf16.msra.mxu0 %v7746_v26  ;;  %2872 = vmatpush1.bf16.msra.mxu1 %v7749_v27  ;;  %v7815_v23 = vld [vmem:[#allocation10 + $0x348] ss:$16 sps:$4 sm:$0xff]   ;;  %v7823_v13 = vld [vmem:[#allocation10 + $0x32c] ss:$16 sps:$4 sm:$0xff]  }
 0x1a5   :  { %2832 = vmatprep.subr.bf16.mxu0 %v7754_v28  ;;  %2873 = vmatprep.subr.bf16.mxu1 %v7757_v29  ;;  %v7818_v25 = vld [vmem:[#allocation10 + $0x128] ss:$16 sps:$4 sm:$0xff]   ;;  %v7826_v27 = vld [vmem:[#allocation10 + $0x10c] ss:$16 sps:$4 sm:$0xff]  }
 0x1a6   :  { %v7821_v26 = vld [vmem:[#allocation10 + $0x328] ss:$16 sps:$4 sm:$0xff]   ;;  %v7829_v28 = vld [vmem:[#allocation10 + $0x30c] ss:$16 sps:$4 sm:$0xff]  }
 0x1a7   :  { %v7824_v29 = vld [vmem:[#allocation10 + $0x108] ss:$16 sps:$4 sm:$0xff]  }
 0x1a8   :  { %2833 = vmatpush1.bf16.msra.mxu0 %v7752_v30  ;;  %2874 = vmatpush1.bf16.msra.mxu1 %v7755_v31  ;;  %v7827_v30 = vld [vmem:[#allocation10 + $0x308] ss:$16 sps:$4 sm:$0xff]   ;;  %v7832_v31 = vld [vmem:[#allocation10 + $0x4ec] ss:$16 sps:$4 sm:$0xff]  }
 0x1a9   :  { %2834 = vmatprep.subr.bf16.mxu0 %v7760_v32  ;;  %2875 = vmatprep.subr.bf16.mxu1 %v7763_v33  ;;  %v7835_v32 = vld [vmem:[#allocation10 + $0x6ec] ss:$16 sps:$4 sm:$0xff]   ;;  %v7830_v33 = vld [vmem:[#allocation10 + $0x4e8] ss:$16 sps:$4 sm:$0xff]  }
 0x1ac   :  { %2835 = vmatpush1.bf16.msra.mxu0 %v7758_v38  ;;  %2876 = vmatpush1.bf16.msra.mxu1 %v7761_v41  ;;  %v7833_v38 = vld [vmem:[#allocation10 + $0x6e8] ss:$16 sps:$4 sm:$0xff]   ;;  %v7838_v41 = vld [vmem:[#allocation10 + $0x4cc] ss:$16 sps:$4 sm:$0xff]  }
 0x1ad   :  { %2836 = vmatprep.subr.bf16.mxu0 %v7766_v35  ;;  %2877 = vmatprep.subr.bf16.mxu1 %v7769_v42  ;;  %v7841_v35 = vld [vmem:[#allocation10 + $0x6cc] ss:$16 sps:$4 sm:$0xff]   ;;  %v7836_v42 = vld [vmem:[#allocation10 + $0x4c8] ss:$16 sps:$4 sm:$0xff]  }
 0x1b0   :  { %2837 = vmatpush1.bf16.msra.mxu0 %v7764_v57  ;;  %2878 = vmatpush1.bf16.msra.mxu1 %v7767_v44  ;;  %v7839_v57 = vld [vmem:[#allocation10 + $0x6c8] ss:$16 sps:$4 sm:$0xff]   ;;  %v7844_v44 = vld [vmem:[#allocation10 + $0x4ac] ss:$16 sps:$4 sm:$0xff]  }
 0x1b1   :  { %2838 = vmatprep.subr.bf16.mxu0 %v7772_v45  ;;  %2879 = vmatprep.subr.bf16.mxu1 %v7775_v46  ;;  %v7847_v45 = vld [vmem:[#allocation10 + $0x6ac] ss:$16 sps:$4 sm:$0xff]   ;;  %v7842_v46 = vld [vmem:[#allocation10 + $0x4a8] ss:$16 sps:$4 sm:$0xff]  }
 0x1b4   :  { %2839 = vmatpush1.bf16.msra.mxu0 %v7770_v47  ;;  %2880 = vmatpush1.bf16.msra.mxu1 %v7773_v48  ;;  %v7850_v47 = vld [vmem:[#allocation10 + $0x48c] ss:$16 sps:$4 sm:$0xff]   ;;  %v7848_v48 = vld [vmem:[#allocation10 + $0x488] ss:$16 sps:$4 sm:$0xff]  }
 0x1b5   :  { %2840 = vmatprep.subr.bf16.mxu0 %v7778_v49  ;;  %2881 = vmatprep.subr.bf16.mxu1 %v7781_v50  ;;  %v7856_v49 = vld [vmem:[#allocation10 + $0x46c] ss:$16 sps:$4 sm:$0xff]  }
 0x1b6   :  { %v7859_v50 = vld [vmem:[#allocation10 + $0x66c] ss:$16 sps:$4 sm:$0xff]  }
 0x1b8   :  { %2841 = vmatpush1.bf16.msra.mxu0 %v7776_v51  ;;  %2882 = vmatpush1.bf16.msra.mxu1 %v7779_v52  ;;  %v7857_v51 = vld [vmem:[#allocation10 + $0x668] ss:$16 sps:$4 sm:$0xff]   ;;  %v7862_v52 = vld [vmem:[#allocation10 + $0x44c] ss:$16 sps:$4 sm:$0xff]  }
 0x1b9   :  { %2842 = vmatprep.subr.bf16.mxu0 %v7784_v53  ;;  %2883 = vmatprep.subr.bf16.mxu1 %v7787_v54  ;;  %v7865_v53 = vld [vmem:[#allocation10 + $0x64c] ss:$16 sps:$4 sm:$0xff]   ;;  %v7860_v54 = vld [vmem:[#allocation10 + $0x448] ss:$16 sps:$4 sm:$0xff]  }
 0x1bc   :  { %2843 = vmatpush2.bf16.msra.mxu0 %v7782_v55  ;;  %2884 = vmatpush2.bf16.msra.mxu1 %v7785_v56  ;;  %v7863_v55 = vld [vmem:[#allocation10 + $0x648] ss:$16 sps:$4 sm:$0xff]   ;;  %v7868_v56 = vld [vmem:[#allocation10 + $0x42c] ss:$16 sps:$4 sm:$0xff]  }
 0x1bd   :  { %2844 = vmatprep.subr.bf16.mxu0 %v7790_v58  ;;  %2885 = vmatprep.subr.bf16.mxu1 %v7793_v59  ;;  %v7871_v58 = vld [vmem:[#allocation10 + $0x62c] ss:$16 sps:$4 sm:$0xff]   ;;  %v7866_v59 = vld [vmem:[#allocation10 + $0x428] ss:$16 sps:$4 sm:$0xff]  }
 0x1c0   :  { %2845 = vmatpush2.bf16.msra.mxu0 %v7788_v60  ;;  %2886 = vmatpush2.bf16.msra.mxu1 %v7791_v61  ;;  %v7869_v60 = vld [vmem:[#allocation10 + $0x628] ss:$16 sps:$4 sm:$0xff]   ;;  %v7874_v61 = vld [vmem:[#allocation10 + $0x40c] ss:$16 sps:$4 sm:$0xff]  }
 0x1c1   :  { %2846 = vmatprep.subr.bf16.mxu0 %v7796_v62  ;;  %2887 = vmatprep.subr.bf16.mxu1 %v7799_v63  ;;  %v7877_v62 = vld [vmem:[#allocation10 + $0x60c] ss:$16 sps:$4 sm:$0xff]   ;;  %v7872_v63 = vld [vmem:[#allocation10 + $0x408] ss:$16 sps:$4 sm:$0xff]  }
 0x1c4   :  { %2847 = vmatpush2.bf16.msra.mxu0 %v7794_v0  ;;  %2888 = vmatpush2.bf16.msra.mxu1 %v7797_v1  ;;  %v7875_v0 = vld [vmem:[#allocation10 + $0x608] ss:$16 sps:$4 sm:$0xff]   ;;  %v7880_v1 = vld [vmem:[#allocation10 + $0x5ec] ss:$16 sps:$4 sm:$0xff]  }
 0x1c5   :  { %2848 = vmatprep.subr.bf16.mxu0 %v7802_v2  ;;  %2889 = vmatprep.subr.bf16.mxu1 %v7805_v10  ;;  %v7883_v2 = vld [vmem:[#allocation10 + $0x7ec] ss:$16 sps:$4 sm:$0xff]   ;;  %v7878_v10 = vld [vmem:[#allocation10 + $0x5e8] ss:$16 sps:$4 sm:$0xff]  }
 0x1c8   :  { %2849 = vmatpush2.bf16.msra.mxu0 %v7800_v3  ;;  %2890 = vmatpush2.bf16.msra.mxu1 %v7803_v4  ;;  %v7881_v3 = vld [vmem:[#allocation10 + $0x7e8] ss:$16 sps:$4 sm:$0xff]   ;;  %v7886_v4 = vld [vmem:[#allocation10 + $0x5cc] ss:$16 sps:$4 sm:$0xff]  }
 0x1c9   :  { %2850 = vmatprep.subr.bf16.mxu0 %v7808_v5  ;;  %2891 = vmatprep.subr.bf16.mxu1 %v7811_v6  ;;  %v7889_v5 = vld [vmem:[#allocation10 + $0x7cc] ss:$16 sps:$4 sm:$0xff]   ;;  %v7884_v6 = vld [vmem:[#allocation10 + $0x5c8] ss:$16 sps:$4 sm:$0xff]  }
 0x1cc   :  { %2851 = vmatpush2.bf16.msra.mxu0 %v7806_v7  ;;  %2892 = vmatpush2.bf16.msra.mxu1 %v7809_v8  ;;  %v7887_v7 = vld [vmem:[#allocation10 + $0x7c8] ss:$16 sps:$4 sm:$0xff]   ;;  %v7892_v8 = vld [vmem:[#allocation10 + $0x5ac] ss:$16 sps:$4 sm:$0xff]  }
 0x1cd   :  { %2852 = vmatprep.subr.bf16.mxu0 %v7814_v18  ;;  %2893 = vmatprep.subr.bf16.mxu1 %v7817_v19  ;;  %v7895_v18 = vld [vmem:[#allocation10 + $0x7ac] ss:$16 sps:$4 sm:$0xff]   ;;  %v7890_v19 = vld [vmem:[#allocation10 + $0x5a8] ss:$16 sps:$4 sm:$0xff]  }
 0x1d0   :  { %2853 = vmatpush2.bf16.msra.mxu0 %v7812_v22  ;;  %2894 = vmatpush2.bf16.msra.mxu1 %v7815_v23  ;;  %v7893_v22 = vld [vmem:[#allocation10 + $0x7a8] ss:$16 sps:$4 sm:$0xff]   ;;  %v7898_v23 = vld [vmem:[#allocation10 + $0x58c] ss:$16 sps:$4 sm:$0xff]  }
 0x1d1   :  { %2854 = vmatprep.subr.bf16.mxu0 %v7820_v24  ;;  %2895 = vmatprep.subr.bf16.mxu1 %v7823_v13  ;;  %v7901_v24 = vld [vmem:[#allocation10 + $0x78c] ss:$16 sps:$4 sm:$0xff]   ;;  %v7896_v13 = vld [vmem:[#allocation10 + $0x588] ss:$16 sps:$4 sm:$0xff]  }
 0x1d4   :  { %2855 = vmatpush2.bf16.msra.mxu0 %v7818_v25  ;;  %2896 = vmatpush2.bf16.msra.mxu1 %v7821_v26  ;;  %v7899_v25 = vld [vmem:[#allocation10 + $0x788] ss:$16 sps:$4 sm:$0xff]   ;;  %v7904_v26 = vld [vmem:[#allocation10 + $0x56c] ss:$16 sps:$4 sm:$0xff]  }
 0x1d5   :  { %2856 = vmatprep.subr.bf16.mxu0 %v7826_v27  ;;  %2897 = vmatprep.subr.bf16.mxu1 %v7829_v28  ;;  %v7907_v27 = vld [vmem:[#allocation10 + $0x76c] ss:$16 sps:$4 sm:$0xff]   ;;  %v7902_v28 = vld [vmem:[#allocation10 + $0x568] ss:$16 sps:$4 sm:$0xff]  }
 0x1d8   :  { %2857 = vmatpush2.bf16.msra.mxu0 %v7824_v29  ;;  %2898 = vmatpush2.bf16.msra.mxu1 %v7827_v30  ;;  %v7905_v29 = vld [vmem:[#allocation10 + $0x768] ss:$16 sps:$4 sm:$0xff]   ;;  %v7910_v30 = vld [vmem:[#allocation10 + $0x54c] ss:$16 sps:$4 sm:$0xff]  }
 0x1d9   :  { %2908 = vmatprep.subr.bf16.mxu0 %v7832_v31  ;;  %2949 = vmatprep.subr.bf16.mxu1 %v7835_v32  ;;  %v7913_v31 = vld [vmem:[#allocation10 + $0x74c] ss:$16 sps:$4 sm:$0xff]   ;;  %v7908_v32 = vld [vmem:[#allocation10 + $0x548] ss:$16 sps:$4 sm:$0xff]  }
 0x1db   :  { %2859 = vmatmul.mubr.bf16.vlgmr.msra.gmra.mxu0 %v8668_v40  ;;  %2900 = vmatmul.mubr.bf16.vlgmr.msra.gmra.mxu1 %v8664_v37  ;;  %v7845_v40 = vld [vmem:[#allocation10 + $0x6a8] ss:$16 sps:$4 sm:$0xff]   ;;  %v7853_v37 = vld [vmem:[#allocation10 + $0x68c] ss:$16 sps:$4 sm:$0xff]  }
 0x1dc   :  { %2909 = vmatpush1.bf16.msra.mxu0 %v7830_v33  ;;  %2940 = vmatprep.mubr.bf16.mxu0 %v8694_v17  ;;  %v7851_v17 = vld [vmem:[#allocation10 + $0x688] ss:$16 sps:$4 sm:$0xff]  }
 0x1dd   :  { %2950 = vmatpush1.bf16.msra.mxu1 %v7833_v38  ;;  %2981 = vmatprep.mubr.bf16.mxu1 %v8698_v21  ;;  %v7854_v21 = vld [vmem:[#allocation10 + $0x468] ss:$16 sps:$4 sm:$0xff]   ;;  %v7916_v38 = vld [vmem:[#allocation10 + $0x52c] ss:$16 sps:$4 sm:$0xff]  }
 0x1de   :  { %2910 = vmatprep.subr.bf16.mxu0 %v7838_v41  ;;  %2951 = vmatprep.subr.bf16.mxu1 %v7841_v35  ;;  %v7911_v33 = vld [vmem:[#allocation10 + $0x748] ss:$16 sps:$4 sm:$0xff]   ;;  %v7919_v41 = vld [vmem:[#allocation10 + $0x72c] ss:$16 sps:$4 sm:$0xff]  }
 0x1df   :  { %v7914_v35 = vld [vmem:[#allocation10 + $0x528] ss:$16 sps:$4 sm:$0xff]  }
 0x1e0   :  { %2911 = vmatpush1.bf16.msra.mxu0 %v7836_v42  ;;  %v7917_v42 = vld [vmem:[#allocation10 + $0x728] ss:$16 sps:$4 sm:$0xff]  }
 0x1e1   :  { %2952 = vmatpush1.bf16.msra.mxu1 %v7839_v57  ;;  %2912 = vmatprep.subr.bf16.mxu0 %v7844_v44  ;;  %v7922_v57 = vld [vmem:[#allocation10 + $0x50c] ss:$16 sps:$4 sm:$0xff]  }
 0x1e2   :  { %2953 = vmatprep.subr.bf16.mxu1 %v7847_v45  ;;  %v7925_v44 = vld [vmem:[#allocation10 + $0x70c] ss:$16 sps:$4 sm:$0xff]   ;;  %v7920_v45 = vld [vmem:[#allocation10 + $0x508] ss:$16 sps:$4 sm:$0xff]  }
 0x1e4   :  { %2913 = vmatpush1.bf16.msra.mxu0 %v7842_v46  ;;  %v7923_v46 = vld [vmem:[#allocation10 + $0x708] ss:$16 sps:$4 sm:$0xff]  }
 0x1e5   :  { %2954 = vmatpush1.bf16.msra.mxu1 %v7845_v40  ;;  %2914 = vmatprep.subr.bf16.mxu0 %v7850_v47  ;;  %v7926_v40 = vld [vmem:[#allocation11 + $0x78] sm:$0xff]  }
 0x1e6   :  { %2955 = vmatprep.subr.bf16.mxu1 %v7853_v37  ;;  %v7927_v47 = vld [vmem:[#allocation11 + $0x38] sm:$0xff]   ;;  %v7928_v37 = vld [vmem:[#allocation11 + $0x70] sm:$0xff]  }
 0x1e8   :  { %2915 = vmatpush1.bf16.msra.mxu0 %v7848_v48 }
 0x1e9   :  { %2956 = vmatpush1.bf16.msra.mxu1 %v7851_v17  ;;  %2916 = vmatprep.subr.bf16.mxu0 %v7856_v49  ;;  %v7929_v49 = vld [vmem:[#allocation11 + $0x30] sm:$0xff]  }
 0x1ea   :  { %2957 = vmatprep.subr.bf16.mxu1 %v7859_v50 }
 0x1ec   :  { %2917 = vmatpush1.bf16.msra.mxu0 %v7854_v21  ;;  %v7930_v21 = vld [vmem:[#allocation11 + $0x68] sm:$0xff]  }
 0x1ed   :  { %2958 = vmatpush1.bf16.msra.mxu1 %v7857_v51  ;;  %2918 = vmatprep.subr.bf16.mxu0 %v7862_v52 }
 0x1ee   :  { %2959 = vmatprep.subr.bf16.mxu1 %v7865_v53 }
 0x1f0   :  { %2919 = vmatpush1.bf16.msra.mxu0 %v7860_v54  ;;  %v7931_v54 = vld [vmem:[#allocation11 + $0x28] sm:$0xff]  }
 0x1f1   :  { %2960 = vmatpush1.bf16.msra.mxu1 %v7863_v55  ;;  %2920 = vmatprep.subr.bf16.mxu0 %v7868_v56  ;;  %v7932_v56 = vld [vmem:[#allocation11 + $0x60] sm:$0xff]  }
 0x1f2   :  { %2961 = vmatprep.subr.bf16.mxu1 %v7871_v58  ;;  %v7933_v58 = vld [vmem:[#allocation11 + $0x20] sm:$0xff]  }
 0x1f4   :  { %2921 = vmatpush1.bf16.msra.mxu0 %v7866_v59  ;;  %v7935_v59 = vld [vmem:[#allocation11 + $0x18] sm:$0xff]  }
 0x1f5   :  { %2962 = vmatpush1.bf16.msra.mxu1 %v7869_v60  ;;  %2922 = vmatprep.subr.bf16.mxu0 %v7874_v61  ;;  %v7936_v60 = vld [vmem:[#allocation11 + $0x50] sm:$0xff]  }
 0x1f6   :  { %2963 = vmatprep.subr.bf16.mxu1 %v7877_v62  ;;  %v7937_v61 = vld [vmem:[#allocation11 + $0x10] sm:$0xff]   ;;  %v7938_v62 = vld [vmem:[#allocation11 + $0x48] sm:$0xff]  }
 0x1f8   :  { %2923 = vmatpush1.bf16.msra.mxu0 %v7872_v63  ;;  %v7939_v63 = vld [vmem:[#allocation11 + $0x8] sm:$0xff]  }
 0x1f9   :  { %2964 = vmatpush1.bf16.msra.mxu1 %v7875_v0  ;;  %2924 = vmatprep.subr.bf16.mxu0 %v7880_v1  ;;  %v7940_v0 = vld [vmem:[#allocation11 + $0x40] sm:$0xff]   ;;  %v8716_v1 = vld [vmem:[#allocation7 + $0x1c0] sm:$0xff] }
 0x1fa   :  { %2965 = vmatprep.subr.bf16.mxu1 %v7883_v2  ;;  %v8718_v2 = vld [vmem:[#allocation7 + $0x1e0] sm:$0xff] }
 0x1fc   :  { %2925 = vmatpush2.bf16.msra.mxu0 %v7878_v10  ;;  %v7941_v10 = vld [vmem:[#allocation11] sm:$0xff]  }
 0x1fd   :  { %2966 = vmatpush2.bf16.msra.mxu1 %v7881_v3  ;;  %2926 = vmatprep.subr.bf16.mxu0 %v7886_v4  ;;  %v7080_v3 = vcombine.high %v8716_v1, %v8718_v2  ;;  %v7942_v4 = vld [vmem:[#allocation11 + $0xf8] sm:$0xff]  }
 0x1fe   :  { %2967 = vmatprep.subr.bf16.mxu1 %v7889_v5  ;;  %v7943_v5 = vld [vmem:[#allocation11 + $0xb8] sm:$0xff]  }
 0x200   :  { %2927 = vmatpush2.bf16.msra.mxu0 %v7884_v6  ;;  %v7944_v6 = vld [vmem:[#allocation11 + $0xf0] sm:$0xff]  }
 0x201   :  { %2968 = vmatpush2.bf16.msra.mxu1 %v7887_v7  ;;  %2928 = vmatprep.subr.bf16.mxu0 %v7892_v8  ;;  %v7945_v7 = vld [vmem:[#allocation11 + $0xb0] sm:$0xff]   ;;  %v7946_v8 = vld [vmem:[#allocation11 + $0xe8] sm:$0xff]  }
 0x202   :  { %2969 = vmatprep.subr.bf16.mxu1 %v7895_v18  ;;  %v7947_v18 = vld [vmem:[#allocation11 + $0xa8] sm:$0xff]  }
 0x204   :  { %2929 = vmatpush2.bf16.msra.mxu0 %v7890_v19  ;;  %v8725_v19 = vld [vmem:[%s8873_s5] sm:$0xf] }
 0x205   :  { %2970 = vmatpush2.bf16.msra.mxu1 %v7893_v22  ;;  %2930 = vmatprep.subr.bf16.mxu0 %v7898_v23  ;;  %v7948_v22 = vld [vmem:[#allocation11 + $0xe0] sm:$0xff]  }
 0x206   :  { %2971 = vmatprep.subr.bf16.mxu1 %v7901_v24  ;;  %v7949_v23 = vld [vmem:[#allocation11 + $0xa0] sm:$0xff]   ;;  %v1365_v24 = vrot.slane %v8725_v19, %v8645_v11 }
 0x208   :  { %2931 = vmatpush2.bf16.msra.mxu0 %v7896_v13  ;;  %v1369_v13 = vrot.slane %v8725_v19, %v8651_v14 }
 0x209   :  { %2972 = vmatpush2.bf16.msra.mxu1 %v7899_v25  ;;  %2932 = vmatprep.subr.bf16.mxu0 %v7904_v26  ;;  %v7950_v25 = vld [vmem:[#allocation11 + $0xd8] sm:$0xff]  }
 0x20a   :  { %2973 = vmatprep.subr.bf16.mxu1 %v7907_v27  ;;  %v7951_v26 = vld [vmem:[#allocation11 + $0x98] sm:$0xff]  }
 0x20c   :  { %2933 = vmatpush2.bf16.msra.mxu0 %v7902_v28 }
 0x20d   :  { %2974 = vmatpush2.bf16.msra.mxu1 %v7905_v29  ;;  %2934 = vmatprep.subr.bf16.mxu0 %v7910_v30  ;;  %v7952_v29 = vld [vmem:[#allocation11 + $0xd0] sm:$0xff]  }
 0x20e   :  { %2975 = vmatprep.subr.bf16.mxu1 %v7913_v31 }
 0x210   :  { %2935 = vmatpush2.bf16.msra.mxu0 %v7908_v32  ;;  %v7953_v32 = vld [vmem:[#allocation11 + $0x90] sm:$0xff]  }
 0x211   :  { %2976 = vmatpush2.bf16.msra.mxu1 %v7911_v33  ;;  %2936 = vmatprep.subr.bf16.mxu0 %v7916_v38 }
 0x212   :  { %2977 = vmatprep.subr.bf16.mxu1 %v7919_v41 }
 0x214   :  { %2937 = vmatpush2.bf16.msra.mxu0 %v7914_v35 }
 0x215   :  { %2978 = vmatpush2.bf16.msra.mxu1 %v7917_v42  ;;  %2938 = vmatprep.subr.bf16.mxu0 %v7922_v57 }
 0x216   :  { %2979 = vmatprep.subr.bf16.mxu1 %v7925_v44 }
 0x218   :  { %2939 = vmatpush2.bf16.msra.mxu0 %v7920_v45  ;;  %v7954_v45 = vld [vmem:[#allocation11 + $0xc8] sm:$0xff]  }
 0x219   :  { %2980 = vmatpush2.bf16.msra.mxu1 %v7923_v46  ;;  %7440 = vmatprep.subr.bf16.mxu0 %v7926_v40  ;;  %v7955_v40 = vld [vmem:[#allocation11 + $0x88] sm:$0xff]  }
 0x21a   :  { %7462 = vmatprep.subr.bf16.mxu1 %v7942_v4 }
 0x21b   :  { %2941 = vmatmul.mubr.bf16.vlgmr.msra.gmra.mxu0 %v8696_v20  ;;  %v2696_v48 = vpop.f32.mrf.mxu0  ;;  %v8712_v17 = vpop.f32.mrf.mxu1 }
 0x21c   :  { %2982 = vmatmul.mubr.bf16.vlgmr.msra.gmra.mxu1 %v8692_v16  ;;  %7441 = vmatpush3.bf16.msra.mxu0 %v7927_v47  ;;  %v7934_v16 = vld [vmem:[#allocation11 + $0x58] sm:$0xff]   ;;  %v2697_v27 = vadd.f32 %v2696_v48, %v1365_v24 }
 0x21d   :  { %v2698_v50 = vpop.f32.mrf.mxu0  ;;  %7442 = vmatprep.subr.bf16.mxu0 %v7928_v37  ;;  %v8714_v51 = vpop.f32.mrf.mxu1  ;;  %7463 = vmatpush3.bf16.msra.mxu1 %v7943_v5 }
 0x21e   :  { %7464 = vmatprep.subr.bf16.mxu1 %v7944_v6  ;;  %v2699_v28 = vadd.f32 %v2698_v50, %v1369_v13  ;;  %v2738_v30 = vadd.f32 %v8712_v17, %v2697_v27  ;;  %v3370_v6 = vld [vmem:[#allocation7 + $0xc0] sm:$0xff] }
 0x21f   :  { %v2700_v52 = vpop.f32.mrf.mxu0  ;;  %v2741_v53 = vpop.f32.mrf.mxu1 }
 0x220   :  { %7443 = vmatpush3.bf16.msra.mxu0 %v7929_v49  ;;  %v2740_v33 = vadd.f32 %v8714_v51, %v2699_v28  ;;  %v3343_v49 = vld [vmem:[#allocation5 + $0x8] sm:$0xff]  ;;  %v3394_v51 = vld [vmem:[#allocation7 + $0x180] sm:$0xff]  ;;  %v7956_v53 = vld [vmem:[#allocation11 + $0xc0] sm:$0xff]  }
 0x221   :  { %v2701_v55 = vpop.f32.mrf.mxu0  ;;  %7444 = vmatprep.subr.bf16.mxu0 %v7930_v21  ;;  %v2742_v20 = vpop.f32.mrf.mxu1  ;;  %7465 = vmatpush3.bf16.msra.mxu1 %v7945_v7  ;;  %v3398_v52 = vld [vmem:[#allocation7 + $0x1a0] sm:$0xff] }
 0x222   :  { %7466 = vmatprep.subr.bf16.mxu1 %v7946_v8  ;;  %v8735_v20 = vpack.c.bf16 %v3343_v49, %v3343_v49  ;;  %v3374_v7 = vld [vmem:[#allocation7 + $0xe0] sm:$0xff] }
 0x223   :  { %v7047_v24 = vcombine.low %v3370_v6, %v3374_v7 }
 0x224   :  { %7445 = vmatpush3.bf16.msra.mxu0 %v7931_v54  ;;  %v7957_v54 = vld [vmem:[#allocation11 + $0x80] sm:$0xff]  }
 0x225   :  { %7446 = vmatprep.subr.bf16.mxu0 %v7932_v56  ;;  %7467 = vmatpush3.bf16.msra.mxu1 %v7947_v18  ;;  %v7079_v56 = vcombine.low %v8716_v1, %v8718_v2  ;;  %v7071_v1 = vcombine.low %v3394_v51, %v3398_v52  ;;  %v7048_v18 = vcombine.high %v3370_v6, %v3374_v7 }
 0x226   :  { %7468 = vmatprep.subr.bf16.mxu1 %v7948_v22  ;;  %v3362_v22 = vld [vmem:[#allocation7 + $0x80] sm:$0xff] }
 0x228   :  { %7447 = vmatpush3.bf16.msra.mxu0 %v7933_v58 }
 0x229   :  { %7448 = vmatprep.subr.bf16.mxu0 %v7934_v16  ;;  %7469 = vmatpush3.bf16.msra.mxu1 %v7949_v23  ;;  %v7072_v16 = vcombine.high %v3394_v51, %v3398_v52  ;;  %v3366_v23 = vld [vmem:[#allocation7 + $0xa0] sm:$0xff] }
 0x22a   :  { %7470 = vmatprep.subr.bf16.mxu1 %v7950_v25  ;;  %v7040_v13 = vcombine.high %v3362_v22, %v3366_v23  ;;  %v3354_v25 = vld [vmem:[#allocation7 + $0x40] sm:$0xff]  ;;  %v7039_v27 = vcombine.low %v3362_v22, %v3366_v23 }
 0x22b   :  { %v3438_v51 = vld [vmem:[#allocation7 + $0x2e0] sm:$0xff] }
 0x22c   :  { %7449 = vmatpush3.bf16.msra.mxu0 %v7935_v59  ;;  %v8737_v59 = vld [vmem:[#allocation7 + $0x1c8] sm:$0xff] }
 0x22d   :  { %7450 = vmatprep.subr.bf16.mxu0 %v7936_v60  ;;  %7471 = vmatpush3.bf16.msra.mxu1 %v7951_v26  ;;  %v8739_v60 = vld [vmem:[#allocation7 + $0x1e8] sm:$0xff]  ;;  %v3358_v26 = vld [vmem:[#allocation7 + $0x60] sm:$0xff] }
 0x22e   :  { %7472 = vmatprep.subr.bf16.mxu1 %v7952_v29  ;;  %v7032_v28 = vcombine.high %v3354_v25, %v3358_v26  ;;  %v3346_v29 = vld [vmem:[#allocation7] sm:$0xff] }
 0x230   :  { %7451 = vmatpush3.bf16.msra.mxu0 %v7937_v61  ;;  %v3386_v61 = vld [vmem:[#allocation7 + $0x140] sm:$0xff] }
 0x231   :  { %7452 = vmatprep.subr.bf16.mxu0 %v7938_v62  ;;  %7473 = vmatpush3.bf16.msra.mxu1 %v7953_v32  ;;  %v3390_v62 = vld [vmem:[#allocation7 + $0x160] sm:$0xff] }
 0x232   :  { %7474 = vmatprep.subr.bf16.mxu1 %v7954_v45  ;;  %v7064_v2 = vcombine.high %v3386_v61, %v3390_v62  ;;  %v7063_v4 = vcombine.low %v3386_v61, %v3390_v62  ;;  %v3422_v61 = vld [vmem:[#allocation7 + $0x260] sm:$0xff] }
 0x234   :  { %7453 = vmatpush3.bf16.msra.mxu0 %v7939_v63  ;;  %v7081_v63 = vcombine.low %v8737_v59, %v8739_v60 }
 0x235   :  { %7454 = vmatprep.subr.bf16.mxu0 %v7940_v0  ;;  %7475 = vmatpush3.bf16.msra.mxu1 %v7955_v40  ;;  %v7082_v0 = vcombine.high %v8737_v59, %v8739_v60  ;;  %v3454_v40 = vld [vmem:[#allocation7 + $0x360] sm:$0xff]  ;;  %v3375_v59 = vld [vmem:[#allocation7 + $0xe8] sm:$0xff] }
 0x236   :  { %7476 = vmatprep.subr.bf16.mxu1 %v7956_v53  ;;  %v7969_v60 = vld [vmem:[#allocation10 + $0x84] ss:$16 sps:$4 sm:$0xff]  }
 0x238   :  { %7455 = vmatpush3.bf16.msra.mxu0 %v7941_v10  ;;  %v3378_v10 = vld [vmem:[#allocation7 + $0x100] sm:$0xff] }
 0x239   :  { %4156 = vmatprep.subr.bf16.mxu0 %v7080_v3  ;;  %7477 = vmatpush3.bf16.msra.mxu1 %v7957_v54  ;;  %v3382_v3 = vld [vmem:[#allocation7 + $0x120] sm:$0xff] }
 0x23a   :  { %4197 = vmatprep.subr.bf16.mxu1 %v7082_v0  ;;  %v7056_v5 = vcombine.high %v3378_v10, %v3382_v3  ;;  %v7055_v8 = vcombine.low %v3378_v10, %v3382_v3  ;;  %v3426_v54 = vld [vmem:[#allocation7 + $0x280] sm:$0xff] }
 0x25b   :  { %v2778_v31 = vpop.f32.mrf.mxu0  ;;  %v2819_v41 = vpop.f32.mrf.mxu1 }
 0x25c   :  { %v2779_v38 = vadd.f32 %v2778_v31, %v2738_v30  ;;  %v3350_v30 = vld [vmem:[#allocation7 + $0x20] sm:$0xff]  ;;  %v7031_v31 = vcombine.low %v3354_v25, %v3358_v26 }
 0x25d   :  { %v2780_v35 = vpop.f32.mrf.mxu0  ;;  %v2821_v44 = vpop.f32.mrf.mxu1  ;;  %v7024_v32 = vcombine.high %v3346_v29, %v3350_v30 }
 0x25e   :  { %v2820_v42 = vadd.f32 %v2819_v41, %v2779_v38  ;;  %v2781_v57 = vadd.f32 %v2780_v35, %v2740_v33  ;;  %v3466_v33 = vld [vmem:[#allocation7 + $0x3c0] sm:$0xff]  ;;  %v7023_v41 = vcombine.low %v3346_v29, %v3350_v30  ;;  %v3400_v29 = vld [vmem:[#allocation7 + $0x1b0] sm:$0xff] }
 0x25f   :  { %v2782_v46 = vpop.f32.mrf.mxu0  ;;  %v2823_v37 = vpop.f32.mrf.mxu1  ;;  %v3470_v38 = vld [vmem:[#allocation7 + $0x3e0] sm:$0xff] }
 0x260   :  { %v2822_v47 = vadd.f32 %v2821_v44, %v2781_v57  ;;  %v2990_v48 = vmax.f32 %v2820_v42, 0.0  ;;  %v7144_v35 = vcombine.high %v3466_v33, %v3470_v38  ;;  %v3458_v42 = vld [vmem:[#allocation7 + $0x380] sm:$0xff]  ;;  %v7143_v44 = vcombine.low %v3466_v33, %v3470_v38  ;;  %v3388_v33 = vld [vmem:[#allocation7 + $0x150] sm:$0xff] }
 0x261   :  { %v2783_v17 = vpop.f32.mrf.mxu0  ;;  %v2824_v21 = vpop.f32.mrf.mxu1  ;;  %v3462_v57 = vld [vmem:[#allocation7 + $0x3a0] sm:$0xff]  ;;  %v3392_v38 = vld [vmem:[#allocation7 + $0x170] sm:$0xff] }
 0x262   :  { %v2991_v50 = vmax.f32 %v2822_v47, 0.0  ;;  %v2994_v58 = vpack.c.bf16 %v2990_v48, %v2990_v48  ;;  %v7136_v45 = vcombine.high %v3458_v42, %v3462_v57  ;;  %v3450_v46 = vld [vmem:[#allocation7 + $0x340] sm:$0xff]  ;;  %v7135_v47 = vcombine.low %v3458_v42, %v3462_v57  ;;  %v3380_v42 = vld [vmem:[#allocation7 + $0x110] sm:$0xff] }
 0x263   :  { %v7128_v37 = vcombine.high %v3450_v46, %v3454_v40  ;;  %v3442_v48 = vld [vmem:[#allocation7 + $0x300] sm:$0xff]  ;;  %v7127_v49 = vcombine.low %v3450_v46, %v3454_v40  ;;  %v3384_v57 = vld [vmem:[#allocation7 + $0x130] sm:$0xff] }
 0x264   :  { %v2995_v55 = vpack.c.bf16 %v2991_v50, %v2991_v50  ;;  %v3446_v17 = vld [vmem:[#allocation7 + $0x320] sm:$0xff]  ;;  %v3372_v46 = vld [vmem:[#allocation7 + $0xd0] sm:$0xff] }
 0x265   :  { %v7120_v50 = vcombine.high %v3442_v48, %v3446_v17  ;;  %v3434_v21 = vld [vmem:[#allocation7 + $0x2c0] sm:$0xff]  ;;  %v7119_v52 = vcombine.low %v3442_v48, %v3446_v17  ;;  %v3376_v40 = vld [vmem:[#allocation7 + $0xf0] sm:$0xff] }
 0x266   :  { %3293 = vmatprep.mubr.bf16.mxu0 %v2995_v55  ;;  %v7112_v53 = vcombine.high %v3434_v21, %v3438_v51  ;;  %v3430_v55 = vld [vmem:[#allocation7 + $0x2a0] sm:$0xff]  ;;  %v3364_v48 = vld [vmem:[#allocation7 + $0x90] sm:$0xff] }
 0x267   :  { %3294 = vmatmul.mubr.bf16.vlgmr.msra.gmra.mxu0 %v2994_v58  ;;  %v7104_v58 = vcombine.high %v3426_v54, %v3430_v55  ;;  %v7103_v62 = vcombine.low %v3426_v54, %v3430_v55  ;;  %v3368_v17 = vld [vmem:[#allocation7 + $0xb0] sm:$0xff] }
 0x268   :  { %4157 = vmatpush1.bf16.msra.mxu0 %v7079_v56  ;;  %4188 = vmatprep.mubr.bf16.mxu0 %v8735_v20  ;;  %v7111_v56 = vcombine.low %v3434_v21, %v3438_v51  ;;  %v3356_v21 = vld [vmem:[#allocation7 + $0x50] sm:$0xff] }
 0x269   :  { %4158 = vmatprep.subr.bf16.mxu0 %v7072_v16  ;;  %v3418_v16 = vld [vmem:[#allocation7 + $0x240] sm:$0xff]  ;;  %v3360_v51 = vld [vmem:[#allocation7 + $0x70] sm:$0xff] }
 0x26a   :  { %v7096_v0 = vcombine.high %v3418_v16, %v3422_v61  ;;  %v3348_v54 = vld [vmem:[#allocation7 + $0x10] sm:$0xff] }
 0x26b   :  { %v3352_v55 = vld [vmem:[#allocation7 + $0x30] sm:$0xff] }
 0x26c   :  { %4159 = vmatpush1.bf16.msra.mxu0 %v7071_v1  ;;  %v3410_v1 = vld [vmem:[#allocation7 + $0x200] sm:$0xff] }
 0x26d   :  { %4160 = vmatprep.subr.bf16.mxu0 %v7064_v2  ;;  %v3414_v2 = vld [vmem:[#allocation7 + $0x220] sm:$0xff] }
 0x26e   :  { %v7088_v6 = vcombine.high %v3410_v1, %v3414_v2 }
 0x270   :  { %4161 = vmatpush1.bf16.msra.mxu0 %v7063_v4  ;;  %v7095_v4 = vcombine.low %v3418_v16, %v3422_v61  ;;  %v3468_v16 = vld [vmem:[#allocation7 + $0x3d0] sm:$0xff] }
 0x271   :  { %4162 = vmatprep.subr.bf16.mxu0 %v7056_v5  ;;  %v3472_v61 = vld [vmem:[#allocation7 + $0x3f0] sm:$0xff] }
 0x274   :  { %4163 = vmatpush1.bf16.msra.mxu0 %v7055_v8  ;;  %v3404_v8 = vld [vmem:[#allocation7 + $0x1d0] sm:$0xff] }
 0x275   :  { %4164 = vmatprep.subr.bf16.mxu0 %v7048_v18  ;;  %v3408_v18 = vld [vmem:[#allocation7 + $0x1f0] sm:$0xff] }
 0x276   :  { %v7084_v26 = vcombine.high %v3404_v8, %v3408_v18 }
 0x278   :  { %4165 = vmatpush1.bf16.msra.mxu0 %v7047_v24  ;;  %v7087_v24 = vcombine.low %v3410_v1, %v3414_v2  ;;  %v3460_v1 = vld [vmem:[#allocation7 + $0x390] sm:$0xff] }
 0x279   :  { %4166 = vmatprep.subr.bf16.mxu0 %v7040_v13  ;;  %v3342_v13 = vld [vmem:[#allocation5] sm:$0xff] }
 0x27a   :  { %v8754_v30 = vpack.c.bf16 %v3342_v13, %v3342_v13  ;;  %v3464_v2 = vld [vmem:[#allocation7 + $0x3b0] sm:$0xff] }
 0x27b   :  { %v3448_v13 = vld [vmem:[#allocation7 + $0x330] sm:$0xff] }
 0x27c   :  { %4167 = vmatpush1.bf16.msra.mxu0 %v7039_v27 }
 0x27d   :  { %4168 = vmatprep.subr.bf16.mxu0 %v7032_v28  ;;  %v3396_v28 = vld [vmem:[#allocation7 + $0x190] sm:$0xff] }
 0x280   :  { %4169 = vmatpush1.bf16.msra.mxu0 %v7031_v31  ;;  %v7083_v31 = vcombine.low %v3404_v8, %v3408_v18  ;;  %v3452_v8 = vld [vmem:[#allocation7 + $0x350] sm:$0xff] }
 0x281   :  { %4170 = vmatprep.subr.bf16.mxu0 %v7024_v32  ;;  %v7076_v32 = vcombine.high %v3396_v28, %v3400_v29  ;;  %v3456_v18 = vld [vmem:[#allocation7 + $0x370] sm:$0xff] }
 0x284   :  { %4171 = vmatpush1.bf16.msra.mxu0 %v7023_v41  ;;  %v7075_v41 = vcombine.low %v3396_v28, %v3400_v29  ;;  %v3440_v28 = vld [vmem:[#allocation7 + $0x2f0] sm:$0xff] }
 0x285   :  { %4172 = vmatprep.subr.bf16.mxu0 %v7144_v35  ;;  %v7068_v35 = vcombine.high %v3388_v33, %v3392_v38 }
 0x288   :  { %4173 = vmatpush2.bf16.msra.mxu0 %v7143_v44  ;;  %v7067_v44 = vcombine.low %v3388_v33, %v3392_v38  ;;  %v3428_v33 = vld [vmem:[#allocation7 + $0x290] sm:$0xff] }
 0x289   :  { %4174 = vmatprep.subr.bf16.mxu0 %v7136_v45  ;;  %v7060_v45 = vcombine.high %v3380_v42, %v3384_v57  ;;  %v3432_v38 = vld [vmem:[#allocation7 + $0x2b0] sm:$0xff] }
 0x28c   :  { %4175 = vmatpush2.bf16.msra.mxu0 %v7135_v47  ;;  %v7059_v47 = vcombine.low %v3380_v42, %v3384_v57  ;;  %v7108_v42 = vcombine.high %v3428_v33, %v3432_v38 }
 0x28d   :  { %4176 = vmatprep.subr.bf16.mxu0 %v7128_v37  ;;  %v7052_v37 = vcombine.high %v3372_v46, %v3376_v40 }
 0x290   :  { %4177 = vmatpush2.bf16.msra.mxu0 %v7127_v49  ;;  %v7051_v49 = vcombine.low %v3372_v46, %v3376_v40  ;;  %v7107_v40 = vcombine.low %v3428_v33, %v3432_v38  ;;  %v7964_v33 = vld [vmem:[#allocation10 + $0xa0] ss:$16 sps:$4 sm:$0xff]  }
 0x291   :  { %4178 = vmatprep.subr.bf16.mxu0 %v7120_v50  ;;  %v7044_v50 = vcombine.high %v3364_v48, %v3368_v17  ;;  %v3371_v38 = vld [vmem:[#allocation7 + $0xc8] sm:$0xff] }
 0x294   :  { %4179 = vmatpush2.bf16.msra.mxu0 %v7119_v52  ;;  %v7043_v52 = vcombine.low %v3364_v48, %v3368_v17  ;;  %v3412_v48 = vld [vmem:[#allocation7 + $0x210] sm:$0xff] }
 0x295   :  { %4180 = vmatprep.subr.bf16.mxu0 %v7112_v53  ;;  %v7036_v53 = vcombine.high %v3356_v21, %v3360_v51  ;;  %v3416_v17 = vld [vmem:[#allocation7 + $0x230] sm:$0xff] }
 0x298   :  { %4181 = vmatpush2.bf16.msra.mxu0 %v7111_v56  ;;  %v7035_v56 = vcombine.low %v3356_v21, %v3360_v51 }
 0x299   :  { %4182 = vmatprep.subr.bf16.mxu0 %v7104_v58  ;;  %v7028_v58 = vcombine.high %v3348_v54, %v3352_v55 }
 0x29b   :  { %v8746_v10 = vpop.f32.mrf.mxu0  ;;  %v8748_v3 = vpop.f32.mrf.mxu1 }
 0x29c   :  { %4183 = vmatpush2.bf16.msra.mxu0 %v7103_v62  ;;  %v7027_v62 = vcombine.low %v3348_v54, %v3352_v55 }
 0x29d   :  { %v8750_v5 = vpop.f32.mrf.mxu0  ;;  %4184 = vmatprep.subr.bf16.mxu0 %v7096_v0  ;;  %v8752_v7 = vpop.f32.mrf.mxu1  ;;  %v7148_v0 = vcombine.high %v3468_v16, %v3472_v61 }
 0x29f   :  { %v2864_v22 = vpop.f32.mrf.mxu0  ;;  %v2905_v23 = vpop.f32.mrf.mxu1 }
 0x2a0   :  { %4185 = vmatpush2.bf16.msra.mxu0 %v7095_v4  ;;  %v7147_v4 = vcombine.low %v3468_v16, %v3472_v61  ;;  %v7139_v22 = vcombine.low %v3460_v1, %v3464_v2  ;;  %v7132_v23 = vcombine.high %v3452_v8, %v3456_v18 }
 0x2a1   :  { %v2865_v25 = vpop.f32.mrf.mxu0  ;;  %4186 = vmatprep.subr.bf16.mxu0 %v7088_v6  ;;  %v2906_v27 = vpop.f32.mrf.mxu1  ;;  %v7140_v6 = vcombine.high %v3460_v1, %v3464_v2  ;;  %v3395_v1 = vld [vmem:[#allocation7 + $0x188] sm:$0xff] }
 0x2a2   :  { %v7131_v25 = vcombine.low %v3452_v8, %v3456_v18  ;;  %v3436_v27 = vld [vmem:[#allocation7 + $0x2d0] sm:$0xff]  ;;  %v3399_v2 = vld [vmem:[#allocation7 + $0x1a8] sm:$0xff] }
 0x2a3   :  { %v7074_v8 = vcombine.high %v3395_v1, %v3399_v2  ;;  %v7958_v18 = vld [vmem:[#allocation10 + $0xe0] ss:$16 sps:$4 sm:$0xff]  }
 0x2a4   :  { %4187 = vmatpush2.bf16.msra.mxu0 %v7087_v24  ;;  %v3444_v24 = vld [vmem:[#allocation7 + $0x310] sm:$0xff] }
 0x2a5   :  { %4238 = vmatprep.subr.bf16.mxu0 %v7084_v26  ;;  %v7124_v26 = vcombine.high %v3444_v24, %v3448_v13  ;;  %v7123_v29 = vcombine.low %v3444_v24, %v3448_v13  ;;  %v7963_v24 = vld [vmem:[#allocation10 + $0xc4] ss:$16 sps:$4 sm:$0xff]   ;;  %v7073_v13 = vcombine.low %v3395_v1, %v3399_v2  ;;  %v7982_v1 = vld [vmem:[#allocation10 + $0x1e0] ss:$16 sps:$4 sm:$0xff]  }
 0x2a6   :  { %v3451_v2 = vld [vmem:[#allocation7 + $0x348] sm:$0xff] }
 0x2a7   :  { %4189 = vmatmul.mubr.bf16.vlgmr.msra.gmra.mxu0 %v8754_v30 }
 0x2a8   :  { %4239 = vmatpush1.bf16.msra.mxu0 %v7083_v31  ;;  %4270 = vmatprep.mubr.bf16.mxu0 %v8735_v20  ;;  %v7116_v31 = vcombine.high %v3436_v27, %v3440_v28 }
 0x2a9   :  { %4240 = vmatprep.subr.bf16.mxu0 %v7076_v32  ;;  %v1373_v32 = vrot.slane %v8725_v19, %v8648_v12 }
 0x2ab   :  { %v2861_v57 = vadd.f32 %v8746_v10, %v1373_v32 }
 0x2ac   :  { %4241 = vmatpush1.bf16.msra.mxu0 %v7075_v41  ;;  %v1377_v41 = vrot.slane %v8725_v19, %v8654_v15 }
 0x2ad   :  { %4242 = vmatprep.subr.bf16.mxu0 %v7068_v35  ;;  %v7115_v35 = vcombine.low %v3436_v27, %v3440_v28  ;;  %v3379_v27 = vld [vmem:[#allocation7 + $0x108] sm:$0xff] }
 0x2ae   :  { %v2863_v46 = vadd.f32 %v8750_v5, %v1377_v41  ;;  %v3383_v28 = vld [vmem:[#allocation7 + $0x128] sm:$0xff]  ;;  %v7050_v41 = vcombine.high %v3371_v38, %v3375_v59 }
 0x2af   :  { %v7058_v32 = vcombine.high %v3379_v27, %v3383_v28 }
 0x2b0   :  { %4243 = vmatpush1.bf16.msra.mxu0 %v7067_v44  ;;  %v3420_v44 = vld [vmem:[#allocation7 + $0x250] sm:$0xff]  ;;  %v2904_v19 = vadd.f32 %v8752_v7, %v2863_v46 }
 0x2b1   :  { %4244 = vmatprep.subr.bf16.mxu0 %v7060_v45  ;;  %v3424_v45 = vld [vmem:[#allocation7 + $0x270] sm:$0xff] }
 0x2b2   :  { %v7099_v51 = vcombine.low %v3420_v44, %v3424_v45 }
 0x2b4   :  { %4245 = vmatpush1.bf16.msra.mxu0 %v7059_v47  ;;  %v7100_v47 = vcombine.high %v3420_v44, %v3424_v45  ;;  %v7972_v44 = vld [vmem:[#allocation10 + $0x64] ss:$16 sps:$4 sm:$0xff]   ;;  %v7049_v45 = vcombine.low %v3371_v38, %v3375_v59  ;;  %v7991_v38 = vld [vmem:[#allocation10 + $0x180] ss:$16 sps:$4 sm:$0xff]  }
 0x2b5   :  { %4246 = vmatprep.subr.bf16.mxu0 %v7052_v37  ;;  %v2902_v37 = vadd.f32 %v8748_v3, %v2861_v57  ;;  %v7091_v3 = vcombine.low %v3412_v48, %v3416_v17  ;;  %v3367_v57 = vld [vmem:[#allocation7 + $0xa8] sm:$0xff] }
 0x2b6   :  { %v3427_v59 = vld [vmem:[#allocation7 + $0x288] sm:$0xff] }
 0x2b8   :  { %4247 = vmatpush1.bf16.msra.mxu0 %v7051_v49 }
 0x2b9   :  { %4248 = vmatprep.subr.bf16.mxu0 %v7044_v50 }
 0x2bc   :  { %4249 = vmatpush1.bf16.msra.mxu0 %v7043_v52  ;;  %v7092_v52 = vcombine.high %v3412_v48, %v3416_v17  ;;  %v7975_v48 = vld [vmem:[#allocation10 + $0x44] ss:$16 sps:$4 sm:$0xff]  }
 0x2bd   :  { %4250 = vmatprep.subr.bf16.mxu0 %v7036_v53 }
 0x2c0   :  { %4251 = vmatpush1.bf16.msra.mxu0 %v7035_v56 }
 0x2c1   :  { %4252 = vmatprep.subr.bf16.mxu0 %v7028_v58 }
 0x2c4   :  { %4253 = vmatpush1.bf16.msra.mxu0 %v7027_v62  ;;  %v7960_v62 = vld [vmem:[#allocation10 + $0xe4] ss:$16 sps:$4 sm:$0xff]  }
 0x2c5   :  { %4254 = vmatprep.subr.bf16.mxu0 %v7148_v0 }
 0x2c8   :  { %4255 = vmatpush2.bf16.msra.mxu0 %v7147_v4 }
 0x2c9   :  { %4256 = vmatprep.subr.bf16.mxu0 %v7140_v6 }
 0x2cc   :  { %4257 = vmatpush2.bf16.msra.mxu0 %v7139_v22  ;;  %v3387_v22 = vld [vmem:[#allocation7 + $0x148] sm:$0xff] }
 0x2cd   :  { %4258 = vmatprep.subr.bf16.mxu0 %v7132_v23  ;;  %v3391_v23 = vld [vmem:[#allocation7 + $0x168] sm:$0xff] }
 0x2d0   :  { %4259 = vmatpush2.bf16.msra.mxu0 %v7131_v25  ;;  %v7066_v25 = vcombine.high %v3387_v22, %v3391_v23 }
 0x2d1   :  { %4260 = vmatprep.subr.bf16.mxu0 %v7124_v26  ;;  %v7961_v26 = vld [vmem:[#allocation10 + $0xc0] ss:$16 sps:$4 sm:$0xff]  }
 0x2d4   :  { %4261 = vmatpush2.bf16.msra.mxu0 %v7123_v29  ;;  %v7966_v29 = vld [vmem:[#allocation10 + $0xa4] ss:$16 sps:$4 sm:$0xff]  }
 0x2d5   :  { %4262 = vmatprep.subr.bf16.mxu0 %v7116_v31  ;;  %v7065_v31 = vcombine.low %v3387_v22, %v3391_v23  ;;  %v7985_v22 = vld [vmem:[#allocation10 + $0x1c0] ss:$16 sps:$4 sm:$0xff]  }
 0x2d6   :  { %v3443_v23 = vld [vmem:[#allocation7 + $0x308] sm:$0xff] }
 0x2d8   :  { %4263 = vmatpush2.bf16.msra.mxu0 %v7115_v35  ;;  %v7967_v35 = vld [vmem:[#allocation10 + $0x80] ss:$16 sps:$4 sm:$0xff]  }
 0x2d9   :  { %4264 = vmatprep.subr.bf16.mxu0 %v7108_v42  ;;  %v3363_v42 = vld [vmem:[#allocation7 + $0x88] sm:$0xff] }
 0x2da   :  { %v7042_v46 = vcombine.high %v3363_v42, %v3367_v57  ;;  %v7041_v17 = vcombine.low %v3363_v42, %v3367_v57  ;;  %v7994_v42 = vld [vmem:[#allocation10 + $0x160] ss:$16 sps:$4 sm:$0xff]  }
 0x2db   :  { %v2942_v49 = vpop.f32.mrf.mxu0  ;;  %v3419_v57 = vld [vmem:[#allocation7 + $0x248] sm:$0xff] }
 0x2dc   :  { %v2943_v50 = vadd.f32 %v2942_v49, %v2902_v37  ;;  %v2983_v21 = vpop.f32.mrf.mxu1  ;;  %4265 = vmatpush2.bf16.msra.mxu0 %v7107_v40  ;;  %v7970_v40 = vld [vmem:[#allocation10 + $0x60] ss:$16 sps:$4 sm:$0xff]  }
 0x2dd   :  { %v2944_v10 = vpop.f32.mrf.mxu0  ;;  %4266 = vmatprep.subr.bf16.mxu0 %v7100_v47  ;;  %v3355_v47 = vld [vmem:[#allocation7 + $0x48] sm:$0xff] }
 0x2de   :  { %v2984_v53 = vadd.f32 %v2983_v21, %v2943_v50  ;;  %v2945_v5 = vadd.f32 %v2944_v10, %v2904_v19  ;;  %v2985_v54 = vpop.f32.mrf.mxu1  ;;  %v3359_v37 = vld [vmem:[#allocation7 + $0x68] sm:$0xff] }
 0x2df   :  { %v2946_v55 = vpop.f32.mrf.mxu0  ;;  %v7034_v49 = vcombine.high %v3355_v47, %v3359_v37  ;;  %v7973_v19 = vld [vmem:[#allocation10 + $0x40] ss:$16 sps:$4 sm:$0xff]   ;;  %v7033_v10 = vcombine.low %v3355_v47, %v3359_v37 }
 0x2e0   :  { %v2986_v56 = vadd.f32 %v2985_v54, %v2945_v5  ;;  %v2987_v58 = vpop.f32.mrf.mxu1  ;;  %4267 = vmatpush2.bf16.msra.mxu0 %v7099_v51  ;;  %v2992_v16 = vmax.f32 %v2984_v53, 0.0  ;;  %v3347_v50 = vld [vmem:[#allocation7 + $0x8] sm:$0xff] }
 0x2e1   :  { %v2947_v61 = vpop.f32.mrf.mxu0  ;;  %4268 = vmatprep.subr.bf16.mxu0 %v7092_v52  ;;  %v3351_v21 = vld [vmem:[#allocation7 + $0x28] sm:$0xff] }
 0x2e2   :  { %v2993_v7 = vmax.f32 %v2986_v56, 0.0  ;;  %v2988_v0 = vpop.f32.mrf.mxu1  ;;  %v2996_v6 = vpack.c.bf16 %v2992_v16, %v2992_v16  ;;  %v7978_v51 = vld [vmem:[#allocation10 + $0x24] ss:$16 sps:$4 sm:$0xff]   ;;  %v7026_v52 = vcombine.high %v3347_v50, %v3351_v21  ;;  %v7976_v53 = vld [vmem:[#allocation10 + $0x20] ss:$16 sps:$4 sm:$0xff]   ;;  %v7025_v56 = vcombine.low %v3347_v50, %v3351_v21 }
 0x2e3   :  { %v3467_v5 = vld [vmem:[#allocation7 + $0x3c8] sm:$0xff]  ;;  %v3405_v21 = vld [vmem:[#allocation7 + $0x1d8] sm:$0xff] }
 0x2e4   :  { %v2997_v4 = vpack.c.bf16 %v2993_v7, %v2993_v7  ;;  %4269 = vmatpush2.bf16.msra.mxu0 %v7091_v3  ;;  %v3471_v54 = vld [vmem:[#allocation7 + $0x3e8] sm:$0xff] }
 0x2e5   :  { %5894 = vmatprep.subr.bf16.mxu0 %v7960_v62  ;;  %v7981_v55 = vld [vmem:[#allocation10 + $0x4] ss:$16 sps:$4 sm:$0xff]   ;;  %v7146_v58 = vcombine.high %v3467_v5, %v3471_v54  ;;  %v7979_v3 = vld [vmem:[#allocation10] ss:$16 sps:$4 sm:$0xff]   ;;  %v7145_v7 = vcombine.low %v3467_v5, %v3471_v54 }
 0x2e6   :  { %3333 = vmatprep.mubr.bf16.mxu1 %v2997_v4  ;;  %v3459_v16 = vld [vmem:[#allocation7 + $0x388] sm:$0xff]  ;;  %v3397_v54 = vld [vmem:[#allocation7 + $0x198] sm:$0xff] }
 0x2e7   :  { %3334 = vmatmul.mubr.bf16.vlgmr.msra.gmra.mxu1 %v2996_v6  ;;  %4271 = vmatmul.mubr.bf16.vlgmr.msra.gmra.mxu0 %v8754_v30  ;;  %v3463_v61 = vld [vmem:[#allocation7 + $0x3a8] sm:$0xff] }
 0x2e8   :  { %4198 = vmatpush1.bf16.msra.mxu1 %v7081_v63  ;;  %4229 = vmatprep.mubr.bf16.mxu1 %v8735_v20  ;;  %v7057_v63 = vcombine.low %v3379_v27, %v3383_v28  ;;  %v7984_v62 = vld [vmem:[#allocation10 + $0x1e4] ss:$16 sps:$4 sm:$0xff]   ;;  %v7138_v0 = vcombine.high %v3459_v16, %v3463_v61  ;;  %v7988_v27 = vld [vmem:[#allocation10 + $0x1a0] ss:$16 sps:$4 sm:$0xff]  }
 0x2e9   :  { %4199 = vmatprep.subr.bf16.mxu1 %v7074_v8  ;;  %5895 = vmatpush1.bf16.msra.mxu0 %v7958_v18  ;;  %v3455_v4 = vld [vmem:[#allocation7 + $0x368] sm:$0xff]  ;;  %v7137_v8 = vcombine.low %v3459_v16, %v3463_v61  ;;  %v3389_v16 = vld [vmem:[#allocation7 + $0x158] sm:$0xff] }
 0x2ea   :  { %5896 = vmatprep.subr.bf16.mxu0 %v7963_v24  ;;  %v7987_v6 = vld [vmem:[#allocation10 + $0x1c4] ss:$16 sps:$4 sm:$0xff]   ;;  %v7130_v18 = vcombine.high %v3451_v2, %v3455_v4  ;;  %v7997_v47 = vld [vmem:[#allocation10 + $0x140] ss:$16 sps:$4 sm:$0xff]  }
 0x2eb   :  { %v3447_v24 = vld [vmem:[#allocation7 + $0x328] sm:$0xff]  ;;  %v3393_v61 = vld [vmem:[#allocation7 + $0x178] sm:$0xff] }
 0x2ec   :  { %4200 = vmatpush1.bf16.msra.mxu1 %v7073_v13  ;;  %v7990_v13 = vld [vmem:[#allocation10 + $0x1a4] ss:$16 sps:$4 sm:$0xff]   ;;  %v8000_v50 = vld [vmem:[#allocation10 + $0x120] ss:$16 sps:$4 sm:$0xff]  }
 0x2ed   :  { %4201 = vmatprep.subr.bf16.mxu1 %v7066_v25  ;;  %5897 = vmatpush1.bf16.msra.mxu0 %v7961_v26  ;;  %v7129_v25 = vcombine.low %v3451_v2, %v3455_v4  ;;  %v7122_v26 = vcombine.high %v3443_v23, %v3447_v24  ;;  %v3435_v28 = vld [vmem:[#allocation7 + $0x2c8] sm:$0xff]  ;;  %v3381_v4 = vld [vmem:[#allocation7 + $0x118] sm:$0xff] }
 0x2ee   :  { %5898 = vmatprep.subr.bf16.mxu0 %v7966_v29  ;;  %v3439_v29 = vld [vmem:[#allocation7 + $0x2e8] sm:$0xff] }
 0x2ef   :  { %v3411_v37 = vld [vmem:[#allocation7 + $0x208] sm:$0xff] }
 0x2f0   :  { %4202 = vmatpush1.bf16.msra.mxu1 %v7065_v31  ;;  %v7993_v31 = vld [vmem:[#allocation10 + $0x184] ss:$16 sps:$4 sm:$0xff]   ;;  %v8003_v5 = vld [vmem:[#allocation10 + $0x100] ss:$16 sps:$4 sm:$0xff]  }
 0x2f1   :  { %4203 = vmatprep.subr.bf16.mxu1 %v7058_v32  ;;  %5899 = vmatpush1.bf16.msra.mxu0 %v7964_v33  ;;  %v7121_v32 = vcombine.low %v3443_v23, %v3447_v24  ;;  %v7114_v33 = vcombine.high %v3435_v28, %v3439_v29  ;;  %v3373_v24 = vld [vmem:[#allocation7 + $0xd8] sm:$0xff] }
 0x2f2   :  { %5900 = vmatprep.subr.bf16.mxu0 %v7969_v60  ;;  %v3431_v60 = vld [vmem:[#allocation7 + $0x2a8] sm:$0xff] }
 0x2f4   :  { %4204 = vmatpush1.bf16.msra.mxu1 %v7057_v63  ;;  %v7996_v63 = vld [vmem:[#allocation10 + $0x164] ss:$16 sps:$4 sm:$0xff]  }
 0x2f5   :  { %4205 = vmatprep.subr.bf16.mxu1 %v7050_v41  ;;  %5901 = vmatpush1.bf16.msra.mxu0 %v7967_v35  ;;  %v7113_v41 = vcombine.low %v3435_v28, %v3439_v29  ;;  %v7106_v35 = vcombine.high %v3427_v59, %v3431_v60 }
 0x2f6   :  { %5902 = vmatprep.subr.bf16.mxu0 %v7972_v44  ;;  %v3423_v44 = vld [vmem:[#allocation7 + $0x268] sm:$0xff] }
 0x2f8   :  { %4206 = vmatpush1.bf16.msra.mxu1 %v7049_v45  ;;  %v7999_v45 = vld [vmem:[#allocation10 + $0x144] ss:$16 sps:$4 sm:$0xff]  }
 0x2f9   :  { %4207 = vmatprep.subr.bf16.mxu1 %v7042_v46  ;;  %5903 = vmatpush1.bf16.msra.mxu0 %v7970_v40  ;;  %v7105_v46 = vcombine.low %v3427_v59, %v3431_v60  ;;  %v7098_v40 = vcombine.high %v3419_v57, %v3423_v44  ;;  %v3349_v59 = vld [vmem:[#allocation7 + $0x18] sm:$0xff] }
 0x2fa   :  { %5904 = vmatprep.subr.bf16.mxu0 %v7975_v48  ;;  %v3415_v48 = vld [vmem:[#allocation7 + $0x228] sm:$0xff]  ;;  %v3353_v60 = vld [vmem:[#allocation7 + $0x38] sm:$0xff] }
 0x2fc   :  { %4208 = vmatpush1.bf16.msra.mxu1 %v7041_v17  ;;  %v8002_v17 = vld [vmem:[#allocation10 + $0x124] ss:$16 sps:$4 sm:$0xff]  }
 0x2fd   :  { %4209 = vmatprep.subr.bf16.mxu1 %v7034_v49  ;;  %5905 = vmatpush1.bf16.msra.mxu0 %v7973_v19  ;;  %v7097_v49 = vcombine.low %v3419_v57, %v3423_v44  ;;  %v7090_v19 = vcombine.high %v3411_v37, %v3415_v48  ;;  %v7029_v57 = vcombine.low %v3349_v59, %v3353_v60 }
 0x2fe   :  { %5906 = vmatprep.subr.bf16.mxu0 %v7978_v51  ;;  %v3409_v51 = vld [vmem:[#allocation7 + $0x1f8] sm:$0xff] }
 0x300   :  { %4210 = vmatpush1.bf16.msra.mxu1 %v7033_v10  ;;  %v8005_v10 = vld [vmem:[#allocation10 + $0x104] ss:$16 sps:$4 sm:$0xff]  }
 0x301   :  { %4211 = vmatprep.subr.bf16.mxu1 %v7026_v52  ;;  %5907 = vmatpush1.bf16.msra.mxu0 %v7976_v53  ;;  %v7089_v52 = vcombine.low %v3411_v37, %v3415_v48  ;;  %v7086_v53 = vcombine.high %v3405_v21, %v3409_v51  ;;  %v3453_v37 = vld [vmem:[#allocation7 + $0x358] sm:$0xff] }
 0x302   :  { %5908 = vmatprep.subr.bf16.mxu0 %v7981_v55  ;;  %v3401_v55 = vld [vmem:[#allocation7 + $0x1b8] sm:$0xff] }
 0x303   :  { %v3457_v48 = vld [vmem:[#allocation7 + $0x378] sm:$0xff] }
 0x304   :  { %4212 = vmatpush1.bf16.msra.mxu1 %v7025_v56  ;;  %v8008_v56 = vld [vmem:[#allocation10 + $0x4e4] ss:$16 sps:$4 sm:$0xff]  }
 0x305   :  { %4213 = vmatprep.subr.bf16.mxu1 %v7146_v58  ;;  %5909 = vmatpush1.bf16.msra.mxu0 %v7979_v3  ;;  %v7085_v58 = vcombine.low %v3405_v21, %v3409_v51  ;;  %v7078_v3 = vcombine.high %v3397_v54, %v3401_v55  ;;  %v7133_v21 = vcombine.low %v3453_v37, %v3457_v48 }
 0x306   :  { %5910 = vmatprep.subr.bf16.mxu0 %v7984_v62 }
 0x308   :  { %4214 = vmatpush2.bf16.msra.mxu1 %v7145_v7  ;;  %v7077_v7 = vcombine.low %v3397_v54, %v3401_v55  ;;  %v3429_v54 = vld [vmem:[#allocation7 + $0x298] sm:$0xff] }
 0x309   :  { %4215 = vmatprep.subr.bf16.mxu1 %v7138_v0  ;;  %5911 = vmatpush2.bf16.msra.mxu0 %v7982_v1  ;;  %v7070_v1 = vcombine.high %v3389_v16, %v3393_v61  ;;  %v3433_v55 = vld [vmem:[#allocation7 + $0x2b8] sm:$0xff] }
 0x30a   :  { %5912 = vmatprep.subr.bf16.mxu0 %v7987_v6  ;;  %v3385_v6 = vld [vmem:[#allocation7 + $0x138] sm:$0xff] }
 0x30b   :  { %v7062_v23 = vcombine.high %v3381_v4, %v3385_v6 }
 0x30c   :  { %4216 = vmatpush2.bf16.msra.mxu1 %v7137_v8 }
 0x30d   :  { %4217 = vmatprep.subr.bf16.mxu1 %v7130_v18  ;;  %5913 = vmatpush2.bf16.msra.mxu0 %v7985_v22  ;;  %v7069_v18 = vcombine.low %v3389_v16, %v3393_v61  ;;  %v3425_v16 = vld [vmem:[#allocation7 + $0x278] sm:$0xff]  ;;  %v7109_v61 = vcombine.low %v3429_v54, %v3433_v55 }
 0x30e   :  { %5914 = vmatprep.subr.bf16.mxu0 %v7990_v13  ;;  %v3377_v13 = vld [vmem:[#allocation7 + $0xf8] sm:$0xff] }
 0x30f   :  { %v7053_v28 = vcombine.low %v3373_v24, %v3377_v13 }
 0x310   :  { %4218 = vmatpush2.bf16.msra.mxu1 %v7129_v25  ;;  %v7061_v25 = vcombine.low %v3381_v4, %v3385_v6 }
 0x311   :  { %4219 = vmatprep.subr.bf16.mxu1 %v7122_v26  ;;  %5915 = vmatpush2.bf16.msra.mxu0 %v7988_v27  ;;  %v7054_v26 = vcombine.high %v3373_v24, %v3377_v13  ;;  %v3369_v27 = vld [vmem:[#allocation7 + $0xb8] sm:$0xff] }
 0x312   :  { %5916 = vmatprep.subr.bf16.mxu0 %v7993_v31  ;;  %v3357_v31 = vld [vmem:[#allocation7 + $0x58] sm:$0xff] }
 0x313   :  { %v8062_v24 = vld [vmem:[#allocation10 + $0x2c4] ss:$16 sps:$4 sm:$0xff]  }
 0x314   :  { %4220 = vmatpush2.bf16.msra.mxu1 %v7121_v32  ;;  %v3361_v32 = vld [vmem:[#allocation7 + $0x78] sm:$0xff] }
 0x315   :  { %4221 = vmatprep.subr.bf16.mxu1 %v7114_v33  ;;  %5917 = vmatpush2.bf16.msra.mxu0 %v7991_v38  ;;  %v7038_v38 = vcombine.high %v3357_v31, %v3361_v32 }
 0x316   :  { %5918 = vmatprep.subr.bf16.mxu0 %v7996_v63  ;;  %v7037_v63 = vcombine.low %v3357_v31, %v3361_v32 }
 0x318   :  { %4222 = vmatpush2.bf16.msra.mxu1 %v7113_v41  ;;  %v7030_v41 = vcombine.high %v3349_v59, %v3353_v60 }
 0x319   :  { %4223 = vmatprep.subr.bf16.mxu1 %v7106_v35  ;;  %5919 = vmatpush2.bf16.msra.mxu0 %v7994_v42  ;;  %v3469_v35 = vld [vmem:[#allocation7 + $0x3d8] sm:$0xff] }
 0x31a   :  { %5920 = vmatprep.subr.bf16.mxu0 %v7999_v45  ;;  %v3473_v42 = vld [vmem:[#allocation7 + $0x3f8] sm:$0xff] }
 0x31b   :  { %v7150_v44 = vcombine.high %v3469_v35, %v3473_v42  ;;  %v3461_v45 = vld [vmem:[#allocation7 + $0x398] sm:$0xff] }
 0x31c   :  { %4224 = vmatpush2.bf16.msra.mxu1 %v7105_v46  ;;  %v3465_v46 = vld [vmem:[#allocation7 + $0x3b8] sm:$0xff] }
 0x31d   :  { %4225 = vmatprep.subr.bf16.mxu1 %v7098_v40  ;;  %5921 = vmatpush2.bf16.msra.mxu0 %v7997_v47  ;;  %v7149_v40 = vcombine.low %v3469_v35, %v3473_v42  ;;  %v7142_v47 = vcombine.high %v3461_v45, %v3465_v46  ;;  %v8011_v35 = vld [vmem:[#allocation10 + $0x4c4] ss:$16 sps:$4 sm:$0xff]   ;;  %v8072_v42 = vld [vmem:[#allocation10 + $0x280] ss:$16 sps:$4 sm:$0xff]  }
 0x31e   :  { %5922 = vmatprep.subr.bf16.mxu0 %v8002_v17  ;;  %v7141_v17 = vcombine.low %v3461_v45, %v3465_v46  ;;  %v8014_v45 = vld [vmem:[#allocation10 + $0x4a4] ss:$16 sps:$4 sm:$0xff]   ;;  %v8078_v46 = vld [vmem:[#allocation10 + $0x260] ss:$16 sps:$4 sm:$0xff]  }
 0x320   :  { %4226 = vmatpush2.bf16.msra.mxu1 %v7097_v49  ;;  %v7134_v49 = vcombine.high %v3453_v37, %v3457_v48  ;;  %v8017_v37 = vld [vmem:[#allocation10 + $0x484] ss:$16 sps:$4 sm:$0xff]   ;;  %v8084_v48 = vld [vmem:[#allocation10 + $0x240] ss:$16 sps:$4 sm:$0xff]  }
 0x321   :  { %4227 = vmatprep.subr.bf16.mxu1 %v7090_v19  ;;  %5923 = vmatpush2.bf16.msra.mxu0 %v8000_v50  ;;  %v3445_v19 = vld [vmem:[#allocation7 + $0x318] sm:$0xff] }
 0x322   :  { %5924 = vmatprep.subr.bf16.mxu0 %v8005_v10  ;;  %v3449_v50 = vld [vmem:[#allocation7 + $0x338] sm:$0xff] }
 0x323   :  { %v7126_v51 = vcombine.high %v3445_v19, %v3449_v50  ;;  %v3437_v10 = vld [vmem:[#allocation7 + $0x2d8] sm:$0xff] }
 0x324   :  { %4228 = vmatpush2.bf16.msra.mxu1 %v7089_v52  ;;  %v3441_v52 = vld [vmem:[#allocation7 + $0x2f8] sm:$0xff] }
 0x325   :  { %4279 = vmatprep.subr.bf16.mxu1 %v7086_v53  ;;  %5925 = vmatpush2.bf16.msra.mxu0 %v8003_v5  ;;  %v7125_v53 = vcombine.low %v3445_v19, %v3449_v50  ;;  %v7118_v5 = vcombine.high %v3437_v10, %v3441_v52  ;;  %v8020_v19 = vld [vmem:[#allocation10 + $0x464] ss:$16 sps:$4 sm:$0xff]   ;;  %v8090_v50 = vld [vmem:[#allocation10 + $0x220] ss:$16 sps:$4 sm:$0xff]  }
 0x326   :  { %5976 = vmatprep.subr.bf16.mxu0 %v8008_v56  ;;  %v7117_v56 = vcombine.low %v3437_v10, %v3441_v52  ;;  %v8023_v10 = vld [vmem:[#allocation10 + $0x444] ss:$16 sps:$4 sm:$0xff]   ;;  %v8096_v52 = vld [vmem:[#allocation10 + $0x200] ss:$16 sps:$4 sm:$0xff]  }
 0x327   :  { %4230 = vmatmul.mubr.bf16.vlgmr.msra.gmra.mxu1 %v8754_v30  ;;  %v7456_v62 = vpop.f32.mrf.mxu0 }
 0x328   :  { %4280 = vmatpush1.bf16.msra.mxu1 %v7085_v58  ;;  %4311 = vmatprep.mubr.bf16.mxu1 %v8735_v20  ;;  %v3365_v20 = vld [vmem:[#allocation7 + $0x98] sm:$0xff]  ;;  %v7110_v58 = vcombine.high %v3429_v54, %v3433_v55 }
 0x329   :  { %v7457_v0 = vpop.f32.mrf.mxu0  ;;  %4281 = vmatprep.subr.bf16.mxu1 %v7078_v3  ;;  %v7046_v29 = vcombine.high %v3365_v20, %v3369_v27  ;;  %v7045_v33 = vcombine.low %v3365_v20, %v3369_v27  ;;  %v3421_v3 = vld [vmem:[#allocation7 + $0x258] sm:$0xff] }
 0x32a   :  { %v8773_v2 = vadd.f32 %v7457_v0, %v7456_v62  ;;  %v7102_v62 = vcombine.high %v3421_v3, %v3425_v16  ;;  %v3417_v0 = vld [vmem:[#allocation7 + $0x238] sm:$0xff] }
 0x32b   :  { %v7459_v8 = vpop.f32.mrf.mxu0  ;;  %v8060_v20 = vld [vmem:[#allocation10 + $0x2c0] ss:$16 sps:$4 sm:$0xff]   ;;  %v8026_v54 = vld [vmem:[#allocation10 + $0x424] ss:$16 sps:$4 sm:$0xff]  }
 0x32c   :  { %4282 = vmatpush1.bf16.msra.mxu1 %v7077_v7  ;;  %v3413_v7 = vld [vmem:[#allocation7 + $0x218] sm:$0xff]  ;;  %v8775_v8 = vld [vmem:[#allocation8] sm:$0xff] }
 0x32d   :  { %v7460_v22 = vpop.f32.mrf.mxu0  ;;  %4283 = vmatprep.subr.bf16.mxu1 %v7070_v1  ;;  %v7101_v1 = vcombine.low %v3421_v3, %v3425_v16  ;;  %v7094_v4 = vcombine.high %v3413_v7, %v3417_v0  ;;  %v7093_v6 = vcombine.low %v3413_v7, %v3417_v0  ;;  %v3483_v13 = vrot.slane %v8775_v8, %v8651_v14  ;;  %v8102_v55 = vld [vmem:[#allocation10 + $0x3e0] ss:$16 sps:$4 sm:$0xff]   ;;  %v8029_v3 = vld [vmem:[#allocation10 + $0x404] ss:$16 sps:$4 sm:$0xff]  }
 0x32e   :  { %v3479_v22 = vrot.slane %v8775_v8, %v8645_v11  ;;  %v8108_v16 = vld [vmem:[#allocation10 + $0x3c0] ss:$16 sps:$4 sm:$0xff]   ;;  %v8032_v7 = vld [vmem:[#allocation10 + $0x5e4] ss:$16 sps:$4 sm:$0xff]  }
 0x32f   :  { %v8114_v0 = vld [vmem:[#allocation10 + $0x3a0] ss:$16 sps:$4 sm:$0xff]  }
 0x330   :  { %4284 = vmatpush1.bf16.msra.mxu1 %v7069_v18  ;;  %v8056_v18 = vld [vmem:[#allocation10 + $0x2e4] ss:$16 sps:$4 sm:$0xff]  }
 0x331   :  { %4285 = vmatprep.subr.bf16.mxu1 %v7062_v23  ;;  %v8054_v23 = vld [vmem:[#allocation10 + $0x2e0] ss:$16 sps:$4 sm:$0xff]  }
 0x334   :  { %4286 = vmatpush1.bf16.msra.mxu1 %v7061_v25 }
 0x335   :  { %4287 = vmatprep.subr.bf16.mxu1 %v7054_v26 }
 0x338   :  { %4288 = vmatpush1.bf16.msra.mxu1 %v7053_v28  ;;  %v8068_v28 = vld [vmem:[#allocation10 + $0x2a4] ss:$16 sps:$4 sm:$0xff]  }
 0x339   :  { %4289 = vmatprep.subr.bf16.mxu1 %v7046_v29 }
 0x33c   :  { %4290 = vmatpush1.bf16.msra.mxu1 %v7045_v33 }
 0x33d   :  { %4291 = vmatprep.subr.bf16.mxu1 %v7038_v38  ;;  %v8066_v38 = vld [vmem:[#allocation10 + $0x2a0] ss:$16 sps:$4 sm:$0xff]  }
 0x340   :  { %4292 = vmatpush1.bf16.msra.mxu1 %v7037_v63  ;;  %v8074_v63 = vld [vmem:[#allocation10 + $0x284] ss:$16 sps:$4 sm:$0xff]  }
 0x341   :  { %4293 = vmatprep.subr.bf16.mxu1 %v7030_v41 }
 0x344   :  { %4294 = vmatpush1.bf16.msra.mxu1 %v7029_v57  ;;  %v8080_v57 = vld [vmem:[#allocation10 + $0x264] ss:$16 sps:$4 sm:$0xff]  }
 0x345   :  { %4295 = vmatprep.subr.bf16.mxu1 %v7150_v44  ;;  %v8009_v44 = vld [vmem:[#allocation10 + $0x4c0] ss:$16 sps:$4 sm:$0xff]  }
 0x348   :  { %4296 = vmatpush2.bf16.msra.mxu1 %v7149_v40  ;;  %v8086_v40 = vld [vmem:[#allocation10 + $0x244] ss:$16 sps:$4 sm:$0xff]  }
 0x349   :  { %4297 = vmatprep.subr.bf16.mxu1 %v7142_v47  ;;  %v8012_v47 = vld [vmem:[#allocation10 + $0x4a0] ss:$16 sps:$4 sm:$0xff]  }
 0x34c   :  { %4298 = vmatpush2.bf16.msra.mxu1 %v7141_v17  ;;  %v8092_v17 = vld [vmem:[#allocation10 + $0x224] ss:$16 sps:$4 sm:$0xff]  }
 0x34d   :  { %4299 = vmatprep.subr.bf16.mxu1 %v7134_v49  ;;  %v8015_v49 = vld [vmem:[#allocation10 + $0x480] ss:$16 sps:$4 sm:$0xff]  }
 0x350   :  { %4300 = vmatpush2.bf16.msra.mxu1 %v7133_v21  ;;  %v8098_v21 = vld [vmem:[#allocation10 + $0x204] ss:$16 sps:$4 sm:$0xff]  }
 0x351   :  { %4301 = vmatprep.subr.bf16.mxu1 %v7126_v51  ;;  %v8018_v51 = vld [vmem:[#allocation10 + $0x460] ss:$16 sps:$4 sm:$0xff]  }
 0x354   :  { %4302 = vmatpush2.bf16.msra.mxu1 %v7125_v53  ;;  %v8104_v53 = vld [vmem:[#allocation10 + $0x3e4] ss:$16 sps:$4 sm:$0xff]  }
 0x355   :  { %4303 = vmatprep.subr.bf16.mxu1 %v7118_v5  ;;  %v8021_v5 = vld [vmem:[#allocation10 + $0x440] ss:$16 sps:$4 sm:$0xff]  }
 0x358   :  { %4304 = vmatpush2.bf16.msra.mxu1 %v7117_v56  ;;  %v8110_v56 = vld [vmem:[#allocation10 + $0x3c4] ss:$16 sps:$4 sm:$0xff]  }
 0x359   :  { %4305 = vmatprep.subr.bf16.mxu1 %v7110_v58  ;;  %v8024_v58 = vld [vmem:[#allocation10 + $0x420] ss:$16 sps:$4 sm:$0xff]  }
 0x35c   :  { %4306 = vmatpush2.bf16.msra.mxu1 %v7109_v61  ;;  %v8116_v61 = vld [vmem:[#allocation10 + $0x3a4] ss:$16 sps:$4 sm:$0xff]  }
 0x35d   :  { %4307 = vmatprep.subr.bf16.mxu1 %v7102_v62  ;;  %v8027_v62 = vld [vmem:[#allocation10 + $0x400] ss:$16 sps:$4 sm:$0xff]  }
 0x360   :  { %4308 = vmatpush2.bf16.msra.mxu1 %v7101_v1  ;;  %v8122_v1 = vld [vmem:[#allocation10 + $0x384] ss:$16 sps:$4 sm:$0xff]  }
 0x361   :  { %4309 = vmatprep.subr.bf16.mxu1 %v7094_v4  ;;  %v8030_v4 = vld [vmem:[#allocation10 + $0x5e0] ss:$16 sps:$4 sm:$0xff]  }
 0x364   :  { %4310 = vmatpush2.bf16.msra.mxu1 %v7093_v6  ;;  %v8035_v6 = vld [vmem:[#allocation10 + $0x5c4] ss:$16 sps:$4 sm:$0xff]  }
 0x365   :  { %5935 = vmatprep.subr.bf16.mxu1 %v8056_v18  ;;  %v8120_v18 = vld [vmem:[#allocation10 + $0x380] ss:$16 sps:$4 sm:$0xff]  }
 0x367   :  { %4312 = vmatmul.mubr.bf16.vlgmr.msra.gmra.mxu1 %v8754_v30  ;;  %v4190_v25 = vpop.f32.mrf.mxu0  ;;  %v8006_v30 = vld [vmem:[#allocation10 + $0x4e0] ss:$16 sps:$4 sm:$0xff]  }
 0x368   :  { %v4191_v26 = vadd.f32 %v4190_v25, %v3479_v22  ;;  %5936 = vmatpush1.bf16.msra.mxu1 %v8054_v23  ;;  %v8128_v22 = vld [vmem:[#allocation10 + $0x364] ss:$16 sps:$4 sm:$0xff]   ;;  %v8033_v23 = vld [vmem:[#allocation10 + $0x5c0] ss:$16 sps:$4 sm:$0xff]  }
 0x369   :  { %v4192_v27 = vpop.f32.mrf.mxu0  ;;  %5937 = vmatprep.subr.bf16.mxu1 %v8062_v24  ;;  %v8038_v24 = vld [vmem:[#allocation10 + $0x5a4] ss:$16 sps:$4 sm:$0xff]  }
 0x36a   :  { %v4320_v29 = vmax.f32 %v4191_v26, 0.0  ;;  %v4193_v31 = vadd.f32 %v4192_v27, %v3483_v13  ;;  %v8126_v13 = vld [vmem:[#allocation10 + $0x360] ss:$16 sps:$4 sm:$0xff]   ;;  %v8134_v25 = vld [vmem:[#allocation10 + $0x344] ss:$16 sps:$4 sm:$0xff]  }
 0x36b   :  { %v4194_v32 = vpop.f32.mrf.mxu0  ;;  %v8036_v26 = vld [vmem:[#allocation10 + $0x5a0] ss:$16 sps:$4 sm:$0xff]  }
 0x36c   :  { %v4321_v33 = vmax.f32 %v4193_v31, 0.0  ;;  %5938 = vmatpush1.bf16.msra.mxu1 %v8060_v20  ;;  %v8782_v59 = vpack.c.bf16 %v4320_v29, %v4320_v29  ;;  %v8041_v20 = vld [vmem:[#allocation10 + $0x584] ss:$16 sps:$4 sm:$0xff]   ;;  %v8132_v27 = vld [vmem:[#allocation10 + $0x340] ss:$16 sps:$4 sm:$0xff]  }
 0x36d   :  { %v4195_v60 = vpop.f32.mrf.mxu0  ;;  %5939 = vmatprep.subr.bf16.mxu1 %v8068_v28  ;;  %v8140_v28 = vld [vmem:[#allocation10 + $0x324] ss:$16 sps:$4 sm:$0xff]   ;;  %v8039_v29 = vld [vmem:[#allocation10 + $0x580] ss:$16 sps:$4 sm:$0xff]  }
 0x36e   :  { %v8784_v41 = vpack.c.bf16 %v4321_v33, %v4321_v33  ;;  %v8044_v31 = vld [vmem:[#allocation10 + $0x564] ss:$16 sps:$4 sm:$0xff]   ;;  %v8138_v32 = vld [vmem:[#allocation10 + $0x320] ss:$16 sps:$4 sm:$0xff]  }
 0x36f   :  { %v8146_v33 = vld [vmem:[#allocation10 + $0x304] ss:$16 sps:$4 sm:$0xff]  }
 0x370   :  { %5926 = vmatprep.mubr.bf16.mxu0 %v8784_v41  ;;  %5940 = vmatpush1.bf16.msra.mxu1 %v8066_v38  ;;  %v8042_v38 = vld [vmem:[#allocation10 + $0x560] ss:$16 sps:$4 sm:$0xff]   ;;  %v8047_v60 = vld [vmem:[#allocation10 + $0x544] ss:$16 sps:$4 sm:$0xff]  }
 0x371   :  { %5927 = vmatmul.mubr.bf16.vlgmr.msra.gmra.mxu0 %v8782_v59  ;;  %5941 = vmatprep.subr.bf16.mxu1 %v8074_v63  ;;  %v8144_v63 = vld [vmem:[#allocation10 + $0x300] ss:$16 sps:$4 sm:$0xff]  }
 0x372   :  { %5977 = vmatpush1.bf16.msra.mxu0 %v8006_v30  ;;  %v8152_v30 = vld [vmem:[#allocation10 + $0x6e4] ss:$16 sps:$4 sm:$0xff]  }
 0x373   :  { %5978 = vmatprep.subr.bf16.mxu0 %v8011_v35  ;;  %v8045_v35 = vld [vmem:[#allocation10 + $0x540] ss:$16 sps:$4 sm:$0xff]  }
 0x374   :  { %5942 = vmatpush1.bf16.msra.mxu1 %v8072_v42  ;;  %v8050_v42 = vld [vmem:[#allocation10 + $0x524] ss:$16 sps:$4 sm:$0xff]  }
 0x375   :  { %5943 = vmatprep.subr.bf16.mxu1 %v8080_v57  ;;  %v3495_v57 = vrot.slane %v8775_v8, %v262_v34 }
 0x376   :  { %5979 = vmatpush1.bf16.msra.mxu0 %v8009_v44  ;;  %v8048_v44 = vld [vmem:[#allocation10 + $0x520] ss:$16 sps:$4 sm:$0xff]  }
 0x377   :  { %5980 = vmatprep.subr.bf16.mxu0 %v8014_v45  ;;  %v3499_v45 = vrot.slane %v8775_v8, %v266_v39  ;;  %v8059_v39 = vld [vmem:[#allocation10 + $0xec] ss:$16 sps:$4 sm:$0xff]  }
 0x378   :  { %5944 = vmatpush1.bf16.msra.mxu1 %v8078_v46  ;;  %v6990_v46 = vld [vmem:[%s8875_s7] ss:$0 sm:$0xff] }
 0x379   :  { %5945 = vmatprep.subr.bf16.mxu1 %v8086_v40  ;;  %v3296_v34 = vadd.f32 %v8773_v2, %v6990_v46  ;;  %v8057_v2 = vld [vmem:[#allocation10 + $0xe8] ss:$16 sps:$4 sm:$0xff]  }
 0x37a   :  { %5981 = vmatpush1.bf16.msra.mxu0 %v8012_v47 }
 0x37b   :  { %5982 = vmatprep.subr.bf16.mxu0 %v8017_v37  ;;  %v8053_v37 = vld [vmem:[#allocation10 + $0x504] ss:$16 sps:$4 sm:$0xff]  }
 0x37c   :  { %5946 = vmatpush1.bf16.msra.mxu1 %v8084_v48 }
 0x37d   :  { %5947 = vmatprep.subr.bf16.mxu1 %v8092_v17 }
 0x37e   :  { %5983 = vmatpush1.bf16.msra.mxu0 %v8015_v49 }
 0x37f   :  { %5984 = vmatprep.subr.bf16.mxu0 %v8020_v19 }
 0x380   :  { %5948 = vmatpush1.bf16.msra.mxu1 %v8090_v50 }
 0x381   :  { %5949 = vmatprep.subr.bf16.mxu1 %v8098_v21 }
 0x382   :  { %5985 = vmatpush1.bf16.msra.mxu0 %v8018_v51  ;;  %v8051_v51 = vld [vmem:[#allocation10 + $0x500] ss:$16 sps:$4 sm:$0xff]  }
 0x383   :  { %5986 = vmatprep.subr.bf16.mxu0 %v8023_v10 }
 0x384   :  { %5950 = vmatpush1.bf16.msra.mxu1 %v8096_v52 }
 0x385   :  { %5951 = vmatprep.subr.bf16.mxu1 %v8104_v53 }
 0x386   :  { %5987 = vmatpush1.bf16.msra.mxu0 %v8021_v5 }
 0x387   :  { %5988 = vmatprep.subr.bf16.mxu0 %v8026_v54 }
 0x388   :  { %5952 = vmatpush2.bf16.msra.mxu1 %v8102_v55 }
 0x389   :  { %5953 = vmatprep.subr.bf16.mxu1 %v8110_v56 }
 0x38a   :  { %5989 = vmatpush1.bf16.msra.mxu0 %v8024_v58 }
 0x38b   :  { %5990 = vmatprep.subr.bf16.mxu0 %v8029_v3  ;;  %v8065_v3 = vld [vmem:[#allocation10 + $0xcc] ss:$16 sps:$4 sm:$0xff]  }
 0x38c   :  { %5954 = vmatpush2.bf16.msra.mxu1 %v8108_v16  ;;  %v8063_v16 = vld [vmem:[#allocation10 + $0xc8] ss:$16 sps:$4 sm:$0xff]  }
 0x38d   :  { %5955 = vmatprep.subr.bf16.mxu1 %v8116_v61  ;;  %v8071_v61 = vld [vmem:[#allocation10 + $0xac] ss:$16 sps:$4 sm:$0xff]  }
 0x38e   :  { %5991 = vmatpush1.bf16.msra.mxu0 %v8027_v62  ;;  %v8069_v62 = vld [vmem:[#allocation10 + $0xa8] ss:$16 sps:$4 sm:$0xff]  }
 0x38f   :  { %5992 = vmatprep.subr.bf16.mxu0 %v8032_v7  ;;  %v8077_v7 = vld [vmem:[#allocation10 + $0x8c] ss:$16 sps:$4 sm:$0xff]  }
 0x390   :  { %5956 = vmatpush2.bf16.msra.mxu1 %v8114_v0  ;;  %v8075_v0 = vld [vmem:[#allocation10 + $0x88] ss:$16 sps:$4 sm:$0xff]  }
 0x391   :  { %5957 = vmatprep.subr.bf16.mxu1 %v8122_v1  ;;  %v8083_v1 = vld [vmem:[#allocation10 + $0x6c] ss:$16 sps:$4 sm:$0xff]  }
 0x392   :  { %5993 = vmatpush2.bf16.msra.mxu0 %v8030_v4  ;;  %v8081_v4 = vld [vmem:[#allocation10 + $0x68] ss:$16 sps:$4 sm:$0xff]  }
 0x393   :  { %5994 = vmatprep.subr.bf16.mxu0 %v8035_v6  ;;  %v8089_v6 = vld [vmem:[#allocation10 + $0x4c] ss:$16 sps:$4 sm:$0xff]  }
 0x394   :  { %5958 = vmatpush2.bf16.msra.mxu1 %v8120_v18  ;;  %v8087_v18 = vld [vmem:[#allocation10 + $0x48] ss:$16 sps:$4 sm:$0xff]  }
 0x395   :  { %5959 = vmatprep.subr.bf16.mxu1 %v8128_v22  ;;  %v8095_v22 = vld [vmem:[#allocation10 + $0x2c] ss:$16 sps:$4 sm:$0xff]  }
 0x396   :  { %5995 = vmatpush2.bf16.msra.mxu0 %v8033_v23  ;;  %v8101_v23 = vld [vmem:[#allocation10 + $0xc] ss:$16 sps:$4 sm:$0xff]  }
 0x397   :  { %5996 = vmatprep.subr.bf16.mxu0 %v8038_v24  ;;  %v8099_v24 = vld [vmem:[#allocation10 + $0x8] ss:$16 sps:$4 sm:$0xff]  }
 0x398   :  { %5960 = vmatpush2.bf16.msra.mxu1 %v8126_v13  ;;  %v8107_v13 = vld [vmem:[#allocation10 + $0x1ec] ss:$16 sps:$4 sm:$0xff]  }
 0x399   :  { %5961 = vmatprep.subr.bf16.mxu1 %v8134_v25  ;;  %v8105_v25 = vld [vmem:[#allocation10 + $0x1e8] ss:$16 sps:$4 sm:$0xff]  }
 0x39a   :  { %5997 = vmatpush2.bf16.msra.mxu0 %v8036_v26  ;;  %v8113_v26 = vld [vmem:[#allocation10 + $0x1cc] ss:$16 sps:$4 sm:$0xff]  }
 0x39b   :  { %5998 = vmatprep.subr.bf16.mxu0 %v8041_v20  ;;  %v8111_v20 = vld [vmem:[#allocation10 + $0x1c8] ss:$16 sps:$4 sm:$0xff]  }
 0x39c   :  { %5962 = vmatpush2.bf16.msra.mxu1 %v8132_v27  ;;  %v8119_v27 = vld [vmem:[#allocation10 + $0x1ac] ss:$16 sps:$4 sm:$0xff]  }
 0x39d   :  { %5963 = vmatprep.subr.bf16.mxu1 %v8140_v28  ;;  %v8117_v28 = vld [vmem:[#allocation10 + $0x1a8] ss:$16 sps:$4 sm:$0xff]  }
 0x39e   :  { %5999 = vmatpush2.bf16.msra.mxu0 %v8039_v29  ;;  %v8125_v29 = vld [vmem:[#allocation10 + $0x18c] ss:$16 sps:$4 sm:$0xff]  }
 0x39f   :  { %6000 = vmatprep.subr.bf16.mxu0 %v8044_v31  ;;  %v8123_v31 = vld [vmem:[#allocation10 + $0x188] ss:$16 sps:$4 sm:$0xff]  }
 0x3a0   :  { %5964 = vmatpush2.bf16.msra.mxu1 %v8138_v32  ;;  %v8131_v32 = vld [vmem:[#allocation10 + $0x16c] ss:$16 sps:$4 sm:$0xff]  }
 0x3a1   :  { %5965 = vmatprep.subr.bf16.mxu1 %v8146_v33  ;;  %v8129_v33 = vld [vmem:[#allocation10 + $0x168] ss:$16 sps:$4 sm:$0xff]  }
 0x3a2   :  { %6001 = vmatpush2.bf16.msra.mxu0 %v8042_v38  ;;  %v8137_v38 = vld [vmem:[#allocation10 + $0x14c] ss:$16 sps:$4 sm:$0xff]  }
 0x3a3   :  { %6002 = vmatprep.subr.bf16.mxu0 %v8047_v60  ;;  %v8135_v60 = vld [vmem:[#allocation10 + $0x148] ss:$16 sps:$4 sm:$0xff]  }
 0x3a4   :  { %5966 = vmatpush2.bf16.msra.mxu1 %v8144_v63  ;;  %v8143_v63 = vld [vmem:[#allocation10 + $0x12c] ss:$16 sps:$4 sm:$0xff]  }
 0x3a5   :  { %6017 = vmatprep.subr.bf16.mxu1 %v8152_v30  ;;  %v3487_v30 = vrot.slane %v8775_v8, %v8648_v12 }
 0x3a6   :  { %6003 = vmatpush2.bf16.msra.mxu0 %v8045_v35  ;;  %v3491_v35 = vrot.slane %v8775_v8, %v8654_v15 }
 0x3a7   :  { %v7478_v40 = vpop.f32.mrf.mxu1  ;;  %v4272_v47 = vpop.f32.mrf.mxu0  ;;  %6004 = vmatprep.subr.bf16.mxu0 %v8050_v42  ;;  %v8141_v42 = vld [vmem:[#allocation10 + $0x128] ss:$16 sps:$4 sm:$0xff]  }
 0x3a8   :  { %v4273_v48 = vadd.f32 %v4272_v47, %v3495_v57  ;;  %v8147_v47 = vld [vmem:[#allocation10 + $0x108] ss:$16 sps:$4 sm:$0xff]  }
 0x3a9   :  { %v7479_v17 = vpop.f32.mrf.mxu1  ;;  %v4274_v49 = vpop.f32.mrf.mxu0 }
 0x3aa   :  { %v4324_v19 = vmax.f32 %v4273_v48, 0.0  ;;  %v7480_v50 = vadd.f32 %v7479_v17, %v7478_v40  ;;  %v4275_v21 = vadd.f32 %v4274_v49, %v3499_v45  ;;  %6005 = vmatpush2.bf16.msra.mxu0 %v8048_v44  ;;  %v8149_v44 = vld [vmem:[#allocation10 + $0x10c] ss:$16 sps:$4 sm:$0xff]  }
 0x3ab   :  { %v7481_v10 = vpop.f32.mrf.mxu1  ;;  %6006 = vmatprep.subr.bf16.mxu0 %v8053_v37  ;;  %v4276_v52 = vpop.f32.mrf.mxu0  ;;  %v8155_v17 = vld [vmem:[#allocation10 + $0x4ec] ss:$16 sps:$4 sm:$0xff]  }
 0x3ac   :  { %v3336_v53 = vadd.f32 %v7480_v50, %v3296_v34  ;;  %v4325_v5 = vmax.f32 %v4275_v21, 0.0  ;;  %v8798_v54 = vpack.c.bf16 %v4324_v19, %v4324_v19  ;;  %v8150_v50 = vld [vmem:[#allocation10 + $0x6e0] ss:$16 sps:$4 sm:$0xff]   ;;  %v8153_v21 = vld [vmem:[#allocation10 + $0x4e8] ss:$16 sps:$4 sm:$0xff]  }
 0x3ad   :  { %v7482_v55 = vpop.f32.mrf.mxu1  ;;  %v4277_v56 = vpop.f32.mrf.mxu0  ;;  %v8158_v10 = vld [vmem:[#allocation10 + $0x6c4] ss:$16 sps:$4 sm:$0xff]   ;;  %v8156_v52 = vld [vmem:[#allocation10 + $0x6c0] ss:$16 sps:$4 sm:$0xff]  }
 0x3ae   :  { %3341 = vst [vmem:[#allocation13] sm:$0xff] %v3336_v53  ;;  %v8800_v58 = vpack.c.bf16 %v4325_v5, %v4325_v5  ;;  %6007 = vmatpush2.bf16.msra.mxu0 %v8051_v51  ;;  %v8159_v53 = vld [vmem:[#allocation10 + $0x4c8] ss:$16 sps:$4 sm:$0xff]   ;;  %v8164_v5 = vld [vmem:[#allocation10 + $0x6a4] ss:$16 sps:$4 sm:$0xff]  }
 0x3af   :  { %6058 = vmatprep.subr.bf16.mxu0 %v8059_v39  ;;  %v8161_v39 = vld [vmem:[#allocation10 + $0x4cc] ss:$16 sps:$4 sm:$0xff]   ;;  %v8162_v56 = vld [vmem:[#allocation10 + $0x6a0] ss:$16 sps:$4 sm:$0xff]  }
 0x3b0   :  { %6008 = vmatprep.mubr.bf16.mxu0 %v8800_v58  ;;  %v8167_v55 = vld [vmem:[#allocation10 + $0x4ac] ss:$16 sps:$4 sm:$0xff]  }
 0x3b1   :  { %6009 = vmatmul.mubr.bf16.vlgmr.msra.gmra.mxu0 %v8798_v54 }
 0x3b2   :  { %6059 = vmatpush1.bf16.msra.mxu0 %v8057_v2  ;;  %6090 = vmatprep.mubr.bf16.mxu0 %v8784_v41  ;;  %v8093_v41 = vld [vmem:[#allocation10 + $0x28] ss:$16 sps:$4 sm:$0xff]  }
 0x3b3   :  { %6060 = vmatprep.subr.bf16.mxu0 %v8065_v3  ;;  %v8165_v2 = vld [vmem:[#allocation10 + $0x4a8] ss:$16 sps:$4 sm:$0xff]   ;;  %v8170_v3 = vld [vmem:[#allocation10 + $0x684] ss:$16 sps:$4 sm:$0xff]  }
 0x3b6   :  { %6061 = vmatpush1.bf16.msra.mxu0 %v8063_v16  ;;  %v8173_v16 = vld [vmem:[#allocation10 + $0x48c] ss:$16 sps:$4 sm:$0xff]  }
 0x3b7   :  { %6062 = vmatprep.subr.bf16.mxu0 %v8071_v61  ;;  %v8171_v61 = vld [vmem:[#allocation10 + $0x488] ss:$16 sps:$4 sm:$0xff]  }
 0x3ba   :  { %6063 = vmatpush1.bf16.msra.mxu0 %v8069_v62  ;;  %v8176_v62 = vld [vmem:[#allocation10 + $0x664] ss:$16 sps:$4 sm:$0xff]  }
 0x3bb   :  { %6064 = vmatprep.subr.bf16.mxu0 %v8077_v7  ;;  %v8179_v7 = vld [vmem:[#allocation10 + $0x46c] ss:$16 sps:$4 sm:$0xff]  }
 0x3be   :  { %6065 = vmatpush1.bf16.msra.mxu0 %v8075_v0  ;;  %v8174_v0 = vld [vmem:[#allocation10 + $0x660] ss:$16 sps:$4 sm:$0xff]  }
 0x3bf   :  { %6066 = vmatprep.subr.bf16.mxu0 %v8083_v1  ;;  %v8182_v1 = vld [vmem:[#allocation10 + $0x644] ss:$16 sps:$4 sm:$0xff]  }
 0x3c2   :  { %6067 = vmatpush1.bf16.msra.mxu0 %v8081_v4  ;;  %v8185_v4 = vld [vmem:[#allocation10 + $0x44c] ss:$16 sps:$4 sm:$0xff]  }
 0x3c3   :  { %6068 = vmatprep.subr.bf16.mxu0 %v8089_v6  ;;  %v8180_v6 = vld [vmem:[#allocation10 + $0x640] ss:$16 sps:$4 sm:$0xff]  }
 0x3c6   :  { %6069 = vmatpush1.bf16.msra.mxu0 %v8087_v18  ;;  %v8183_v18 = vld [vmem:[#allocation10 + $0x448] ss:$16 sps:$4 sm:$0xff]  }
 0x3c7   :  { %6070 = vmatprep.subr.bf16.mxu0 %v8095_v22  ;;  %v8188_v22 = vld [vmem:[#allocation10 + $0x624] ss:$16 sps:$4 sm:$0xff]  }
 0x3ca   :  { %6071 = vmatpush1.bf16.msra.mxu0 %v8093_v41  ;;  %v8191_v41 = vld [vmem:[#allocation10 + $0x42c] ss:$16 sps:$4 sm:$0xff]  }
 0x3cb   :  { %6072 = vmatprep.subr.bf16.mxu0 %v8101_v23  ;;  %v8186_v23 = vld [vmem:[#allocation10 + $0x620] ss:$16 sps:$4 sm:$0xff]  }
 0x3ce   :  { %6073 = vmatpush1.bf16.msra.mxu0 %v8099_v24  ;;  %v8189_v24 = vld [vmem:[#allocation10 + $0x428] ss:$16 sps:$4 sm:$0xff]  }
 0x3cf   :  { %6074 = vmatprep.subr.bf16.mxu0 %v8107_v13  ;;  %v8194_v13 = vld [vmem:[#allocation10 + $0x604] ss:$16 sps:$4 sm:$0xff]  }
 0x3d2   :  { %6075 = vmatpush2.bf16.msra.mxu0 %v8105_v25  ;;  %v8197_v25 = vld [vmem:[#allocation10 + $0x40c] ss:$16 sps:$4 sm:$0xff]  }
 0x3d3   :  { %6076 = vmatprep.subr.bf16.mxu0 %v8113_v26  ;;  %v8192_v26 = vld [vmem:[#allocation10 + $0x600] ss:$16 sps:$4 sm:$0xff]  }
 0x3d6   :  { %6077 = vmatpush2.bf16.msra.mxu0 %v8111_v20  ;;  %v8195_v20 = vld [vmem:[#allocation10 + $0x408] ss:$16 sps:$4 sm:$0xff]  }
 0x3d7   :  { %6078 = vmatprep.subr.bf16.mxu0 %v8119_v27  ;;  %v8200_v27 = vld [vmem:[#allocation10 + $0x7e4] ss:$16 sps:$4 sm:$0xff]  }
 0x3da   :  { %6079 = vmatpush2.bf16.msra.mxu0 %v8117_v28  ;;  %v8203_v28 = vld [vmem:[#allocation10 + $0x5ec] ss:$16 sps:$4 sm:$0xff]  }
 0x3db   :  { %6080 = vmatprep.subr.bf16.mxu0 %v8125_v29  ;;  %v8198_v29 = vld [vmem:[#allocation10 + $0x7e0] ss:$16 sps:$4 sm:$0xff]  }
 0x3de   :  { %6081 = vmatpush2.bf16.msra.mxu0 %v8123_v31  ;;  %v8201_v31 = vld [vmem:[#allocation10 + $0x5e8] ss:$16 sps:$4 sm:$0xff]  }
 0x3df   :  { %6082 = vmatprep.subr.bf16.mxu0 %v8131_v32  ;;  %v8206_v32 = vld [vmem:[#allocation10 + $0x7c4] ss:$16 sps:$4 sm:$0xff]  }
 0x3e2   :  { %6083 = vmatpush2.bf16.msra.mxu0 %v8129_v33  ;;  %v8209_v33 = vld [vmem:[#allocation10 + $0x5cc] ss:$16 sps:$4 sm:$0xff]  }
 0x3e3   :  { %6084 = vmatprep.subr.bf16.mxu0 %v8137_v38  ;;  %v8204_v38 = vld [vmem:[#allocation10 + $0x7c0] ss:$16 sps:$4 sm:$0xff]  }
 0x3e6   :  { %6085 = vmatpush2.bf16.msra.mxu0 %v8135_v60  ;;  %v8207_v60 = vld [vmem:[#allocation10 + $0x5c8] ss:$16 sps:$4 sm:$0xff]  }
 0x3e7   :  { %v4231_v57 = vpop.f32.mrf.mxu1  ;;  %6086 = vmatprep.subr.bf16.mxu0 %v8143_v63  ;;  %v8212_v63 = vld [vmem:[#allocation10 + $0x7a4] ss:$16 sps:$4 sm:$0xff]  }
 0x3e8   :  { %v4232_v45 = vadd.f32 %v4231_v57, %v3487_v30  ;;  %v8215_v30 = vld [vmem:[#allocation10 + $0x5ac] ss:$16 sps:$4 sm:$0xff]   ;;  %v8218_v57 = vld [vmem:[#allocation10 + $0x784] ss:$16 sps:$4 sm:$0xff]  }
 0x3e9   :  { %v4233_v46 = vpop.f32.mrf.mxu1 }
 0x3ea   :  { %v4234_v40 = vadd.f32 %v4233_v46, %v3491_v35  ;;  %6087 = vmatpush2.bf16.msra.mxu0 %v8141_v42  ;;  %v4322_v37 = vmax.f32 %v4232_v45, 0.0  ;;  %v8210_v35 = vld [vmem:[#allocation10 + $0x7a0] ss:$16 sps:$4 sm:$0xff]   ;;  %v8213_v42 = vld [vmem:[#allocation10 + $0x5a8] ss:$16 sps:$4 sm:$0xff]  }
 0x3eb   :  { %v4235_v48 = vpop.f32.mrf.mxu1  ;;  %6088 = vmatprep.subr.bf16.mxu0 %v8149_v44  ;;  %v8221_v44 = vld [vmem:[#allocation10 + $0x58c] ss:$16 sps:$4 sm:$0xff]   ;;  %v8216_v45 = vld [vmem:[#allocation10 + $0x780] ss:$16 sps:$4 sm:$0xff]   ;;  %v8219_v46 = vld [vmem:[#allocation10 + $0x588] ss:$16 sps:$4 sm:$0xff]  }
 0x3ec   :  { %v4323_v49 = vmax.f32 %v4234_v40, 0.0  ;;  %v8811_v51 = vpack.c.bf16 %v4322_v37, %v4322_v37  ;;  %v8224_v40 = vld [vmem:[#allocation10 + $0x764] ss:$16 sps:$4 sm:$0xff]   ;;  %v8222_v37 = vld [vmem:[#allocation10 + $0x760] ss:$16 sps:$4 sm:$0xff]  }
 0x3ed   :  { %v4236_v34 = vpop.f32.mrf.mxu1  ;;  %v8225_v48 = vld [vmem:[#allocation10 + $0x568] ss:$16 sps:$4 sm:$0xff]  }
 0x3ee   :  { %v8809_v19 = vpack.c.bf16 %v4323_v49, %v4323_v49  ;;  %6089 = vmatpush2.bf16.msra.mxu0 %v8147_v47  ;;  %v8227_v47 = vld [vmem:[#allocation10 + $0x56c] ss:$16 sps:$4 sm:$0xff]   ;;  %v8228_v34 = vld [vmem:[#allocation10 + $0x740] ss:$16 sps:$4 sm:$0xff]  }
 0x3ef   :  { %6140 = vmatprep.subr.bf16.mxu0 %v8155_v17  ;;  %v8230_v17 = vld [vmem:[#allocation10 + $0x744] ss:$16 sps:$4 sm:$0xff]   ;;  %v8233_v49 = vld [vmem:[#allocation10 + $0x54c] ss:$16 sps:$4 sm:$0xff]  }
 0x3f0   :  { %5967 = vmatprep.mubr.bf16.mxu1 %v8809_v19 }
 0x3f1   :  { %5968 = vmatmul.mubr.bf16.vlgmr.msra.gmra.mxu1 %v8811_v51  ;;  %6091 = vmatmul.mubr.bf16.vlgmr.msra.gmra.mxu0 %v8782_v59  ;;  %v8168_v59 = vld [vmem:[#allocation10 + $0x680] ss:$16 sps:$4 sm:$0xff]  }
 0x3f2   :  { %6018 = vmatpush1.bf16.msra.mxu1 %v8150_v50  ;;  %6141 = vmatpush1.bf16.msra.mxu0 %v8153_v21  ;;  %v8231_v50 = vld [vmem:[#allocation10 + $0x548] ss:$16 sps:$4 sm:$0xff]   ;;  %v8236_v21 = vld [vmem:[#allocation10 + $0x724] ss:$16 sps:$4 sm:$0xff]  }
 0x3f3   :  { %6019 = vmatprep.subr.bf16.mxu1 %v8158_v10  ;;  %6142 = vmatprep.subr.bf16.mxu0 %v8161_v39  ;;  %v8239_v10 = vld [vmem:[#allocation10 + $0x52c] ss:$16 sps:$4 sm:$0xff]   ;;  %v3503_v39 = vrot.slane %v8775_v8, %v270_v36  ;;  %v8243_v36 = vld [vmem:[#allocation10 + $0x508] ss:$16 sps:$4 sm:$0xff]  }
 0x3f4   :  { %6172 = vmatprep.mubr.bf16.mxu0 %v8800_v58  ;;  %v8177_v58 = vld [vmem:[#allocation10 + $0x468] ss:$16 sps:$4 sm:$0xff]  }
 0x3f6   :  { %6020 = vmatpush1.bf16.msra.mxu1 %v8156_v52  ;;  %6143 = vmatpush1.bf16.msra.mxu0 %v8159_v53  ;;  %v8234_v52 = vld [vmem:[#allocation10 + $0x720] ss:$16 sps:$4 sm:$0xff]   ;;  %v3507_v53 = vrot.slane %v8775_v8, %v274_v43 }
 0x3f7   :  { %6021 = vmatprep.subr.bf16.mxu1 %v8164_v5  ;;  %6144 = vmatprep.subr.bf16.mxu0 %v8167_v55  ;;  %v8237_v5 = vld [vmem:[#allocation10 + $0x528] ss:$16 sps:$4 sm:$0xff]  }
 0x3fa   :  { %6022 = vmatpush1.bf16.msra.mxu1 %v8162_v56  ;;  %6145 = vmatpush1.bf16.msra.mxu0 %v8165_v2  ;;  %v8242_v56 = vld [vmem:[#allocation10 + $0x704] ss:$16 sps:$4 sm:$0xff]   ;;  %v8245_v2 = vld [vmem:[#allocation10 + $0x50c] ss:$16 sps:$4 sm:$0xff]  }
 0x3fb   :  { %6023 = vmatprep.subr.bf16.mxu1 %v8170_v3  ;;  %6146 = vmatprep.subr.bf16.mxu0 %v8173_v16 }
 0x3fe   :  { %6024 = vmatpush1.bf16.msra.mxu1 %v8168_v59  ;;  %6147 = vmatpush1.bf16.msra.mxu0 %v8171_v61  ;;  %v8240_v61 = vld [vmem:[#allocation10 + $0x700] ss:$16 sps:$4 sm:$0xff]  }
 0x3ff   :  { %6025 = vmatprep.subr.bf16.mxu1 %v8176_v62  ;;  %6148 = vmatprep.subr.bf16.mxu0 %v8179_v7 }
 0x402   :  { %6026 = vmatpush1.bf16.msra.mxu1 %v8174_v0  ;;  %6149 = vmatpush1.bf16.msra.mxu0 %v8177_v58  ;;  %v8246_v58 = vld [vmem:[#allocation10 + $0x2e8] ss:$16 sps:$4 sm:$0xff]  }
 0x403   :  { %6027 = vmatprep.subr.bf16.mxu1 %v8182_v1  ;;  %6150 = vmatprep.subr.bf16.mxu0 %v8185_v4  ;;  %v8251_v4 = vld [vmem:[#allocation10 + $0x2cc] ss:$16 sps:$4 sm:$0xff]  }
 0x406   :  { %6028 = vmatpush1.bf16.msra.mxu1 %v8180_v6  ;;  %6151 = vmatpush1.bf16.msra.mxu0 %v8183_v18  ;;  %v8249_v18 = vld [vmem:[#allocation10 + $0x2c8] ss:$16 sps:$4 sm:$0xff]  }
 0x407   :  { %6029 = vmatprep.subr.bf16.mxu1 %v8188_v22  ;;  %6152 = vmatprep.subr.bf16.mxu0 %v8191_v41  ;;  %v8254_v22 = vld [vmem:[#allocation10 + $0x2ac] ss:$16 sps:$4 sm:$0xff]  }
 0x40a   :  { %6030 = vmatpush1.bf16.msra.mxu1 %v8186_v23  ;;  %6153 = vmatpush1.bf16.msra.mxu0 %v8189_v24  ;;  %v8252_v24 = vld [vmem:[#allocation10 + $0x2a8] ss:$16 sps:$4 sm:$0xff]  }
 0x40b   :  { %6031 = vmatprep.subr.bf16.mxu1 %v8194_v13  ;;  %6154 = vmatprep.subr.bf16.mxu0 %v8197_v25  ;;  %v8257_v13 = vld [vmem:[#allocation10 + $0x28c] ss:$16 sps:$4 sm:$0xff]  }
 0x40e   :  { %6032 = vmatpush1.bf16.msra.mxu1 %v8192_v26  ;;  %6155 = vmatpush1.bf16.msra.mxu0 %v8195_v20  ;;  %v8342_v26 = vld [vmem:[#allocation11 + $0x78] sm:$0xff]  }
 0x40f   :  { %6033 = vmatprep.subr.bf16.mxu1 %v8200_v27  ;;  %6156 = vmatprep.subr.bf16.mxu0 %v8203_v28  ;;  %v8343_v20 = vld [vmem:[#allocation11 + $0x38] sm:$0xff]   ;;  %v8344_v27 = vld [vmem:[#allocation11 + $0x70] sm:$0xff]  }
 0x410   :  { %v8345_v28 = vld [vmem:[#allocation11 + $0x30] sm:$0xff]  }
 0x412   :  { %6034 = vmatpush2.bf16.msra.mxu1 %v8198_v29  ;;  %6157 = vmatpush2.bf16.msra.mxu0 %v8201_v31  ;;  %v8346_v29 = vld [vmem:[#allocation11 + $0x68] sm:$0xff]  }
 0x413   :  { %6035 = vmatprep.subr.bf16.mxu1 %v8206_v32  ;;  %6158 = vmatprep.subr.bf16.mxu0 %v8209_v33  ;;  %v8258_v31 = vld [vmem:[#allocation10 + $0x268] ss:$16 sps:$4 sm:$0xff]   ;;  %v8263_v33 = vld [vmem:[#allocation10 + $0x24c] ss:$16 sps:$4 sm:$0xff]  }
 0x414   :  { %v8347_v32 = vld [vmem:[#allocation11 + $0x28] sm:$0xff]  }
 0x416   :  { %6036 = vmatpush2.bf16.msra.mxu1 %v8204_v38  ;;  %6159 = vmatpush2.bf16.msra.mxu0 %v8207_v60  ;;  %v8348_v38 = vld [vmem:[#allocation11 + $0x60] sm:$0xff]   ;;  %v8261_v60 = vld [vmem:[#allocation10 + $0x248] ss:$16 sps:$4 sm:$0xff]  }
 0x417   :  { %6037 = vmatprep.subr.bf16.mxu1 %v8212_v63  ;;  %6160 = vmatprep.subr.bf16.mxu0 %v8215_v30  ;;  %v8349_v63 = vld [vmem:[#allocation11 + $0x20] sm:$0xff]   ;;  %v8266_v30 = vld [vmem:[#allocation10 + $0x22c] ss:$16 sps:$4 sm:$0xff]  }
 0x41a   :  { %6038 = vmatpush2.bf16.msra.mxu1 %v8210_v35  ;;  %6161 = vmatpush2.bf16.msra.mxu0 %v8213_v42  ;;  %v8350_v35 = vld [vmem:[#allocation11 + $0x58] sm:$0xff]  }
 0x41b   :  { %6039 = vmatprep.subr.bf16.mxu1 %v8218_v57  ;;  %6162 = vmatprep.subr.bf16.mxu0 %v8221_v44  ;;  %v8264_v42 = vld [vmem:[#allocation10 + $0x228] ss:$16 sps:$4 sm:$0xff]   ;;  %v8269_v44 = vld [vmem:[#allocation10 + $0x20c] ss:$16 sps:$4 sm:$0xff]  }
 0x41c   :  { %v8351_v57 = vld [vmem:[#allocation11 + $0x18] sm:$0xff]  }
 0x41e   :  { %6040 = vmatpush2.bf16.msra.mxu1 %v8216_v45  ;;  %6163 = vmatpush2.bf16.msra.mxu0 %v8219_v46  ;;  %v8352_v45 = vld [vmem:[#allocation11 + $0x50] sm:$0xff]   ;;  %v8267_v46 = vld [vmem:[#allocation10 + $0x208] ss:$16 sps:$4 sm:$0xff]  }
 0x41f   :  { %6041 = vmatprep.subr.bf16.mxu1 %v8224_v40  ;;  %6164 = vmatprep.subr.bf16.mxu0 %v8227_v47  ;;  %v8353_v40 = vld [vmem:[#allocation11 + $0x10] sm:$0xff]   ;;  %v8272_v47 = vld [vmem:[#allocation10 + $0x3ec] ss:$16 sps:$4 sm:$0xff]  }
 0x422   :  { %6042 = vmatpush2.bf16.msra.mxu1 %v8222_v37  ;;  %6165 = vmatpush2.bf16.msra.mxu0 %v8225_v48  ;;  %v8270_v37 = vld [vmem:[#allocation10 + $0x3e8] ss:$16 sps:$4 sm:$0xff]   ;;  %v8275_v48 = vld [vmem:[#allocation10 + $0x3cc] ss:$16 sps:$4 sm:$0xff]  }
 0x423   :  { %6043 = vmatprep.subr.bf16.mxu1 %v8230_v17  ;;  %6166 = vmatprep.subr.bf16.mxu0 %v8233_v49  ;;  %v8273_v17 = vld [vmem:[#allocation10 + $0x3c8] ss:$16 sps:$4 sm:$0xff]   ;;  %v8278_v49 = vld [vmem:[#allocation10 + $0x3ac] ss:$16 sps:$4 sm:$0xff]  }
 0x426   :  { %6044 = vmatpush2.bf16.msra.mxu1 %v8228_v34  ;;  %6167 = vmatpush2.bf16.msra.mxu0 %v8231_v50  ;;  %v8276_v34 = vld [vmem:[#allocation10 + $0x3a8] ss:$16 sps:$4 sm:$0xff]   ;;  %v8281_v50 = vld [vmem:[#allocation10 + $0x38c] ss:$16 sps:$4 sm:$0xff]  }
 0x427   :  { %v4313_v55 = vpop.f32.mrf.mxu1  ;;  %6045 = vmatprep.subr.bf16.mxu1 %v8236_v21  ;;  %6168 = vmatprep.subr.bf16.mxu0 %v8239_v10  ;;  %v8279_v21 = vld [vmem:[#allocation10 + $0x388] ss:$16 sps:$4 sm:$0xff]   ;;  %v8284_v10 = vld [vmem:[#allocation10 + $0x36c] ss:$16 sps:$4 sm:$0xff]  }
 0x428   :  { %v4314_v3 = vadd.f32 %v4313_v55, %v3503_v39  ;;  %v8282_v39 = vld [vmem:[#allocation10 + $0x368] ss:$16 sps:$4 sm:$0xff]  }
 0x429   :  { %v4315_v16 = vpop.f32.mrf.mxu1  ;;  %v8288_v55 = vld [vmem:[#allocation10 + $0x328] ss:$16 sps:$4 sm:$0xff]  }
 0x42a   :  { %v4316_v59 = vadd.f32 %v4315_v16, %v3507_v53  ;;  %6046 = vmatpush2.bf16.msra.mxu1 %v8234_v52  ;;  %6169 = vmatpush2.bf16.msra.mxu0 %v8237_v5  ;;  %v4326_v62 = vmax.f32 %v4314_v3, 0.0  ;;  %v8287_v52 = vld [vmem:[#allocation10 + $0x34c] ss:$16 sps:$4 sm:$0xff]   ;;  %v8285_v53 = vld [vmem:[#allocation10 + $0x348] ss:$16 sps:$4 sm:$0xff]  }
 0x42b   :  { %v4317_v7 = vpop.f32.mrf.mxu1  ;;  %6047 = vmatprep.subr.bf16.mxu1 %v8242_v56  ;;  %6170 = vmatprep.subr.bf16.mxu0 %v8245_v2  ;;  %v8290_v5 = vld [vmem:[#allocation10 + $0x32c] ss:$16 sps:$4 sm:$0xff]   ;;  %v8291_v2 = vld [vmem:[#allocation10 + $0x308] ss:$16 sps:$4 sm:$0xff]  }
 0x42c   :  { %v4327_v0 = vmax.f32 %v4316_v59, 0.0  ;;  %v8825_v1 = vpack.c.bf16 %v4326_v62, %v4326_v62  ;;  %v8293_v56 = vld [vmem:[#allocation10 + $0x30c] ss:$16 sps:$4 sm:$0xff]   ;;  %v8294_v16 = vld [vmem:[#allocation10 + $0x6e8] ss:$16 sps:$4 sm:$0xff]  }
 0x42d   :  { %v4318_v43 = vpop.f32.mrf.mxu1  ;;  %v8296_v3 = vld [vmem:[#allocation10 + $0x6ec] ss:$16 sps:$4 sm:$0xff]  }
 0x42e   :  { %v8823_v8 = vpack.c.bf16 %v4327_v0, %v4327_v0  ;;  %6048 = vmatpush2.bf16.msra.mxu1 %v8240_v61  ;;  %6171 = vmatpush2.bf16.msra.mxu0 %v8243_v36  ;;  %v8299_v59 = vld [vmem:[#allocation10 + $0x6cc] ss:$16 sps:$4 sm:$0xff]   ;;  %v8297_v36 = vld [vmem:[#allocation10 + $0x6c8] ss:$16 sps:$4 sm:$0xff]  }
 0x42f   :  { %6099 = vmatprep.subr.bf16.mxu1 %v8248_v9  ;;  %7484 = vmatprep.subr.bf16.mxu0 %v8342_v26  ;;  %v8354_v62 = vld [vmem:[#allocation11 + $0x48] sm:$0xff]  }
 0x430   :  { %6049 = vmatprep.mubr.bf16.mxu1 %v8823_v8  ;;  %v8302_v7 = vld [vmem:[#allocation10 + $0x6ac] ss:$16 sps:$4 sm:$0xff]  }
 0x431   :  { %6050 = vmatmul.mubr.bf16.vlgmr.msra.gmra.mxu1 %v8825_v1  ;;  %6173 = vmatmul.mubr.bf16.vlgmr.msra.gmra.mxu0 %v8798_v54  ;;  %v8830_v6 = vpop.f32.mrf.mxu0  ;;  %v8255_v54 = vld [vmem:[#allocation10 + $0x288] ss:$16 sps:$4 sm:$0xff]   ;;  %v8314_v26 = vld [vmem:[#allocation10 + $0x62c] ss:$16 sps:$4 sm:$0xff]  }
 0x432   :  { %6100 = vmatpush1.bf16.msra.mxu1 %v8246_v58  ;;  %6131 = vmatprep.mubr.bf16.mxu1 %v8809_v19  ;;  %v8260_v19 = vld [vmem:[#allocation10 + $0x26c] ss:$16 sps:$4 sm:$0xff]   ;;  %v8300_v58 = vld [vmem:[#allocation10 + $0x6a8] ss:$16 sps:$4 sm:$0xff]  }
 0x433   :  { %6101 = vmatprep.subr.bf16.mxu1 %v8251_v4  ;;  %v8833_v41 = vpop.f32.mrf.mxu0  ;;  %7485 = vmatpush3.bf16.msra.mxu0 %v8343_v20  ;;  %v8355_v0 = vld [vmem:[#allocation11 + $0x8] sm:$0xff]   ;;  %v8356_v4 = vld [vmem:[#allocation11 + $0x40] sm:$0xff]  }
 0x434   :  { %7486 = vmatprep.subr.bf16.mxu0 %v8344_v27  ;;  %v8312_v20 = vld [vmem:[#allocation10 + $0x628] ss:$16 sps:$4 sm:$0xff]   ;;  %v8317_v27 = vld [vmem:[#allocation10 + $0x60c] ss:$16 sps:$4 sm:$0xff]  }
 0x435   :  { %v5932_v23 = vpop.f32.mrf.mxu0 }
 0x436   :  { %6102 = vmatpush1.bf16.msra.mxu1 %v8249_v18  ;;  %v8308_v23 = vld [vmem:[#allocation10 + $0x66c] ss:$16 sps:$4 sm:$0xff]  }
 0x437   :  { %6103 = vmatprep.subr.bf16.mxu1 %v8254_v22  ;;  %v5933_v25 = vpop.f32.mrf.mxu0  ;;  %7487 = vmatpush3.bf16.msra.mxu0 %v8345_v28  ;;  %v8357_v22 = vld [vmem:[#allocation11] sm:$0xff]   ;;  %v8320_v28 = vld [vmem:[#allocation10 + $0x7ec] ss:$16 sps:$4 sm:$0xff]  }
 0x438   :  { %7488 = vmatprep.subr.bf16.mxu0 %v8346_v29  ;;  %v8309_v25 = vld [vmem:[#allocation10 + $0x648] ss:$16 sps:$4 sm:$0xff]   ;;  %v8323_v29 = vld [vmem:[#allocation10 + $0x7cc] ss:$16 sps:$4 sm:$0xff]  }
 0x43a   :  { %6104 = vmatpush1.bf16.msra.mxu1 %v8252_v24  ;;  %v8306_v24 = vld [vmem:[#allocation10 + $0x668] ss:$16 sps:$4 sm:$0xff]  }
 0x43b   :  { %6105 = vmatprep.subr.bf16.mxu1 %v8257_v13  ;;  %7489 = vmatpush3.bf16.msra.mxu0 %v8347_v32  ;;  %v8311_v13 = vld [vmem:[#allocation10 + $0x64c] ss:$16 sps:$4 sm:$0xff]  }
 0x43c   :  { %7490 = vmatprep.subr.bf16.mxu0 %v8348_v38  ;;  %v8326_v32 = vld [vmem:[#allocation10 + $0x7ac] ss:$16 sps:$4 sm:$0xff]  }
 0x43d   :  { %v8329_v38 = vld [vmem:[#allocation10 + $0x78c] ss:$16 sps:$4 sm:$0xff]  }
 0x43e   :  { %6106 = vmatpush1.bf16.msra.mxu1 %v8255_v54  ;;  %v8315_v54 = vld [vmem:[#allocation10 + $0x608] ss:$16 sps:$4 sm:$0xff]  }
 0x43f   :  { %6107 = vmatprep.subr.bf16.mxu1 %v8260_v19  ;;  %7491 = vmatpush3.bf16.msra.mxu0 %v8349_v63  ;;  %v8318_v19 = vld [vmem:[#allocation10 + $0x7e8] ss:$16 sps:$4 sm:$0xff]   ;;  %v8332_v63 = vld [vmem:[#allocation10 + $0x76c] ss:$16 sps:$4 sm:$0xff]  }
 0x440   :  { %7492 = vmatprep.subr.bf16.mxu0 %v8350_v35  ;;  %v8335_v35 = vld [vmem:[#allocation10 + $0x74c] ss:$16 sps:$4 sm:$0xff]  }
 0x442   :  { %6108 = vmatpush1.bf16.msra.mxu1 %v8258_v31  ;;  %v8321_v31 = vld [vmem:[#allocation10 + $0x7c8] ss:$16 sps:$4 sm:$0xff]  }
 0x443   :  { %6109 = vmatprep.subr.bf16.mxu1 %v8263_v33  ;;  %7493 = vmatpush3.bf16.msra.mxu0 %v8351_v57  ;;  %v8324_v33 = vld [vmem:[#allocation10 + $0x7a8] ss:$16 sps:$4 sm:$0xff]   ;;  %v8338_v57 = vld [vmem:[#allocation10 + $0x72c] ss:$16 sps:$4 sm:$0xff]  }
 0x444   :  { %7494 = vmatprep.subr.bf16.mxu0 %v8352_v45  ;;  %v8341_v45 = vld [vmem:[#allocation10 + $0x70c] ss:$16 sps:$4 sm:$0xff]  }
 0x446   :  { %6110 = vmatpush1.bf16.msra.mxu1 %v8261_v60  ;;  %v8327_v60 = vld [vmem:[#allocation10 + $0x788] ss:$16 sps:$4 sm:$0xff]  }
 0x447   :  { %6111 = vmatprep.subr.bf16.mxu1 %v8266_v30  ;;  %7495 = vmatpush3.bf16.msra.mxu0 %v8353_v40  ;;  %v8330_v30 = vld [vmem:[#allocation10 + $0x768] ss:$16 sps:$4 sm:$0xff]  }
 0x448   :  { %7496 = vmatprep.subr.bf16.mxu0 %v8354_v62  ;;  %v4592_v40 = vld [vmem:[%s8873_s5] sm:$0xf]  ;;  %v8369_v62 = vld [vmem:[#allocation11 + $0x90] sm:$0xff]   ;;  %s8558_s5 = smov [#allocation13]  }
 0x449   :  { %s6580_s1 = sshll.u32 %s8558_s5, 4  ;;  %s6581_s1 = int_to_ptr.vmem [resolvable:$true] %s6580_s1 }
 0x44a   :  { %6112 = vmatpush1.bf16.msra.mxu1 %v8264_v42  ;;  %v8333_v42 = vld [vmem:[#allocation10 + $0x748] ss:$16 sps:$4 sm:$0xff]   ;;  %s8494_s24 = scalar_lea.vmem %s6581_s1, 128  ;;  %p8499_p3 = scmp.lt.s32.totalorder %s6581_s1, %s6581_s1 }
 0x44b   :  { %6113 = vmatprep.subr.bf16.mxu1 %v8269_v44  ;;  %7497 = vmatpush3.bf16.msra.mxu0 %v8355_v0  ;;  %v8336_v44 = vld [vmem:[#allocation10 + $0x728] ss:$16 sps:$4 sm:$0xff]   ;;  %v4601_v0 = vrot.slane %v4592_v40, %v8651_v14  ;;  %p8495_p2 = scmp.ne.s32.totalorder %s6581_s1, %s8494_s24  ;;  %p8500_p4 = scmp.lt.s32.totalorder %s8494_s24, %s8494_s24 }
 0x44c   :  { %7498 = vmatprep.subr.bf16.mxu0 %v8356_v4 }
 0x44d   :  { %p8501_p5 = por %p8500_p4, %p8499_p3 }
 0x44e   :  { %6114 = vmatpush1.bf16.msra.mxu1 %v8267_v46  ;;  %v8339_v46 = vld [vmem:[#allocation10 + $0x708] ss:$16 sps:$4 sm:$0xff]  }
 0x44f   :  { %6115 = vmatprep.subr.bf16.mxu1 %v8272_v47  ;;  %7499 = vmatpush3.bf16.msra.mxu0 %v8357_v22  ;;  %v4605_v47 = vrot.slane %v4592_v40, %v8648_v12  ;;  %v8361_v12 = vld [vmem:[#allocation11 + $0xb0] sm:$0xff]   ;;  %p8502_p6 = pnand %p8501_p5, %p8495_p2 }
 0x452   :  { %6116 = vmatpush2.bf16.msra.mxu1 %v8270_v37  ;;  %v4609_v37 = vrot.slane %v4592_v40, %v8654_v15  ;;  %v8362_v15 = vld [vmem:[#allocation11 + $0xe8] sm:$0xff]  }
 0x453   :  { %6117 = vmatprep.subr.bf16.mxu1 %v8275_v48 }
 0x456   :  { %6118 = vmatpush2.bf16.msra.mxu1 %v8273_v17 }
 0x457   :  { %6119 = vmatprep.subr.bf16.mxu1 %v8278_v49 }
 0x45a   :  { %6120 = vmatpush2.bf16.msra.mxu1 %v8276_v34 }
 0x45b   :  { %6121 = vmatprep.subr.bf16.mxu1 %v8281_v50 }
 0x45e   :  { %6122 = vmatpush2.bf16.msra.mxu1 %v8279_v21 }
 0x45f   :  { %6123 = vmatprep.subr.bf16.mxu1 %v8284_v10 }
 0x462   :  { %6124 = vmatpush2.bf16.msra.mxu1 %v8282_v39 }
 0x463   :  { %6125 = vmatprep.subr.bf16.mxu1 %v8287_v52 }
 0x466   :  { %6126 = vmatpush2.bf16.msra.mxu1 %v8285_v53 }
 0x467   :  { %6127 = vmatprep.subr.bf16.mxu1 %v8290_v5  ;;  %v8358_v5 = vld [vmem:[#allocation11 + $0xf8] sm:$0xff]  }
 0x46a   :  { %6128 = vmatpush2.bf16.msra.mxu1 %v8288_v55  ;;  %v8359_v55 = vld [vmem:[#allocation11 + $0xb8] sm:$0xff]  }
 0x46b   :  { %6129 = vmatprep.subr.bf16.mxu1 %v8293_v56  ;;  %v8360_v56 = vld [vmem:[#allocation11 + $0xf0] sm:$0xff]  }
 0x46e   :  { %6130 = vmatpush2.bf16.msra.mxu1 %v8291_v2  ;;  %v8364_v2 = vld [vmem:[#allocation11 + $0xe0] sm:$0xff]  }
 0x46f   :  { %6181 = vmatprep.subr.bf16.mxu1 %v8296_v3  ;;  %v8365_v3 = vld [vmem:[#allocation11 + $0xa0] sm:$0xff]  }
 0x471   :  { %6132 = vmatmul.mubr.bf16.vlgmr.msra.gmra.mxu1 %v8811_v51  ;;  %v8836_v61 = vpop.f32.mrf.mxu0  ;;  %v8305_v51 = vld [vmem:[#allocation10 + $0x68c] ss:$16 sps:$4 sm:$0xff]  }
 0x472   :  { %6182 = vmatpush1.bf16.msra.mxu1 %v8294_v16  ;;  %6213 = vmatprep.mubr.bf16.mxu1 %v8823_v8  ;;  %v8303_v8 = vld [vmem:[#allocation10 + $0x688] ss:$16 sps:$4 sm:$0xff]  }
 0x473   :  { %6183 = vmatprep.subr.bf16.mxu1 %v8299_v59  ;;  %v8839_v9 = vpop.f32.mrf.mxu0  ;;  %v8366_v16 = vld [vmem:[#allocation11 + $0xd8] sm:$0xff]  }
 0x474   :  { %v8367_v59 = vld [vmem:[#allocation11 + $0x98] sm:$0xff]  }
 0x475   :  { %v6014_v43 = vpop.f32.mrf.mxu0 }
 0x476   :  { %6184 = vmatpush1.bf16.msra.mxu1 %v8297_v36  ;;  %v8368_v36 = vld [vmem:[#allocation11 + $0xd0] sm:$0xff]  }
 0x477   :  { %6185 = vmatprep.subr.bf16.mxu1 %v8302_v7  ;;  %v6015_v18 = vpop.f32.mrf.mxu0  ;;  %v4597_v7 = vrot.slane %v4592_v40, %v8645_v11 }
 0x479   :  { %v5929_v43 = vadd.f32 %v8830_v6, %v4597_v7 }
 0x47a   :  { %6186 = vmatpush1.bf16.msra.mxu1 %v8300_v58  ;;  %v5931_v58 = vadd.f32 %v8833_v41, %v4601_v0  ;;  %v8372_v41 = vld [vmem:[#allocation11 + $0xc0] sm:$0xff]  }
 0x47b   :  { %6187 = vmatprep.subr.bf16.mxu1 %v8305_v51 }
 0x47e   :  { %6188 = vmatpush1.bf16.msra.mxu1 %v8303_v8 }
 0x47f   :  { %6189 = vmatprep.subr.bf16.mxu1 %v8308_v23  ;;  %v8370_v23 = vld [vmem:[#allocation11 + $0xc8] sm:$0xff]  }
 0x482   :  { %6190 = vmatpush1.bf16.msra.mxu1 %v8306_v24 }
 0x483   :  { %6191 = vmatprep.subr.bf16.mxu1 %v8311_v13 }
 0x486   :  { %6192 = vmatpush1.bf16.msra.mxu1 %v8309_v25  ;;  %v8371_v25 = vld [vmem:[#allocation11 + $0x88] sm:$0xff]  }
 0x487   :  { %6193 = vmatprep.subr.bf16.mxu1 %v8314_v26 }
 0x48a   :  { %6194 = vmatpush1.bf16.msra.mxu1 %v8312_v20 }
 0x48b   :  { %6195 = vmatprep.subr.bf16.mxu1 %v8317_v27 }
 0x48e   :  { %6196 = vmatpush1.bf16.msra.mxu1 %v8315_v54 }
 0x48f   :  { %6197 = vmatprep.subr.bf16.mxu1 %v8320_v28  ;;  %v8373_v28 = vld [vmem:[#allocation11 + $0x80] sm:$0xff]  }
 0x492   :  { %6198 = vmatpush2.bf16.msra.mxu1 %v8318_v19 }
 0x493   :  { %6199 = vmatprep.subr.bf16.mxu1 %v8323_v29 }
 0x496   :  { %6200 = vmatpush2.bf16.msra.mxu1 %v8321_v31 }
 0x497   :  { %6201 = vmatprep.subr.bf16.mxu1 %v8326_v32 }
 0x49a   :  { %6202 = vmatpush2.bf16.msra.mxu1 %v8324_v33 }
 0x49b   :  { %6203 = vmatprep.subr.bf16.mxu1 %v8329_v38 }
 0x49e   :  { %6204 = vmatpush2.bf16.msra.mxu1 %v8327_v60 }
 0x49f   :  { %6205 = vmatprep.subr.bf16.mxu1 %v8332_v63 }
 0x4a2   :  { %6206 = vmatpush2.bf16.msra.mxu1 %v8330_v30 }
 0x4a3   :  { %6207 = vmatprep.subr.bf16.mxu1 %v8335_v35 }
 0x4a6   :  { %6208 = vmatpush2.bf16.msra.mxu1 %v8333_v42 }
 0x4a7   :  { %6209 = vmatprep.subr.bf16.mxu1 %v8338_v57 }
 0x4aa   :  { %6210 = vmatpush2.bf16.msra.mxu1 %v8336_v44 }
 0x4ab   :  { %6211 = vmatprep.subr.bf16.mxu1 %v8341_v45 }
 0x4ae   :  { %6212 = vmatpush2.bf16.msra.mxu1 %v8339_v46 }
 0x4af   :  { %7506 = vmatprep.subr.bf16.mxu1 %v8358_v5 }
 0x4b1   :  { %6214 = vmatmul.mubr.bf16.vlgmr.msra.gmra.mxu1 %v8825_v1  ;;  %v5969_v48 = vpop.f32.mrf.mxu1  ;;  %v6092_v17 = vpop.f32.mrf.mxu0  ;;  %v8363_v1 = vld [vmem:[#allocation11 + $0xa8] sm:$0xff]  }
 0x4b2   :  { %v8847_v49 = vadd.f32 %v6092_v17, %v4605_v47  ;;  %7507 = vmatpush3.bf16.msra.mxu1 %v8359_v55  ;;  %v5970_v4 = vadd.f32 %v5969_v48, %v5929_v43 }
 0x4b3   :  { %v5971_v34 = vpop.f32.mrf.mxu1  ;;  %v6094_v50 = vpop.f32.mrf.mxu0  ;;  %7508 = vmatprep.subr.bf16.mxu1 %v8360_v56 }
 0x4b4   :  { %v8849_v21 = vadd.f32 %v6094_v50, %v4609_v37  ;;  %v5972_v51 = vadd.f32 %v5971_v34, %v5931_v58  ;;  %v6011_v18 = vadd.f32 %v8836_v61, %v5970_v4 }
 0x4b5   :  { %v5973_v10 = vpop.f32.mrf.mxu1  ;;  %v6096_v39 = vpop.f32.mrf.mxu0 }
 0x4b6   :  { %7509 = vmatpush3.bf16.msra.mxu1 %v8361_v12  ;;  %v6013_v13 = vadd.f32 %v8839_v9, %v5972_v51 }
 0x4b7   :  { %v5974_v52 = vpop.f32.mrf.mxu1  ;;  %v6097_v53 = vpop.f32.mrf.mxu0  ;;  %7510 = vmatprep.subr.bf16.mxu1 %v8362_v15 }
 0x4ba   :  { %7511 = vmatpush3.bf16.msra.mxu1 %v8363_v1 }
 0x4bb   :  { %7512 = vmatprep.subr.bf16.mxu1 %v8364_v2 }
 0x4be   :  { %7513 = vmatpush3.bf16.msra.mxu1 %v8365_v3 }
 0x4bf   :  { %7514 = vmatprep.subr.bf16.mxu1 %v8366_v16 }
 0x4c2   :  { %7515 = vmatpush3.bf16.msra.mxu1 %v8367_v59 }
 0x4c3   :  { %7516 = vmatprep.subr.bf16.mxu1 %v8368_v36 }
 0x4c6   :  { %7517 = vmatpush3.bf16.msra.mxu1 %v8369_v62 }
 0x4c7   :  { %7518 = vmatprep.subr.bf16.mxu1 %v8370_v23 }
 0x4ca   :  { %7519 = vmatpush3.bf16.msra.mxu1 %v8371_v25 }
 0x4cb   :  { %7520 = vmatprep.subr.bf16.mxu1 %v8372_v41 }
 0x4ce   :  { %7521 = vmatpush3.bf16.msra.mxu1 %v8373_v28 }
 0x4f1   :  { %v6051_v22 = vpop.f32.mrf.mxu1  ;;  %v6174_v8 = vpop.f32.mrf.mxu0 }
 0x4f2   :  { %v6052_v24 = vadd.f32 %v6051_v22, %v6011_v18 }
 0x4f3   :  { %v6053_v26 = vpop.f32.mrf.mxu1  ;;  %v6176_v20 = vpop.f32.mrf.mxu0 }
 0x4f4   :  { %v6054_v11 = vadd.f32 %v6053_v26, %v6013_v13  ;;  %v6222_v14 = vmax.f32 %v6052_v24, 0.0 }
 0x4f5   :  { %v6055_v6 = vpop.f32.mrf.mxu1  ;;  %v6178_v27 = vpop.f32.mrf.mxu0 }
 0x4f6   :  { %v6223_v54 = vmax.f32 %v6054_v11, 0.0  ;;  %v6226_v31 = vpack.c.bf16 %v6222_v14, %v6222_v14 }
 0x4f7   :  { %v6056_v19 = vpop.f32.mrf.mxu1  ;;  %v6179_v61 = vpop.f32.mrf.mxu0 }
 0x4f8   :  { %v6227_v29 = vpack.c.bf16 %v6223_v54, %v6223_v54 }
 0x4fa   :  { %6525 = vmatprep.mubr.bf16.mxu0 %v6227_v29 }
 0x4fb   :  { %6526 = vmatmul.mubr.bf16.vlgmr.msra.gmra.mxu0 %v6226_v31 }
 0x531   :  { %v6133_v9 = vpop.f32.mrf.mxu1 }
 0x532   :  { %v6134_v60 = vadd.f32 %v6133_v9, %v8847_v49 }
 0x533   :  { %v6135_v32 = vpop.f32.mrf.mxu1 }
 0x534   :  { %v6136_v63 = vadd.f32 %v6135_v32, %v8849_v21  ;;  %v6175_v30 = vadd.f32 %v6174_v8, %v6134_v60 }
 0x535   :  { %v6137_v33 = vpop.f32.mrf.mxu1 }
 0x536   :  { %v6177_v57 = vadd.f32 %v6176_v20, %v6136_v63 }
 0x537   :  { %v6138_v38 = vpop.f32.mrf.mxu1 }
 0x571   :  { %v6215_v35 = vpop.f32.mrf.mxu1 }
 0x572   :  { %v6216_v42 = vadd.f32 %v6215_v35, %v6175_v30 }
 0x573   :  { %v6217_v44 = vpop.f32.mrf.mxu1 }
 0x574   :  { %v6218_v45 = vadd.f32 %v6217_v44, %v6177_v57  ;;  %v6224_v46 = vmax.f32 %v6216_v42, 0.0 }
 0x575   :  { %v6219_v40 = vpop.f32.mrf.mxu1 }
 0x576   :  { %v6225_v47 = vmax.f32 %v6218_v45, 0.0  ;;  %v6228_v17 = vpack.c.bf16 %v6224_v46, %v6224_v46 }
 0x577   :  { %v6220_v37 = vpop.f32.mrf.mxu1 }
 0x578   :  { %v6229_v48 = vpack.c.bf16 %v6225_v47, %v6225_v47 }
 0x57a   :  { %6565 = vmatprep.mubr.bf16.mxu1 %v6229_v48 }
 0x57b   :  { %6566 = vmatmul.mubr.bf16.vlgmr.msra.gmra.mxu1 %v6228_v17 }
 0x5bb   :  { %v7500_v34 = vpop.f32.mrf.mxu0 }
 0x5bd   :  { %v7501_v50 = vpop.f32.mrf.mxu0 }
 0x5be   :  { %v7502_v10 = vadd.f32 %v7501_v50, %v7500_v34 }
 0x5bf   :  { %v7503_v49 = vpop.f32.mrf.mxu0 }
 0x5c1   :  { %v7504_v39 = vpop.f32.mrf.mxu0 }
 0x5c2   :  { %8505 = shalt.err (!%p8502_p6)
}
 0x5c3   :  { %6583 = dma.vmem_to_hbm [thread:$0]  %s6581_s1, 128, %s8876_s8, [#allocation4]   ;;  %v7407_v21 = vld [vmem:[%s8875_s7] ss:$0 sm:$0xff] }
 0x5c4   :  { %s8559_s28 = smov [#allocation14]   ;;  %v6528_v5 = vadd.f32 %v7502_v10, %v7407_v21 }
 0x5c5   :  { %s6590_s29 = sshll.u32 %s8559_s28, 4  ;;  %s6591_s29 = int_to_ptr.vmem [resolvable:$true] %s6590_s29 }
 0x5c6   :  { %s8514_s30 = scalar_lea.vmem %s6591_s29, 128  ;;  %p8519_p8 = scmp.lt.s32.totalorder %s6591_s29, %s6591_s29 }
 0x5c7   :  { %p8515_p7 = scmp.ne.s32.totalorder %s6591_s29, %s8514_s30  ;;  %p8520_p9 = scmp.lt.s32.totalorder %s8514_s30, %s8514_s30 }
 0x5c9   :  { %p8521_p10 = por %p8520_p9, %p8519_p8 }
 0x5cb   :  { %p8522_p11 = pnand %p8521_p10, %p8515_p7 }
 0x63b   :  { %v7522_v52 = vpop.f32.mrf.mxu1 }
 0x63d   :  { %v7523_v53 = vpop.f32.mrf.mxu1 }
 0x63e   :  { %v7524_v55 = vadd.f32 %v7523_v53, %v7522_v52 }
 0x63f   :  { %v7525_v56 = vpop.f32.mrf.mxu1 }
 0x640   :  { %v6568_v12 = vadd.f32 %v7524_v55, %v6528_v5 }
 0x641   :  { %v7526_v15 = vpop.f32.mrf.mxu1 }
 0x642   :  { %6573 = vst [vmem:[#allocation14] sm:$0xff] %v6568_v12 }
 0x643   :  { %8525 = shalt.err (!%p8522_p11)
}
 0x644   :  { %6593 = dma.vmem_to_hbm [thread:$0]  %s6591_s29, 128, %s8877_s9, [#allocation15]  }
 0x645   :  { %8542 = dma.done.wait [#allocation4], 128  }
 0x646   :  { %8543 = vsyncadd [#allocation4], 4294967168 }
 0x647   :  { %8544 = dma.done.wait [#allocation15], 128  }
 0x648   :  { %8545 = vsyncadd [#allocation15], 4294967168 }
 0x649   :  { %6600 = vsyncpa [#allocation3], 1 }
 0x64a   :  { %6601 = vsyncpa [#allocation6], 1 }
 0x64b   :  { %6602 = vsyncpa [#allocation9], 1 }
 0x64c   :  { %6603 = vsyncpa [#allocation12], 1 }
 0x64d   :  { %6604 = vsyncpa [#allocation4], 1 }
 0x64e   :  { %6605 = vsyncpa [#allocation15], 1 }

</bundles_post_ra>
